<compile_context>
chip_gen: v7x
topology: tpu7x:2x2x1
jax: 0.10.0
libtpu: 0.0.40
codegen_flags: <defaults>
</compile_context>

<pallas_src>
import functools
import math

import jax
import jax.numpy as jnp
from jax.experimental import pallas as pl
from jax.experimental.pallas import tpu as pltpu

# ---- scaled-down ViT config (same topology as vit-base, small dims) ----
PATCH = 16
HIDDEN = 128
NUM_HEADS = 4
HEAD_DIM = HIDDEN // NUM_HEADS
INTERMEDIATE = 256
NUM_LAYERS = 2
NUM_CLASSES = 8
LN_EPS = 1e-12                        # HF ViT layer_norm_eps
IMG = 32
CHANNELS = 3
NUM_PATCHES = (IMG // PATCH) ** 2     # 4
SEQ = NUM_PATCHES + 1                 # 5 (CLS + patches)
SEQ_PAD = 8                           # sublane-aligned padded sequence
CLS_PAD = 128                         # lane-dense classifier output width
PATCH_DIM = CHANNELS * PATCH * PATCH  # 768
MAX_NB = 16                           # max images packed per grid step


# --------------------------- in-kernel helpers ---------------------------
def _layernorm(x, w, b):
    mu = jnp.mean(x, axis=-1, keepdims=True)
    var = jnp.mean(jnp.square(x - mu), axis=-1, keepdims=True)
    return (x - mu) * jax.lax.rsqrt(var + LN_EPS) * w + b


def _erf(x):
    # Abramowitz & Stegun 7.1.26 (|abs err| < 1.5e-7): only exp/mul/add/where,
    # so it lowers cleanly in Mosaic. Matches exact-GELU semantics of HF ViT
    # well within bf16-matmul tolerance.
    a1, a2, a3, a4, a5 = 0.254829592, -0.284496736, 1.421413741, -1.453152027, 1.061405429
    p = 0.3275911
    ax = jnp.abs(x)
    t = 1.0 / (1.0 + p * ax)
    poly = ((((a5 * t + a4) * t + a3) * t + a2) * t + a1) * t
    y = 1.0 - poly * jnp.exp(-ax * ax)
    return jnp.where(x >= 0, y, -y)


def _gelu(x):
    # exact (erf-based) GELU, matching nn.GELU() used by HF ViT ("gelu")
    return 0.5 * x * (1.0 + _erf(x * (1.0 / math.sqrt(2.0))))


# --------------------------- fused ViT kernel ---------------------------
def vit_kernel(
    nb,                         # static: images per grid step
    patches_ref,                # (nb*SEQ_PAD, PATCH_DIM) bf16 (pre-padded rows)
    pw_ref,                     # (PATCH_DIM, H) bf16
    base_ref,                   # (nb*SEQ_PAD, H) f32 : cls/pos/patch-bias base
    ln1w_ref, ln1b_ref,         # (L, 1, H) f32
    wqkv_ref, bqkv_ref,         # (L, H, 3H) bf16, (L, 1, 3H) f32 (scale folded)
    wo_ref, bo_ref,             # (L, H, H) bf16, (L, 1, H) f32
    ln2w_ref, ln2b_ref,         # (L, 1, H) f32
    w1_ref, b1_ref,             # (L, H, I) bf16, (L, 1, I) f32
    w2_ref, b2_ref,             # (L, I, H) bf16, (L, 1, H) f32
    lnf_w_ref, lnf_b_ref,       # (1, H) f32
    wc_ref, bc_ref,             # (H, CLS_PAD) bf16, (1, CLS_PAD) f32
    o_ref,                      # (nb*SEQ_PAD, CLS_PAD) f32
):
    m = nb * SEQ_PAD

    # --- patch embedding + token assembly: one aligned matmul + one add ---
    # base already holds [CLS+pos0, pos_i+patch_bias, 0-pad] per image.
    x = base_ref[...] + jnp.dot(patches_ref[...], pw_ref[...],
                                preferred_element_type=jnp.float32)   # (m, H) f32

    # additive key-padding bias (padded key columns never attended to)
    key_id = jax.lax.broadcasted_iota(jnp.int32, (1, SEQ_PAD), 1)
    mask_bias = jnp.where(key_id < SEQ, 0.0, -1e30).astype(jnp.float32)  # (1, S)

    for l in range(NUM_LAYERS):            # static unroll (NUM_LAYERS = 2)
        # ----- self-attention block (pre-LN) -----
        h = _layernorm(x, ln1w_ref[l], ln1b_ref[l]).astype(jnp.bfloat16)   # (m, H)
        # fused lane-dense QKV projection: one (m,128)x(128,384) dot
        qkv = jnp.dot(h, wqkv_ref[l],
                      preferred_element_type=jnp.float32) + bqkv_ref[l]    # (m, 3H)
        qkv = qkv.astype(jnp.bfloat16).reshape(nb, SEQ_PAD, 3 * HIDDEN)

        ctx_parts = []
        for hh in range(NUM_HEADS):        # static, tiny per-head score matmuls
            qo = hh * HEAD_DIM
            q = qkv[:, :, qo:qo + HEAD_DIM]                           # (nb, S, D)
            k = qkv[:, :, HIDDEN + qo:HIDDEN + qo + HEAD_DIM]
            v = qkv[:, :, 2 * HIDDEN + qo:2 * HIDDEN + qo + HEAD_DIM]
            # scale already folded into Q weights/bias
            s = jnp.einsum('bqd,bkd->bqk', q, k,
                           preferred_element_type=jnp.float32)        # (nb, S, S)
            s = s + mask_bias
            s = s - jnp.max(s, axis=-1, keepdims=True)
            p_att = jnp.exp(s)
            denom = jnp.sum(p_att, axis=-1, keepdims=True)
            p_att = p_att * pl.reciprocal(denom, approx=True)
            ctx_h = jnp.einsum('bqk,bkd->bqd', p_att.astype(jnp.bfloat16), v,
                               preferred_element_type=jnp.float32)    # (nb, S, D)
            ctx_parts.append(ctx_h.astype(jnp.bfloat16))

        # merge heads along lanes -> single K=128 output projection
        ctx = jnp.concatenate(ctx_parts, axis=-1).reshape(m, HIDDEN)  # (m, H) bf16
        attn_out = jnp.dot(ctx, wo_ref[l],
                           preferred_element_type=jnp.float32) + bo_ref[l]
        x = x + attn_out                                              # residual

        # ----- MLP block (pre-LN) -----
        h2 = _layernorm(x, ln2w_ref[l], ln2b_ref[l]).astype(jnp.bfloat16)
        inter = _gelu(jnp.dot(h2, w1_ref[l],
                              preferred_element_type=jnp.float32) + b1_ref[l])
        mlp = jnp.dot(inter.astype(jnp.bfloat16), w2_ref[l],
                      preferred_element_type=jnp.float32) + b2_ref[l]
        x = x + mlp                                                   # residual

    # ----- final LayerNorm + classifier (all rows, lane-dense store) -----
    y = _layernorm(x, lnf_w_ref[...], lnf_b_ref[...]).astype(jnp.bfloat16)
    o_ref[...] = jnp.dot(y, wc_ref[...],
                         preferred_element_type=jnp.float32) + bc_ref[...]


# --------------------------- parameters ---------------------------
def init_params(key):
    keys = iter(jax.random.split(key, 64))

    def nrm(shape, scale=0.02):
        return (scale * jax.random.normal(next(keys), shape)).astype(jnp.float32)

    params = {
        "patch_w": nrm((HIDDEN, CHANNELS, PATCH, PATCH)),  # Conv2d weight (OIHW)
        "patch_b": jnp.zeros((1, HIDDEN), jnp.float32),
        "cls_tok": nrm((1, 1, HIDDEN)),
        "pos_emb": nrm((1, SEQ, HIDDEN)),
        "ln_w": jnp.ones((1, HIDDEN), jnp.float32),
        "ln_b": jnp.zeros((1, HIDDEN), jnp.float32),
        "cls_w": nrm((HIDDEN, NUM_CLASSES)),
        "cls_b": jnp.zeros((1, NUM_CLASSES), jnp.float32),
        "layers": [],
    }
    for _ in range(NUM_LAYERS):
        params["layers"].append({
            "ln1_w": jnp.ones((1, HIDDEN), jnp.float32),
            "ln1_b": jnp.zeros((1, HIDDEN), jnp.float32),
            "wq": nrm((HIDDEN, HIDDEN)), "bq": jnp.zeros((1, HIDDEN), jnp.float32),
            "wk": nrm((HIDDEN, HIDDEN)), "bk": jnp.zeros((1, HIDDEN), jnp.float32),
            "wv": nrm((HIDDEN, HIDDEN)), "bv": jnp.zeros((1, HIDDEN), jnp.float32),
            "wo": nrm((HIDDEN, HIDDEN)), "bo": jnp.zeros((1, HIDDEN), jnp.float32),
            "ln2_w": jnp.ones((1, HIDDEN), jnp.float32),
            "ln2_b": jnp.zeros((1, HIDDEN), jnp.float32),
            "w1": nrm((HIDDEN, INTERMEDIATE)),
            "b1": jnp.zeros((1, INTERMEDIATE), jnp.float32),
            "w2": nrm((INTERMEDIATE, HIDDEN)),
            "b2": jnp.zeros((1, HIDDEN), jnp.float32),
        })
    return params


def prepare_params(params):
    """One-time restructuring for the fused kernel:
       * patch conv -> (PATCH_DIM, H) bf16 matmul weight
       * CLS + pos-emb + patch-bias folded into a (SEQ_PAD, H) base tensor
       * per-layer weights stacked along a layer axis
       * QKV fused to (H, 3H) with 1/sqrt(HEAD_DIM) folded into Q columns
       * matmul weights cast to bf16, biases/LN params kept f32
       * classifier padded to 128 output lanes."""
    pw = params["patch_w"].reshape(HIDDEN, PATCH_DIM).T.astype(jnp.bfloat16)

    cls = params["cls_tok"].reshape(1, HIDDEN)
    pos = params["pos_emb"].reshape(SEQ, HIDDEN)
    base = jnp.concatenate(
        [cls + pos[0:1],                                    # CLS row
         pos[1:1 + NUM_PATCHES] + params["patch_b"],        # patch rows (+conv bias)
         jnp.zeros((SEQ_PAD - SEQ, HIDDEN), jnp.float32)],  # padded rows
        axis=0)                                             # (SEQ_PAD, H)

    scale = 1.0 / math.sqrt(HEAD_DIM)

    def stack(name):
        return jnp.stack([lp[name] for lp in params["layers"]], axis=0)

    wqkv = jnp.stack(
        [jnp.concatenate([lp["wq"] * scale, lp["wk"], lp["wv"]], axis=1)
         for lp in params["layers"]], axis=0).astype(jnp.bfloat16)       # (L, H, 3H)
    bqkv = jnp.stack(
        [jnp.concatenate([lp["bq"] * scale, lp["bk"], lp["bv"]], axis=1)
         for lp in params["layers"]], axis=0).astype(jnp.float32)        # (L, 1, 3H)

    return {
        "pw": pw,
        "base": base,
        "ln1w": stack("ln1_w"), "ln1b": stack("ln1_b"),
        "wqkv": wqkv, "bqkv": bqkv,
        "wo": stack("wo").astype(jnp.bfloat16), "bo": stack("bo"),
        "ln2w": stack("ln2_w"), "ln2b": stack("ln2_b"),
        "w1": stack("w1").astype(jnp.bfloat16), "b1": stack("b1"),
        "w2": stack("w2").astype(jnp.bfloat16), "b2": stack("b2"),
        "lnf_w": params["ln_w"], "lnf_b": params["ln_b"],
        "wc": jnp.pad(params["cls_w"],
                      ((0, 0), (0, CLS_PAD - NUM_CLASSES))).astype(jnp.bfloat16),
        "bc": jnp.pad(params["cls_b"], ((0, 0), (0, CLS_PAD - NUM_CLASSES))),
    }


# --------------------------- forward ---------------------------
def _full_spec(a):
    rank = a.ndim
    return pl.BlockSpec(a.shape, lambda b, _r=rank: (0,) * _r)


def _choose_nb(batch):
    """Images per grid step: largest divisor of batch <= MAX_NB, preferring
    a grid of >= 2 steps (so both TensorCores get work on v7x)."""
    divisors = [d for d in range(1, batch + 1) if batch % d == 0 and d <= MAX_NB]
    multi_step = [d for d in divisors if batch // d >= 2]
    return max(multi_step) if multi_step else max(divisors)


@jax.jit
def vit_forward(prepared, x):
    # x: (B, C, H, W) NCHW, matching the PyTorch module input
    B, C, Hi, Wi = x.shape
    Hp, Wp = Hi // PATCH, Wi // PATCH
    nb = _choose_nb(B)                      # static under jit
    m = nb * SEQ_PAD

    # Conv2d(kernel=stride=PATCH) == non-overlapping patch extraction (layout only)
    patches = x.reshape(B, C, Hp, PATCH, Wp, PATCH)
    patches = patches.transpose(0, 2, 4, 1, 3, 5)                 # (B,Hp,Wp,C,P,P)
    patches = patches.reshape(B, Hp * Wp, PATCH_DIM)              # (B, Np, K)
    # pre-pad to SEQ_PAD token rows (zero CLS row + zero pad rows), bf16 stream
    patches = jnp.pad(patches, ((0, 0), (1, SEQ_PAD - 1 - NUM_PATCHES), (0, 0)))
    patches = patches.astype(jnp.bfloat16).reshape(B * SEQ_PAD, PATCH_DIM)

    base_tiled = jnp.tile(prepared["base"], (nb, 1))              # (m, H) f32

    args = [
        patches,
        prepared["pw"], base_tiled,
        prepared["ln1w"], prepared["ln1b"],
        prepared["wqkv"], prepared["bqkv"],
        prepared["wo"], prepared["bo"],
        prepared["ln2w"], prepared["ln2b"],
        prepared["w1"], prepared["b1"],
        prepared["w2"], prepared["b2"],
        prepared["lnf_w"], prepared["lnf_b"],
        prepared["wc"], prepared["bc"],
    ]
    in_specs = [pl.BlockSpec((m, PATCH_DIM), lambda b: (b, 0))]
    in_specs += [_full_spec(a) for a in args[1:]]

    out = pl.pallas_call(
        functools.partial(vit_kernel, nb),
        out_shape=jax.ShapeDtypeStruct((B * SEQ_PAD, CLS_PAD), jnp.float32),
        grid=(B // nb,),
        in_specs=in_specs,
        out_specs=pl.BlockSpec((m, CLS_PAD), lambda b: (b, 0)),
        compiler_params=pltpu.CompilerParams(
            dimension_semantics=("parallel",),
            vmem_limit_bytes=32 * 1024 * 1024),
    )(*args)

    # CLS row per image, real classes only
    return out.reshape(B, SEQ_PAD, CLS_PAD)[:, 0, :NUM_CLASSES]


# TODO(synk): pretrained-checkpoint loading (from_pretrained) has no Pallas
# equivalent; weights are deterministically random-initialized in-script.

if __name__ == "__main__":
    key = jax.random.PRNGKey(0)
    pkey, xkey = jax.random.split(key)
    params = init_params(pkey)
    prepared = prepare_params(params)

    B = 8  # packs 4 images per grid step -> grid=(2,) (both TCs busy on v7x)
    x = jax.random.normal(xkey, (B, CHANNELS, IMG, IMG), dtype=jnp.float32)

    logits = vit_forward(prepared, x)
    jax.block_until_ready(logits)
    assert logits.shape == (B, NUM_CLASSES)
    assert logits.dtype == jnp.float32
    assert bool(jnp.all(jnp.isfinite(logits)))
    print("KERNEL_OK")
</pallas_src>

<mosaic_0001>
module attributes {stable_mosaic.version = 11 : i64} {
  func.func @vit_kernel(%arg0: i32, %arg1: memref<32x768xbf16, #tpu.memory_space<vmem>>, %arg2: memref<768x128xbf16, #tpu.memory_space<vmem>>, %arg3: memref<32x128xf32, #tpu.memory_space<vmem>>, %arg4: memref<2x1x128xf32, #tpu.memory_space<vmem>>, %arg5: memref<2x1x128xf32, #tpu.memory_space<vmem>>, %arg6: memref<2x128x384xbf16, #tpu.memory_space<vmem>>, %arg7: memref<2x1x384xf32, #tpu.memory_space<vmem>>, %arg8: memref<2x128x128xbf16, #tpu.memory_space<vmem>>, %arg9: memref<2x1x128xf32, #tpu.memory_space<vmem>>, %arg10: memref<2x1x128xf32, #tpu.memory_space<vmem>>, %arg11: memref<2x1x128xf32, #tpu.memory_space<vmem>>, %arg12: memref<2x128x256xbf16, #tpu.memory_space<vmem>>, %arg13: memref<2x1x256xf32, #tpu.memory_space<vmem>>, %arg14: memref<2x256x128xbf16, #tpu.memory_space<vmem>>, %arg15: memref<2x1x128xf32, #tpu.memory_space<vmem>>, %arg16: memref<1x128xf32, #tpu.memory_space<vmem>>, %arg17: memref<1x128xf32, #tpu.memory_space<vmem>>, %arg18: memref<128x128xbf16, #tpu.memory_space<vmem>>, %arg19: memref<1x128xf32, #tpu.memory_space<vmem>>, %arg20: memref<32x128xf32, #tpu.memory_space<vmem>>) attributes {dimension_semantics = [#tpu.dimension_semantics<parallel>], iteration_bounds = array<i64: 2>, scalar_prefetch = 0 : i64, scratch_operands = 0 : i64, tpu.core_type = #tpu.core_type<tc>, window_params = [{transform_indices = @transform_0, window_bounds = array<i64: 32, 768>}, {pipeline_mode = #tpu.pipeline_mode<synchronous>, transform_indices = @transform_1, window_bounds = array<i64: 768, 128>}, {pipeline_mode = #tpu.pipeline_mode<synchronous>, transform_indices = @transform_2, window_bounds = array<i64: 32, 128>}, {pipeline_mode = #tpu.pipeline_mode<synchronous>, transform_indices = @transform_3, window_bounds = array<i64: 2, 1, 128>}, {pipeline_mode = #tpu.pipeline_mode<synchronous>, transform_indices = @transform_4, window_bounds = array<i64: 2, 1, 128>}, {pipeline_mode = #tpu.pipeline_mode<synchronous>, transform_indices = @transform_5, window_bounds = array<i64: 2, 128, 384>}, {pipeline_mode = #tpu.pipeline_mode<synchronous>, transform_indices = @transform_6, window_bounds = array<i64: 2, 1, 384>}, {pipeline_mode = #tpu.pipeline_mode<synchronous>, transform_indices = @transform_7, window_bounds = array<i64: 2, 128, 128>}, {pipeline_mode = #tpu.pipeline_mode<synchronous>, transform_indices = @transform_8, window_bounds = array<i64: 2, 1, 128>}, {pipeline_mode = #tpu.pipeline_mode<synchronous>, transform_indices = @transform_9, window_bounds = array<i64: 2, 1, 128>}, {pipeline_mode = #tpu.pipeline_mode<synchronous>, transform_indices = @transform_10, window_bounds = array<i64: 2, 1, 128>}, {pipeline_mode = #tpu.pipeline_mode<synchronous>, transform_indices = @transform_11, window_bounds = array<i64: 2, 128, 256>}, {pipeline_mode = #tpu.pipeline_mode<synchronous>, transform_indices = @transform_12, window_bounds = array<i64: 2, 1, 256>}, {pipeline_mode = #tpu.pipeline_mode<synchronous>, transform_indices = @transform_13, window_bounds = array<i64: 2, 256, 128>}, {pipeline_mode = #tpu.pipeline_mode<synchronous>, transform_indices = @transform_14, window_bounds = array<i64: 2, 1, 128>}, {pipeline_mode = #tpu.pipeline_mode<synchronous>, transform_indices = @transform_15, window_bounds = array<i64: 1, 128>}, {pipeline_mode = #tpu.pipeline_mode<synchronous>, transform_indices = @transform_16, window_bounds = array<i64: 1, 128>}, {pipeline_mode = #tpu.pipeline_mode<synchronous>, transform_indices = @transform_17, window_bounds = array<i64: 128, 128>}, {pipeline_mode = #tpu.pipeline_mode<synchronous>, transform_indices = @transform_18, window_bounds = array<i64: 1, 128>}, {transform_indices = @transform_19, window_bounds = array<i64: 32, 128>}]} {
    %c0 = arith.constant 0 : index
    %c0_0 = arith.constant 0 : index
    %0 = vector.load %arg3[%c0, %c0_0] : memref<32x128xf32, #tpu.memory_space<vmem>>, vector<32x128xf32>
    %c0_1 = arith.constant 0 : index
    %c0_2 = arith.constant 0 : index
    %1 = vector.load %arg1[%c0_1, %c0_2] : memref<32x768xbf16, #tpu.memory_space<vmem>>, vector<32x768xbf16>
    %c0_3 = arith.constant 0 : index
    %c0_4 = arith.constant 0 : index
    %2 = vector.load %arg2[%c0_3, %c0_4] : memref<768x128xbf16, #tpu.memory_space<vmem>>, vector<768x128xbf16>
    %cst = arith.constant dense<0.000000e+00> : vector<32x128xf32>
    %3 = tpu.matmul %1, %2, %cst {dimension_numbers = #tpu.dot_dimension_numbers<[1], [0], [0], [1], [0, 0, 1, 1], [], []>} : vector<32x768xbf16>, vector<768x128xbf16>, vector<32x128xf32> -> vector<32x128xf32>
    %4 = arith.addf %0, %3 : vector<32x128xf32>
    %5 = tpu.iota {dimensions = array<i32: 1>} : vector<1x8xi32>
    %c5_i32 = arith.constant 5 : i32
    %6 = vector.broadcast %c5_i32 : i32 to vector<1x8xi32>
    %7 = arith.cmpi slt, %5, %6 : vector<1x8xi32>
    %cst_5 = arith.constant 0.000000e+00 : f32
    %cst_6 = arith.constant -1.000000e+30 : f32
    %8 = vector.broadcast %cst_5 : f32 to vector<1x8xf32>
    %9 = vector.broadcast %cst_6 : f32 to vector<1x8xf32>
    %10 = arith.select %7, %8, %9 : vector<1x8xi1>, vector<1x8xf32>
    %c0_7 = arith.constant 0 : index
    %c0_8 = arith.constant 0 : index
    %c0_9 = arith.constant 0 : index
    %11 = vector.load %arg4[%c0_7, %c0_8, %c0_9] : memref<2x1x128xf32, #tpu.memory_space<vmem>>, vector<1x1x128xf32>
    %12 = vector.shape_cast %11 : vector<1x1x128xf32> to vector<1x128xf32>
    %c0_10 = arith.constant 0 : index
    %c0_11 = arith.constant 0 : index
    %c0_12 = arith.constant 0 : index
    %13 = vector.load %arg5[%c0_10, %c0_11, %c0_12] : memref<2x1x128xf32, #tpu.memory_space<vmem>>, vector<1x1x128xf32>
    %14 = vector.shape_cast %13 : vector<1x1x128xf32> to vector<1x128xf32>
    %cst_13 = arith.constant dense<0.000000e+00> : vector<32xf32>
    %15 = vector.multi_reduction <add>, %4, %cst_13 [1] : vector<32x128xf32> to vector<32xf32>
    %16 = vector.shape_cast %15 : vector<32xf32> to vector<32x1xf32>
    %cst_14 = arith.constant 1.280000e+02 : f32
    %17 = vector.broadcast %cst_14 : f32 to vector<32x1xf32>
    %18 = arith.divf %16, %17 : vector<32x1xf32>
    %19 = vector.broadcast %18 : vector<32x1xf32> to vector<32x128xf32>
    %20 = arith.subf %4, %19 : vector<32x128xf32>
    %21 = arith.mulf %20, %20 : vector<32x128xf32>
    %cst_15 = arith.constant dense<0.000000e+00> : vector<32xf32>
    %22 = vector.multi_reduction <add>, %21, %cst_15 [1] : vector<32x128xf32> to vector<32xf32>
    %23 = vector.shape_cast %22 : vector<32xf32> to vector<32x1xf32>
    %cst_16 = arith.constant 1.280000e+02 : f32
    %24 = vector.broadcast %cst_16 : f32 to vector<32x1xf32>
    %25 = arith.divf %23, %24 : vector<32x1xf32>
    %26 = vector.broadcast %18 : vector<32x1xf32> to vector<32x128xf32>
    %27 = arith.subf %4, %26 : vector<32x128xf32>
    %cst_17 = arith.constant 9.99999996E-13 : f32
    %28 = vector.broadcast %cst_17 : f32 to vector<32x1xf32>
    %29 = arith.addf %25, %28 : vector<32x1xf32>
    %30 = math.rsqrt %29 : vector<32x1xf32>
    %31 = vector.broadcast %30 : vector<32x1xf32> to vector<32x128xf32>
    %32 = arith.mulf %27, %31 : vector<32x128xf32>
    %33 = vector.broadcast %12 : vector<1x128xf32> to vector<32x128xf32>
    %34 = arith.mulf %32, %33 : vector<32x128xf32>
    %35 = vector.broadcast %14 : vector<1x128xf32> to vector<32x128xf32>
    %36 = arith.addf %34, %35 : vector<32x128xf32>
    %37 = arith.truncf %36 : vector<32x128xf32> to vector<32x128xbf16>
    %c0_18 = arith.constant 0 : index
    %c0_19 = arith.constant 0 : index
    %c0_20 = arith.constant 0 : index
    %38 = vector.load %arg6[%c0_18, %c0_19, %c0_20] : memref<2x128x384xbf16, #tpu.memory_space<vmem>>, vector<1x128x384xbf16>
    %39 = vector.shape_cast %38 : vector<1x128x384xbf16> to vector<128x384xbf16>
    %cst_21 = arith.constant dense<0.000000e+00> : vector<32x384xf32>
    %40 = tpu.matmul %37, %39, %cst_21 {dimension_numbers = #tpu.dot_dimension_numbers<[1], [0], [0], [1], [0, 0, 1, 1], [], []>} : vector<32x128xbf16>, vector<128x384xbf16>, vector<32x384xf32> -> vector<32x384xf32>
    %c0_22 = arith.constant 0 : index
    %c0_23 = arith.constant 0 : index
    %c0_24 = arith.constant 0 : index
    %41 = vector.load %arg7[%c0_22, %c0_23, %c0_24] : memref<2x1x384xf32, #tpu.memory_space<vmem>>, vector<1x1x384xf32>
    %42 = vector.shape_cast %41 : vector<1x1x384xf32> to vector<1x384xf32>
    %43 = vector.broadcast %42 : vector<1x384xf32> to vector<32x384xf32>
    %44 = arith.addf %40, %43 : vector<32x384xf32>
    %45 = arith.truncf %44 : vector<32x384xf32> to vector<32x384xbf16>
    %46 = vector.shape_cast %45 : vector<32x384xbf16> to vector<4x8x384xbf16>
    %47 = vector.extract_strided_slice %46 {offsets = [0, 0, 0], sizes = [4, 8, 32], strides = [1, 1, 1]} : vector<4x8x384xbf16> to vector<4x8x32xbf16>
    %48 = vector.extract_strided_slice %46 {offsets = [0, 0, 128], sizes = [4, 8, 32], strides = [1, 1, 1]} : vector<4x8x384xbf16> to vector<4x8x32xbf16>
    %49 = vector.extract_strided_slice %46 {offsets = [0, 0, 256], sizes = [4, 8, 32], strides = [1, 1, 1]} : vector<4x8x384xbf16> to vector<4x8x32xbf16>
    "tpu.trace_start"() <{level = 10 : i32, message = "bqd,bkd->bqk"}> : () -> ()
    %cst_25 = arith.constant dense<0.000000e+00> : vector<4x8x8xf32>
    %50 = tpu.matmul %47, %48, %cst_25 {dimension_numbers = #tpu.dot_dimension_numbers<[2], [2], [1], [1], [0, 0, 0, 1, 1, 1], [0], [0]>} : vector<4x8x32xbf16>, vector<4x8x32xbf16>, vector<4x8x8xf32> -> vector<4x8x8xf32>
    "tpu.trace_stop"() : () -> ()
    %51 = vector.shape_cast %10 : vector<1x8xf32> to vector<1x1x8xf32>
    %52 = vector.broadcast %51 : vector<1x1x8xf32> to vector<4x8x8xf32>
    %53 = arith.addf %50, %52 : vector<4x8x8xf32>
    %cst_26 = arith.constant dense<0xFF800000> : vector<4x8xf32>
    %54 = vector.multi_reduction <maximumf>, %53, %cst_26 [2] : vector<4x8x8xf32> to vector<4x8xf32>
    %55 = vector.shape_cast %54 : vector<4x8xf32> to vector<4x8x1xf32>
    %56 = vector.broadcast %55 : vector<4x8x1xf32> to vector<4x8x8xf32>
    %57 = arith.subf %53, %56 : vector<4x8x8xf32>
    %58 = math.exp %57 : vector<4x8x8xf32>
    %cst_27 = arith.constant dense<0.000000e+00> : vector<4x8xf32>
    %59 = vector.multi_reduction <add>, %58, %cst_27 [2] : vector<4x8x8xf32> to vector<4x8xf32>
    %60 = vector.shape_cast %59 : vector<4x8xf32> to vector<4x8x1xf32>
    %61 = tpu.reciprocal %60 {approx = true} : vector<4x8x1xf32> -> vector<4x8x1xf32>
    %62 = vector.broadcast %61 : vector<4x8x1xf32> to vector<4x8x8xf32>
    %63 = arith.mulf %58, %62 : vector<4x8x8xf32>
    %64 = arith.truncf %63 : vector<4x8x8xf32> to vector<4x8x8xbf16>
    "tpu.trace_start"() <{level = 10 : i32, message = "bqk,bkd->bqd"}> : () -> ()
    %cst_28 = arith.constant dense<0.000000e+00> : vector<4x8x32xf32>
    %65 = tpu.matmul %64, %49, %cst_28 {dimension_numbers = #tpu.dot_dimension_numbers<[2], [1], [1], [2], [0, 0, 0, 1, 1, 2], [0], [0]>} : vector<4x8x8xbf16>, vector<4x8x32xbf16>, vector<4x8x32xf32> -> vector<4x8x32xf32>
    "tpu.trace_stop"() : () -> ()
    %66 = arith.truncf %65 : vector<4x8x32xf32> to vector<4x8x32xbf16>
    %67 = vector.extract_strided_slice %46 {offsets = [0, 0, 32], sizes = [4, 8, 32], strides = [1, 1, 1]} : vector<4x8x384xbf16> to vector<4x8x32xbf16>
    %68 = vector.extract_strided_slice %46 {offsets = [0, 0, 160], sizes = [4, 8, 32], strides = [1, 1, 1]} : vector<4x8x384xbf16> to vector<4x8x32xbf16>
    %69 = vector.extract_strided_slice %46 {offsets = [0, 0, 288], sizes = [4, 8, 32], strides = [1, 1, 1]} : vector<4x8x384xbf16> to vector<4x8x32xbf16>
    "tpu.trace_start"() <{level = 10 : i32, message = "bqd,bkd->bqk"}> : () -> ()
    %cst_29 = arith.constant dense<0.000000e+00> : vector<4x8x8xf32>
    %70 = tpu.matmul %67, %68, %cst_29 {dimension_numbers = #tpu.dot_dimension_numbers<[2], [2], [1], [1], [0, 0, 0, 1, 1, 1], [0], [0]>} : vector<4x8x32xbf16>, vector<4x8x32xbf16>, vector<4x8x8xf32> -> vector<4x8x8xf32>
    "tpu.trace_stop"() : () -> ()
    %71 = vector.shape_cast %10 : vector<1x8xf32> to vector<1x1x8xf32>
    %72 = vector.broadcast %71 : vector<1x1x8xf32> to vector<4x8x8xf32>
    %73 = arith.addf %70, %72 : vector<4x8x8xf32>
    %cst_30 = arith.constant dense<0xFF800000> : vector<4x8xf32>
    %74 = vector.multi_reduction <maximumf>, %73, %cst_30 [2] : vector<4x8x8xf32> to vector<4x8xf32>
    %75 = vector.shape_cast %74 : vector<4x8xf32> to vector<4x8x1xf32>
    %76 = vector.broadcast %75 : vector<4x8x1xf32> to vector<4x8x8xf32>
    %77 = arith.subf %73, %76 : vector<4x8x8xf32>
    %78 = math.exp %77 : vector<4x8x8xf32>
    %cst_31 = arith.constant dense<0.000000e+00> : vector<4x8xf32>
    %79 = vector.multi_reduction <add>, %78, %cst_31 [2] : vector<4x8x8xf32> to vector<4x8xf32>
    %80 = vector.shape_cast %79 : vector<4x8xf32> to vector<4x8x1xf32>
    %81 = tpu.reciprocal %80 {approx = true} : vector<4x8x1xf32> -> vector<4x8x1xf32>
    %82 = vector.broadcast %81 : vector<4x8x1xf32> to vector<4x8x8xf32>
    %83 = arith.mulf %78, %82 : vector<4x8x8xf32>
    %84 = arith.truncf %83 : vector<4x8x8xf32> to vector<4x8x8xbf16>
    "tpu.trace_start"() <{level = 10 : i32, message = "bqk,bkd->bqd"}> : () -> ()
    %cst_32 = arith.constant dense<0.000000e+00> : vector<4x8x32xf32>
    %85 = tpu.matmul %84, %69, %cst_32 {dimension_numbers = #tpu.dot_dimension_numbers<[2], [1], [1], [2], [0, 0, 0, 1, 1, 2], [0], [0]>} : vector<4x8x8xbf16>, vector<4x8x32xbf16>, vector<4x8x32xf32> -> vector<4x8x32xf32>
    "tpu.trace_stop"() : () -> ()
    %86 = arith.truncf %85 : vector<4x8x32xf32> to vector<4x8x32xbf16>
    %87 = vector.extract_strided_slice %46 {offsets = [0, 0, 64], sizes = [4, 8, 32], strides = [1, 1, 1]} : vector<4x8x384xbf16> to vector<4x8x32xbf16>
    %88 = vector.extract_strided_slice %46 {offsets = [0, 0, 192], sizes = [4, 8, 32], strides = [1, 1, 1]} : vector<4x8x384xbf16> to vector<4x8x32xbf16>
    %89 = vector.extract_strided_slice %46 {offsets = [0, 0, 320], sizes = [4, 8, 32], strides = [1, 1, 1]} : vector<4x8x384xbf16> to vector<4x8x32xbf16>
    "tpu.trace_start"() <{level = 10 : i32, message = "bqd,bkd->bqk"}> : () -> ()
    %cst_33 = arith.constant dense<0.000000e+00> : vector<4x8x8xf32>
    %90 = tpu.matmul %87, %88, %cst_33 {dimension_numbers = #tpu.dot_dimension_numbers<[2], [2], [1], [1], [0, 0, 0, 1, 1, 1], [0], [0]>} : vector<4x8x32xbf16>, vector<4x8x32xbf16>, vector<4x8x8xf32> -> vector<4x8x8xf32>
    "tpu.trace_stop"() : () -> ()
    %91 = vector.shape_cast %10 : vector<1x8xf32> to vector<1x1x8xf32>
    %92 = vector.broadcast %91 : vector<1x1x8xf32> to vector<4x8x8xf32>
    %93 = arith.addf %90, %92 : vector<4x8x8xf32>
    %cst_34 = arith.constant dense<0xFF800000> : vector<4x8xf32>
    %94 = vector.multi_reduction <maximumf>, %93, %cst_34 [2] : vector<4x8x8xf32> to vector<4x8xf32>
    %95 = vector.shape_cast %94 : vector<4x8xf32> to vector<4x8x1xf32>
    %96 = vector.broadcast %95 : vector<4x8x1xf32> to vector<4x8x8xf32>
    %97 = arith.subf %93, %96 : vector<4x8x8xf32>
    %98 = math.exp %97 : vector<4x8x8xf32>
    %cst_35 = arith.constant dense<0.000000e+00> : vector<4x8xf32>
    %99 = vector.multi_reduction <add>, %98, %cst_35 [2] : vector<4x8x8xf32> to vector<4x8xf32>
    %100 = vector.shape_cast %99 : vector<4x8xf32> to vector<4x8x1xf32>
    %101 = tpu.reciprocal %100 {approx = true} : vector<4x8x1xf32> -> vector<4x8x1xf32>
    %102 = vector.broadcast %101 : vector<4x8x1xf32> to vector<4x8x8xf32>
    %103 = arith.mulf %98, %102 : vector<4x8x8xf32>
    %104 = arith.truncf %103 : vector<4x8x8xf32> to vector<4x8x8xbf16>
    "tpu.trace_start"() <{level = 10 : i32, message = "bqk,bkd->bqd"}> : () -> ()
    %cst_36 = arith.constant dense<0.000000e+00> : vector<4x8x32xf32>
    %105 = tpu.matmul %104, %89, %cst_36 {dimension_numbers = #tpu.dot_dimension_numbers<[2], [1], [1], [2], [0, 0, 0, 1, 1, 2], [0], [0]>} : vector<4x8x8xbf16>, vector<4x8x32xbf16>, vector<4x8x32xf32> -> vector<4x8x32xf32>
    "tpu.trace_stop"() : () -> ()
    %106 = arith.truncf %105 : vector<4x8x32xf32> to vector<4x8x32xbf16>
    %107 = vector.extract_strided_slice %46 {offsets = [0, 0, 96], sizes = [4, 8, 32], strides = [1, 1, 1]} : vector<4x8x384xbf16> to vector<4x8x32xbf16>
    %108 = vector.extract_strided_slice %46 {offsets = [0, 0, 224], sizes = [4, 8, 32], strides = [1, 1, 1]} : vector<4x8x384xbf16> to vector<4x8x32xbf16>
    %109 = vector.extract_strided_slice %46 {offsets = [0, 0, 352], sizes = [4, 8, 32], strides = [1, 1, 1]} : vector<4x8x384xbf16> to vector<4x8x32xbf16>
    "tpu.trace_start"() <{level = 10 : i32, message = "bqd,bkd->bqk"}> : () -> ()
    %cst_37 = arith.constant dense<0.000000e+00> : vector<4x8x8xf32>
    %110 = tpu.matmul %107, %108, %cst_37 {dimension_numbers = #tpu.dot_dimension_numbers<[2], [2], [1], [1], [0, 0, 0, 1, 1, 1], [0], [0]>} : vector<4x8x32xbf16>, vector<4x8x32xbf16>, vector<4x8x8xf32> -> vector<4x8x8xf32>
    "tpu.trace_stop"() : () -> ()
    %111 = vector.shape_cast %10 : vector<1x8xf32> to vector<1x1x8xf32>
    %112 = vector.broadcast %111 : vector<1x1x8xf32> to vector<4x8x8xf32>
    %113 = arith.addf %110, %112 : vector<4x8x8xf32>
    %cst_38 = arith.constant dense<0xFF800000> : vector<4x8xf32>
    %114 = vector.multi_reduction <maximumf>, %113, %cst_38 [2] : vector<4x8x8xf32> to vector<4x8xf32>
    %115 = vector.shape_cast %114 : vector<4x8xf32> to vector<4x8x1xf32>
    %116 = vector.broadcast %115 : vector<4x8x1xf32> to vector<4x8x8xf32>
    %117 = arith.subf %113, %116 : vector<4x8x8xf32>
    %118 = math.exp %117 : vector<4x8x8xf32>
    %cst_39 = arith.constant dense<0.000000e+00> : vector<4x8xf32>
    %119 = vector.multi_reduction <add>, %118, %cst_39 [2] : vector<4x8x8xf32> to vector<4x8xf32>
    %120 = vector.shape_cast %119 : vector<4x8xf32> to vector<4x8x1xf32>
    %121 = tpu.reciprocal %120 {approx = true} : vector<4x8x1xf32> -> vector<4x8x1xf32>
    %122 = vector.broadcast %121 : vector<4x8x1xf32> to vector<4x8x8xf32>
    %123 = arith.mulf %118, %122 : vector<4x8x8xf32>
    %124 = arith.truncf %123 : vector<4x8x8xf32> to vector<4x8x8xbf16>
    "tpu.trace_start"() <{level = 10 : i32, message = "bqk,bkd->bqd"}> : () -> ()
    %cst_40 = arith.constant dense<0.000000e+00> : vector<4x8x32xf32>
    %125 = tpu.matmul %124, %109, %cst_40 {dimension_numbers = #tpu.dot_dimension_numbers<[2], [1], [1], [2], [0, 0, 0, 1, 1, 2], [0], [0]>} : vector<4x8x8xbf16>, vector<4x8x32xbf16>, vector<4x8x32xf32> -> vector<4x8x32xf32>
    "tpu.trace_stop"() : () -> ()
    %126 = arith.truncf %125 : vector<4x8x32xf32> to vector<4x8x32xbf16>
    %127 = tpu.concatenate %66, %86, %106, %126 in 2 : vector<4x8x32xbf16>, vector<4x8x32xbf16>, vector<4x8x32xbf16>, vector<4x8x32xbf16> -> vector<4x8x128xbf16>
    %128 = vector.shape_cast %127 : vector<4x8x128xbf16> to vector<32x128xbf16>
    %c0_41 = arith.constant 0 : index
    %c0_42 = arith.constant 0 : index
    %c0_43 = arith.constant 0 : index
    %129 = vector.load %arg8[%c0_41, %c0_42, %c0_43] : memref<2x128x128xbf16, #tpu.memory_space<vmem>>, vector<1x128x128xbf16>
    %130 = vector.shape_cast %129 : vector<1x128x128xbf16> to vector<128x128xbf16>
    %cst_44 = arith.constant dense<0.000000e+00> : vector<32x128xf32>
    %131 = tpu.matmul %128, %130, %cst_44 {dimension_numbers = #tpu.dot_dimension_numbers<[1], [0], [0], [1], [0, 0, 1, 1], [], []>} : vector<32x128xbf16>, vector<128x128xbf16>, vector<32x128xf32> -> vector<32x128xf32>
    %c0_45 = arith.constant 0 : index
    %c0_46 = arith.constant 0 : index
    %c0_47 = arith.constant 0 : index
    %132 = vector.load %arg9[%c0_45, %c0_46, %c0_47] : memref<2x1x128xf32, #tpu.memory_space<vmem>>, vector<1x1x128xf32>
    %133 = vector.shape_cast %132 : vector<1x1x128xf32> to vector<1x128xf32>
    %134 = vector.broadcast %133 : vector<1x128xf32> to vector<32x128xf32>
    %135 = arith.addf %131, %134 : vector<32x128xf32>
    %136 = arith.addf %4, %135 : vector<32x128xf32>
    %c0_48 = arith.constant 0 : index
    %c0_49 = arith.constant 0 : index
    %c0_50 = arith.constant 0 : index
    %137 = vector.load %arg10[%c0_48, %c0_49, %c0_50] : memref<2x1x128xf32, #tpu.memory_space<vmem>>, vector<1x1x128xf32>
    %138 = vector.shape_cast %137 : vector<1x1x128xf32> to vector<1x128xf32>
    %c0_51 = arith.constant 0 : index
    %c0_52 = arith.constant 0 : index
    %c0_53 = arith.constant 0 : index
    %139 = vector.load %arg11[%c0_51, %c0_52, %c0_53] : memref<2x1x128xf32, #tpu.memory_space<vmem>>, vector<1x1x128xf32>
    %140 = vector.shape_cast %139 : vector<1x1x128xf32> to vector<1x128xf32>
    %cst_54 = arith.constant dense<0.000000e+00> : vector<32xf32>
    %141 = vector.multi_reduction <add>, %136, %cst_54 [1] : vector<32x128xf32> to vector<32xf32>
    %142 = vector.shape_cast %141 : vector<32xf32> to vector<32x1xf32>
    %cst_55 = arith.constant 1.280000e+02 : f32
    %143 = vector.broadcast %cst_55 : f32 to vector<32x1xf32>
    %144 = arith.divf %142, %143 : vector<32x1xf32>
    %145 = vector.broadcast %144 : vector<32x1xf32> to vector<32x128xf32>
    %146 = arith.subf %136, %145 : vector<32x128xf32>
    %147 = arith.mulf %146, %146 : vector<32x128xf32>
    %cst_56 = arith.constant dense<0.000000e+00> : vector<32xf32>
    %148 = vector.multi_reduction <add>, %147, %cst_56 [1] : vector<32x128xf32> to vector<32xf32>
    %149 = vector.shape_cast %148 : vector<32xf32> to vector<32x1xf32>
    %cst_57 = arith.constant 1.280000e+02 : f32
    %150 = vector.broadcast %cst_57 : f32 to vector<32x1xf32>
    %151 = arith.divf %149, %150 : vector<32x1xf32>
    %152 = vector.broadcast %144 : vector<32x1xf32> to vector<32x128xf32>
    %153 = arith.subf %136, %152 : vector<32x128xf32>
    %cst_58 = arith.constant 9.99999996E-13 : f32
    %154 = vector.broadcast %cst_58 : f32 to vector<32x1xf32>
    %155 = arith.addf %151, %154 : vector<32x1xf32>
    %156 = math.rsqrt %155 : vector<32x1xf32>
    %157 = vector.broadcast %156 : vector<32x1xf32> to vector<32x128xf32>
    %158 = arith.mulf %153, %157 : vector<32x128xf32>
    %159 = vector.broadcast %138 : vector<1x128xf32> to vector<32x128xf32>
    %160 = arith.mulf %158, %159 : vector<32x128xf32>
    %161 = vector.broadcast %140 : vector<1x128xf32> to vector<32x128xf32>
    %162 = arith.addf %160, %161 : vector<32x128xf32>
    %163 = arith.truncf %162 : vector<32x128xf32> to vector<32x128xbf16>
    %c0_59 = arith.constant 0 : index
    %c0_60 = arith.constant 0 : index
    %c0_61 = arith.constant 0 : index
    %164 = vector.load %arg12[%c0_59, %c0_60, %c0_61] : memref<2x128x256xbf16, #tpu.memory_space<vmem>>, vector<1x128x256xbf16>
    %165 = vector.shape_cast %164 : vector<1x128x256xbf16> to vector<128x256xbf16>
    %cst_62 = arith.constant dense<0.000000e+00> : vector<32x256xf32>
    %166 = tpu.matmul %163, %165, %cst_62 {dimension_numbers = #tpu.dot_dimension_numbers<[1], [0], [0], [1], [0, 0, 1, 1], [], []>} : vector<32x128xbf16>, vector<128x256xbf16>, vector<32x256xf32> -> vector<32x256xf32>
    %c0_63 = arith.constant 0 : index
    %c0_64 = arith.constant 0 : index
    %c0_65 = arith.constant 0 : index
    %167 = vector.load %arg13[%c0_63, %c0_64, %c0_65] : memref<2x1x256xf32, #tpu.memory_space<vmem>>, vector<1x1x256xf32>
    %168 = vector.shape_cast %167 : vector<1x1x256xf32> to vector<1x256xf32>
    %169 = vector.broadcast %168 : vector<1x256xf32> to vector<32x256xf32>
    %170 = arith.addf %166, %169 : vector<32x256xf32>
    %cst_66 = arith.constant 5.000000e-01 : f32
    %171 = vector.broadcast %cst_66 : f32 to vector<32x256xf32>
    %172 = arith.mulf %171, %170 : vector<32x256xf32>
    %cst_67 = arith.constant 0.707106769 : f32
    %173 = vector.broadcast %cst_67 : f32 to vector<32x256xf32>
    %174 = arith.mulf %170, %173 : vector<32x256xf32>
    %175 = math.absf %174 : vector<32x256xf32>
    %cst_68 = arith.constant 0.327591091 : f32
    %176 = vector.broadcast %cst_68 : f32 to vector<32x256xf32>
    %177 = arith.mulf %176, %175 : vector<32x256xf32>
    %cst_69 = arith.constant 1.000000e+00 : f32
    %178 = vector.broadcast %cst_69 : f32 to vector<32x256xf32>
    %179 = arith.addf %178, %177 : vector<32x256xf32>
    %cst_70 = arith.constant 1.000000e+00 : f32
    %180 = vector.broadcast %cst_70 : f32 to vector<32x256xf32>
    %181 = arith.divf %180, %179 : vector<32x256xf32>
    %cst_71 = arith.constant 1.06140542 : f32
    %182 = vector.broadcast %cst_71 : f32 to vector<32x256xf32>
    %183 = arith.mulf %182, %181 : vector<32x256xf32>
    %cst_72 = arith.constant -1.45315206 : f32
    %184 = vector.broadcast %cst_72 : f32 to vector<32x256xf32>
    %185 = arith.addf %183, %184 : vector<32x256xf32>
    %186 = arith.mulf %185, %181 : vector<32x256xf32>
    %cst_73 = arith.constant 1.42141378 : f32
    %187 = vector.broadcast %cst_73 : f32 to vector<32x256xf32>
    %188 = arith.addf %186, %187 : vector<32x256xf32>
    %189 = arith.mulf %188, %181 : vector<32x256xf32>
    %cst_74 = arith.constant -0.284496725 : f32
    %190 = vector.broadcast %cst_74 : f32 to vector<32x256xf32>
    %191 = arith.addf %189, %190 : vector<32x256xf32>
    %192 = arith.mulf %191, %181 : vector<32x256xf32>
    %cst_75 = arith.constant 0.254829586 : f32
    %193 = vector.broadcast %cst_75 : f32 to vector<32x256xf32>
    %194 = arith.addf %192, %193 : vector<32x256xf32>
    %195 = arith.mulf %194, %181 : vector<32x256xf32>
    %cst_76 = arith.constant 0.000000e+00 : f32
    %196 = vector.broadcast %cst_76 : f32 to vector<32x256xf32>
    %197 = arith.subf %196, %175 : vector<32x256xf32>
    %198 = arith.mulf %197, %175 : vector<32x256xf32>
    %199 = math.exp %198 : vector<32x256xf32>
    %200 = arith.mulf %195, %199 : vector<32x256xf32>
    %cst_77 = arith.constant 1.000000e+00 : f32
    %201 = vector.broadcast %cst_77 : f32 to vector<32x256xf32>
    %202 = arith.subf %201, %200 : vector<32x256xf32>
    %cst_78 = arith.constant 0.000000e+00 : f32
    %203 = vector.broadcast %cst_78 : f32 to vector<32x256xf32>
    %204 = arith.cmpf oge, %174, %203 : vector<32x256xf32>
    %cst_79 = arith.constant 0.000000e+00 : f32
    %205 = vector.broadcast %cst_79 : f32 to vector<32x256xf32>
    %206 = arith.subf %205, %202 : vector<32x256xf32>
    %207 = arith.select %204, %202, %206 : vector<32x256xi1>, vector<32x256xf32>
    %cst_80 = arith.constant 1.000000e+00 : f32
    %208 = vector.broadcast %cst_80 : f32 to vector<32x256xf32>
    %209 = arith.addf %208, %207 : vector<32x256xf32>
    %210 = arith.mulf %172, %209 : vector<32x256xf32>
    %211 = arith.truncf %210 : vector<32x256xf32> to vector<32x256xbf16>
    %c0_81 = arith.constant 0 : index
    %c0_82 = arith.constant 0 : index
    %c0_83 = arith.constant 0 : index
    %212 = vector.load %arg14[%c0_81, %c0_82, %c0_83] : memref<2x256x128xbf16, #tpu.memory_space<vmem>>, vector<1x256x128xbf16>
    %213 = vector.shape_cast %212 : vector<1x256x128xbf16> to vector<256x128xbf16>
    %cst_84 = arith.constant dense<0.000000e+00> : vector<32x128xf32>
    %214 = tpu.matmul %211, %213, %cst_84 {dimension_numbers = #tpu.dot_dimension_numbers<[1], [0], [0], [1], [0, 0, 1, 1], [], []>} : vector<32x256xbf16>, vector<256x128xbf16>, vector<32x128xf32> -> vector<32x128xf32>
    %c0_85 = arith.constant 0 : index
    %c0_86 = arith.constant 0 : index
    %c0_87 = arith.constant 0 : index
    %215 = vector.load %arg15[%c0_85, %c0_86, %c0_87] : memref<2x1x128xf32, #tpu.memory_space<vmem>>, vector<1x1x128xf32>
    %216 = vector.shape_cast %215 : vector<1x1x128xf32> to vector<1x128xf32>
    %217 = vector.broadcast %216 : vector<1x128xf32> to vector<32x128xf32>
    %218 = arith.addf %214, %217 : vector<32x128xf32>
    %219 = arith.addf %136, %218 : vector<32x128xf32>
    %c1 = arith.constant 1 : index
    %c0_88 = arith.constant 0 : index
    %c0_89 = arith.constant 0 : index
    %220 = vector.load %arg4[%c1, %c0_88, %c0_89] : memref<2x1x128xf32, #tpu.memory_space<vmem>>, vector<1x1x128xf32>
    %221 = vector.shape_cast %220 : vector<1x1x128xf32> to vector<1x128xf32>
    %c1_90 = arith.constant 1 : index
    %c0_91 = arith.constant 0 : index
    %c0_92 = arith.constant 0 : index
    %222 = vector.load %arg5[%c1_90, %c0_91, %c0_92] : memref<2x1x128xf32, #tpu.memory_space<vmem>>, vector<1x1x128xf32>
    %223 = vector.shape_cast %222 : vector<1x1x128xf32> to vector<1x128xf32>
    %cst_93 = arith.constant dense<0.000000e+00> : vector<32xf32>
    %224 = vector.multi_reduction <add>, %219, %cst_93 [1] : vector<32x128xf32> to vector<32xf32>
    %225 = vector.shape_cast %224 : vector<32xf32> to vector<32x1xf32>
    %cst_94 = arith.constant 1.280000e+02 : f32
    %226 = vector.broadcast %cst_94 : f32 to vector<32x1xf32>
    %227 = arith.divf %225, %226 : vector<32x1xf32>
    %228 = vector.broadcast %227 : vector<32x1xf32> to vector<32x128xf32>
    %229 = arith.subf %219, %228 : vector<32x128xf32>
    %230 = arith.mulf %229, %229 : vector<32x128xf32>
    %cst_95 = arith.constant dense<0.000000e+00> : vector<32xf32>
    %231 = vector.multi_reduction <add>, %230, %cst_95 [1] : vector<32x128xf32> to vector<32xf32>
    %232 = vector.shape_cast %231 : vector<32xf32> to vector<32x1xf32>
    %cst_96 = arith.constant 1.280000e+02 : f32
    %233 = vector.broadcast %cst_96 : f32 to vector<32x1xf32>
    %234 = arith.divf %232, %233 : vector<32x1xf32>
    %235 = vector.broadcast %227 : vector<32x1xf32> to vector<32x128xf32>
    %236 = arith.subf %219, %235 : vector<32x128xf32>
    %cst_97 = arith.constant 9.99999996E-13 : f32
    %237 = vector.broadcast %cst_97 : f32 to vector<32x1xf32>
    %238 = arith.addf %234, %237 : vector<32x1xf32>
    %239 = math.rsqrt %238 : vector<32x1xf32>
    %240 = vector.broadcast %239 : vector<32x1xf32> to vector<32x128xf32>
    %241 = arith.mulf %236, %240 : vector<32x128xf32>
    %242 = vector.broadcast %221 : vector<1x128xf32> to vector<32x128xf32>
    %243 = arith.mulf %241, %242 : vector<32x128xf32>
    %244 = vector.broadcast %223 : vector<1x128xf32> to vector<32x128xf32>
    %245 = arith.addf %243, %244 : vector<32x128xf32>
    %246 = arith.truncf %245 : vector<32x128xf32> to vector<32x128xbf16>
    %c1_98 = arith.constant 1 : index
    %c0_99 = arith.constant 0 : index
    %c0_100 = arith.constant 0 : index
    %247 = vector.load %arg6[%c1_98, %c0_99, %c0_100] : memref<2x128x384xbf16, #tpu.memory_space<vmem>>, vector<1x128x384xbf16>
    %248 = vector.shape_cast %247 : vector<1x128x384xbf16> to vector<128x384xbf16>
    %cst_101 = arith.constant dense<0.000000e+00> : vector<32x384xf32>
    %249 = tpu.matmul %246, %248, %cst_101 {dimension_numbers = #tpu.dot_dimension_numbers<[1], [0], [0], [1], [0, 0, 1, 1], [], []>} : vector<32x128xbf16>, vector<128x384xbf16>, vector<32x384xf32> -> vector<32x384xf32>
    %c1_102 = arith.constant 1 : index
    %c0_103 = arith.constant 0 : index
    %c0_104 = arith.constant 0 : index
    %250 = vector.load %arg7[%c1_102, %c0_103, %c0_104] : memref<2x1x384xf32, #tpu.memory_space<vmem>>, vector<1x1x384xf32>
    %251 = vector.shape_cast %250 : vector<1x1x384xf32> to vector<1x384xf32>
    %252 = vector.broadcast %251 : vector<1x384xf32> to vector<32x384xf32>
    %253 = arith.addf %249, %252 : vector<32x384xf32>
    %254 = arith.truncf %253 : vector<32x384xf32> to vector<32x384xbf16>
    %255 = vector.shape_cast %254 : vector<32x384xbf16> to vector<4x8x384xbf16>
    %256 = vector.extract_strided_slice %255 {offsets = [0, 0, 0], sizes = [4, 8, 32], strides = [1, 1, 1]} : vector<4x8x384xbf16> to vector<4x8x32xbf16>
    %257 = vector.extract_strided_slice %255 {offsets = [0, 0, 128], sizes = [4, 8, 32], strides = [1, 1, 1]} : vector<4x8x384xbf16> to vector<4x8x32xbf16>
    %258 = vector.extract_strided_slice %255 {offsets = [0, 0, 256], sizes = [4, 8, 32], strides = [1, 1, 1]} : vector<4x8x384xbf16> to vector<4x8x32xbf16>
    "tpu.trace_start"() <{level = 10 : i32, message = "bqd,bkd->bqk"}> : () -> ()
    %cst_105 = arith.constant dense<0.000000e+00> : vector<4x8x8xf32>
    %259 = tpu.matmul %256, %257, %cst_105 {dimension_numbers = #tpu.dot_dimension_numbers<[2], [2], [1], [1], [0, 0, 0, 1, 1, 1], [0], [0]>} : vector<4x8x32xbf16>, vector<4x8x32xbf16>, vector<4x8x8xf32> -> vector<4x8x8xf32>
    "tpu.trace_stop"() : () -> ()
    %260 = vector.shape_cast %10 : vector<1x8xf32> to vector<1x1x8xf32>
    %261 = vector.broadcast %260 : vector<1x1x8xf32> to vector<4x8x8xf32>
    %262 = arith.addf %259, %261 : vector<4x8x8xf32>
    %cst_106 = arith.constant dense<0xFF800000> : vector<4x8xf32>
    %263 = vector.multi_reduction <maximumf>, %262, %cst_106 [2] : vector<4x8x8xf32> to vector<4x8xf32>
    %264 = vector.shape_cast %263 : vector<4x8xf32> to vector<4x8x1xf32>
    %265 = vector.broadcast %264 : vector<4x8x1xf32> to vector<4x8x8xf32>
    %266 = arith.subf %262, %265 : vector<4x8x8xf32>
    %267 = math.exp %266 : vector<4x8x8xf32>
    %cst_107 = arith.constant dense<0.000000e+00> : vector<4x8xf32>
    %268 = vector.multi_reduction <add>, %267, %cst_107 [2] : vector<4x8x8xf32> to vector<4x8xf32>
    %269 = vector.shape_cast %268 : vector<4x8xf32> to vector<4x8x1xf32>
    %270 = tpu.reciprocal %269 {approx = true} : vector<4x8x1xf32> -> vector<4x8x1xf32>
    %271 = vector.broadcast %270 : vector<4x8x1xf32> to vector<4x8x8xf32>
    %272 = arith.mulf %267, %271 : vector<4x8x8xf32>
    %273 = arith.truncf %272 : vector<4x8x8xf32> to vector<4x8x8xbf16>
    "tpu.trace_start"() <{level = 10 : i32, message = "bqk,bkd->bqd"}> : () -> ()
    %cst_108 = arith.constant dense<0.000000e+00> : vector<4x8x32xf32>
    %274 = tpu.matmul %273, %258, %cst_108 {dimension_numbers = #tpu.dot_dimension_numbers<[2], [1], [1], [2], [0, 0, 0, 1, 1, 2], [0], [0]>} : vector<4x8x8xbf16>, vector<4x8x32xbf16>, vector<4x8x32xf32> -> vector<4x8x32xf32>
    "tpu.trace_stop"() : () -> ()
    %275 = arith.truncf %274 : vector<4x8x32xf32> to vector<4x8x32xbf16>
    %276 = vector.extract_strided_slice %255 {offsets = [0, 0, 32], sizes = [4, 8, 32], strides = [1, 1, 1]} : vector<4x8x384xbf16> to vector<4x8x32xbf16>
    %277 = vector.extract_strided_slice %255 {offsets = [0, 0, 160], sizes = [4, 8, 32], strides = [1, 1, 1]} : vector<4x8x384xbf16> to vector<4x8x32xbf16>
    %278 = vector.extract_strided_slice %255 {offsets = [0, 0, 288], sizes = [4, 8, 32], strides = [1, 1, 1]} : vector<4x8x384xbf16> to vector<4x8x32xbf16>
    "tpu.trace_start"() <{level = 10 : i32, message = "bqd,bkd->bqk"}> : () -> ()
    %cst_109 = arith.constant dense<0.000000e+00> : vector<4x8x8xf32>
    %279 = tpu.matmul %276, %277, %cst_109 {dimension_numbers = #tpu.dot_dimension_numbers<[2], [2], [1], [1], [0, 0, 0, 1, 1, 1], [0], [0]>} : vector<4x8x32xbf16>, vector<4x8x32xbf16>, vector<4x8x8xf32> -> vector<4x8x8xf32>
    "tpu.trace_stop"() : () -> ()
    %280 = vector.shape_cast %10 : vector<1x8xf32> to vector<1x1x8xf32>
    %281 = vector.broadcast %280 : vector<1x1x8xf32> to vector<4x8x8xf32>
    %282 = arith.addf %279, %281 : vector<4x8x8xf32>
    %cst_110 = arith.constant dense<0xFF800000> : vector<4x8xf32>
    %283 = vector.multi_reduction <maximumf>, %282, %cst_110 [2] : vector<4x8x8xf32> to vector<4x8xf32>
    %284 = vector.shape_cast %283 : vector<4x8xf32> to vector<4x8x1xf32>
    %285 = vector.broadcast %284 : vector<4x8x1xf32> to vector<4x8x8xf32>
    %286 = arith.subf %282, %285 : vector<4x8x8xf32>
    %287 = math.exp %286 : vector<4x8x8xf32>
    %cst_111 = arith.constant dense<0.000000e+00> : vector<4x8xf32>
    %288 = vector.multi_reduction <add>, %287, %cst_111 [2] : vector<4x8x8xf32> to vector<4x8xf32>
    %289 = vector.shape_cast %288 : vector<4x8xf32> to vector<4x8x1xf32>
    %290 = tpu.reciprocal %289 {approx = true} : vector<4x8x1xf32> -> vector<4x8x1xf32>
    %291 = vector.broadcast %290 : vector<4x8x1xf32> to vector<4x8x8xf32>
    %292 = arith.mulf %287, %291 : vector<4x8x8xf32>
    %293 = arith.truncf %292 : vector<4x8x8xf32> to vector<4x8x8xbf16>
    "tpu.trace_start"() <{level = 10 : i32, message = "bqk,bkd->bqd"}> : () -> ()
    %cst_112 = arith.constant dense<0.000000e+00> : vector<4x8x32xf32>
    %294 = tpu.matmul %293, %278, %cst_112 {dimension_numbers = #tpu.dot_dimension_numbers<[2], [1], [1], [2], [0, 0, 0, 1, 1, 2], [0], [0]>} : vector<4x8x8xbf16>, vector<4x8x32xbf16>, vector<4x8x32xf32> -> vector<4x8x32xf32>
    "tpu.trace_stop"() : () -> ()
    %295 = arith.truncf %294 : vector<4x8x32xf32> to vector<4x8x32xbf16>
    %296 = vector.extract_strided_slice %255 {offsets = [0, 0, 64], sizes = [4, 8, 32], strides = [1, 1, 1]} : vector<4x8x384xbf16> to vector<4x8x32xbf16>
    %297 = vector.extract_strided_slice %255 {offsets = [0, 0, 192], sizes = [4, 8, 32], strides = [1, 1, 1]} : vector<4x8x384xbf16> to vector<4x8x32xbf16>
    %298 = vector.extract_strided_slice %255 {offsets = [0, 0, 320], sizes = [4, 8, 32], strides = [1, 1, 1]} : vector<4x8x384xbf16> to vector<4x8x32xbf16>
    "tpu.trace_start"() <{level = 10 : i32, message = "bqd,bkd->bqk"}> : () -> ()
    %cst_113 = arith.constant dense<0.000000e+00> : vector<4x8x8xf32>
    %299 = tpu.matmul %296, %297, %cst_113 {dimension_numbers = #tpu.dot_dimension_numbers<[2], [2], [1], [1], [0, 0, 0, 1, 1, 1], [0], [0]>} : vector<4x8x32xbf16>, vector<4x8x32xbf16>, vector<4x8x8xf32> -> vector<4x8x8xf32>
    "tpu.trace_stop"() : () -> ()
    %300 = vector.shape_cast %10 : vector<1x8xf32> to vector<1x1x8xf32>
    %301 = vector.broadcast %300 : vector<1x1x8xf32> to vector<4x8x8xf32>
    %302 = arith.addf %299, %301 : vector<4x8x8xf32>
    %cst_114 = arith.constant dense<0xFF800000> : vector<4x8xf32>
    %303 = vector.multi_reduction <maximumf>, %302, %cst_114 [2] : vector<4x8x8xf32> to vector<4x8xf32>
    %304 = vector.shape_cast %303 : vector<4x8xf32> to vector<4x8x1xf32>
    %305 = vector.broadcast %304 : vector<4x8x1xf32> to vector<4x8x8xf32>
    %306 = arith.subf %302, %305 : vector<4x8x8xf32>
    %307 = math.exp %306 : vector<4x8x8xf32>
    %cst_115 = arith.constant dense<0.000000e+00> : vector<4x8xf32>
    %308 = vector.multi_reduction <add>, %307, %cst_115 [2] : vector<4x8x8xf32> to vector<4x8xf32>
    %309 = vector.shape_cast %308 : vector<4x8xf32> to vector<4x8x1xf32>
    %310 = tpu.reciprocal %309 {approx = true} : vector<4x8x1xf32> -> vector<4x8x1xf32>
    %311 = vector.broadcast %310 : vector<4x8x1xf32> to vector<4x8x8xf32>
    %312 = arith.mulf %307, %311 : vector<4x8x8xf32>
    %313 = arith.truncf %312 : vector<4x8x8xf32> to vector<4x8x8xbf16>
    "tpu.trace_start"() <{level = 10 : i32, message = "bqk,bkd->bqd"}> : () -> ()
    %cst_116 = arith.constant dense<0.000000e+00> : vector<4x8x32xf32>
    %314 = tpu.matmul %313, %298, %cst_116 {dimension_numbers = #tpu.dot_dimension_numbers<[2], [1], [1], [2], [0, 0, 0, 1, 1, 2], [0], [0]>} : vector<4x8x8xbf16>, vector<4x8x32xbf16>, vector<4x8x32xf32> -> vector<4x8x32xf32>
    "tpu.trace_stop"() : () -> ()
    %315 = arith.truncf %314 : vector<4x8x32xf32> to vector<4x8x32xbf16>
    %316 = vector.extract_strided_slice %255 {offsets = [0, 0, 96], sizes = [4, 8, 32], strides = [1, 1, 1]} : vector<4x8x384xbf16> to vector<4x8x32xbf16>
    %317 = vector.extract_strided_slice %255 {offsets = [0, 0, 224], sizes = [4, 8, 32], strides = [1, 1, 1]} : vector<4x8x384xbf16> to vector<4x8x32xbf16>
    %318 = vector.extract_strided_slice %255 {offsets = [0, 0, 352], sizes = [4, 8, 32], strides = [1, 1, 1]} : vector<4x8x384xbf16> to vector<4x8x32xbf16>
    "tpu.trace_start"() <{level = 10 : i32, message = "bqd,bkd->bqk"}> : () -> ()
    %cst_117 = arith.constant dense<0.000000e+00> : vector<4x8x8xf32>
    %319 = tpu.matmul %316, %317, %cst_117 {dimension_numbers = #tpu.dot_dimension_numbers<[2], [2], [1], [1], [0, 0, 0, 1, 1, 1], [0], [0]>} : vector<4x8x32xbf16>, vector<4x8x32xbf16>, vector<4x8x8xf32> -> vector<4x8x8xf32>
    "tpu.trace_stop"() : () -> ()
    %320 = vector.shape_cast %10 : vector<1x8xf32> to vector<1x1x8xf32>
    %321 = vector.broadcast %320 : vector<1x1x8xf32> to vector<4x8x8xf32>
    %322 = arith.addf %319, %321 : vector<4x8x8xf32>
    %cst_118 = arith.constant dense<0xFF800000> : vector<4x8xf32>
    %323 = vector.multi_reduction <maximumf>, %322, %cst_118 [2] : vector<4x8x8xf32> to vector<4x8xf32>
    %324 = vector.shape_cast %323 : vector<4x8xf32> to vector<4x8x1xf32>
    %325 = vector.broadcast %324 : vector<4x8x1xf32> to vector<4x8x8xf32>
    %326 = arith.subf %322, %325 : vector<4x8x8xf32>
    %327 = math.exp %326 : vector<4x8x8xf32>
    %cst_119 = arith.constant dense<0.000000e+00> : vector<4x8xf32>
    %328 = vector.multi_reduction <add>, %327, %cst_119 [2] : vector<4x8x8xf32> to vector<4x8xf32>
    %329 = vector.shape_cast %328 : vector<4x8xf32> to vector<4x8x1xf32>
    %330 = tpu.reciprocal %329 {approx = true} : vector<4x8x1xf32> -> vector<4x8x1xf32>
    %331 = vector.broadcast %330 : vector<4x8x1xf32> to vector<4x8x8xf32>
    %332 = arith.mulf %327, %331 : vector<4x8x8xf32>
    %333 = arith.truncf %332 : vector<4x8x8xf32> to vector<4x8x8xbf16>
    "tpu.trace_start"() <{level = 10 : i32, message = "bqk,bkd->bqd"}> : () -> ()
    %cst_120 = arith.constant dense<0.000000e+00> : vector<4x8x32xf32>
    %334 = tpu.matmul %333, %318, %cst_120 {dimension_numbers = #tpu.dot_dimension_numbers<[2], [1], [1], [2], [0, 0, 0, 1, 1, 2], [0], [0]>} : vector<4x8x8xbf16>, vector<4x8x32xbf16>, vector<4x8x32xf32> -> vector<4x8x32xf32>
    "tpu.trace_stop"() : () -> ()
    %335 = arith.truncf %334 : vector<4x8x32xf32> to vector<4x8x32xbf16>
    %336 = tpu.concatenate %275, %295, %315, %335 in 2 : vector<4x8x32xbf16>, vector<4x8x32xbf16>, vector<4x8x32xbf16>, vector<4x8x32xbf16> -> vector<4x8x128xbf16>
    %337 = vector.shape_cast %336 : vector<4x8x128xbf16> to vector<32x128xbf16>
    %c1_121 = arith.constant 1 : index
    %c0_122 = arith.constant 0 : index
    %c0_123 = arith.constant 0 : index
    %338 = vector.load %arg8[%c1_121, %c0_122, %c0_123] : memref<2x128x128xbf16, #tpu.memory_space<vmem>>, vector<1x128x128xbf16>
    %339 = vector.shape_cast %338 : vector<1x128x128xbf16> to vector<128x128xbf16>
    %cst_124 = arith.constant dense<0.000000e+00> : vector<32x128xf32>
    %340 = tpu.matmul %337, %339, %cst_124 {dimension_numbers = #tpu.dot_dimension_numbers<[1], [0], [0], [1], [0, 0, 1, 1], [], []>} : vector<32x128xbf16>, vector<128x128xbf16>, vector<32x128xf32> -> vector<32x128xf32>
    %c1_125 = arith.constant 1 : index
    %c0_126 = arith.constant 0 : index
    %c0_127 = arith.constant 0 : index
    %341 = vector.load %arg9[%c1_125, %c0_126, %c0_127] : memref<2x1x128xf32, #tpu.memory_space<vmem>>, vector<1x1x128xf32>
    %342 = vector.shape_cast %341 : vector<1x1x128xf32> to vector<1x128xf32>
    %343 = vector.broadcast %342 : vector<1x128xf32> to vector<32x128xf32>
    %344 = arith.addf %340, %343 : vector<32x128xf32>
    %345 = arith.addf %219, %344 : vector<32x128xf32>
    %c1_128 = arith.constant 1 : index
    %c0_129 = arith.constant 0 : index
    %c0_130 = arith.constant 0 : index
    %346 = vector.load %arg10[%c1_128, %c0_129, %c0_130] : memref<2x1x128xf32, #tpu.memory_space<vmem>>, vector<1x1x128xf32>
    %347 = vector.shape_cast %346 : vector<1x1x128xf32> to vector<1x128xf32>
    %c1_131 = arith.constant 1 : index
    %c0_132 = arith.constant 0 : index
    %c0_133 = arith.constant 0 : index
    %348 = vector.load %arg11[%c1_131, %c0_132, %c0_133] : memref<2x1x128xf32, #tpu.memory_space<vmem>>, vector<1x1x128xf32>
    %349 = vector.shape_cast %348 : vector<1x1x128xf32> to vector<1x128xf32>
    %cst_134 = arith.constant dense<0.000000e+00> : vector<32xf32>
    %350 = vector.multi_reduction <add>, %345, %cst_134 [1] : vector<32x128xf32> to vector<32xf32>
    %351 = vector.shape_cast %350 : vector<32xf32> to vector<32x1xf32>
    %cst_135 = arith.constant 1.280000e+02 : f32
    %352 = vector.broadcast %cst_135 : f32 to vector<32x1xf32>
    %353 = arith.divf %351, %352 : vector<32x1xf32>
    %354 = vector.broadcast %353 : vector<32x1xf32> to vector<32x128xf32>
    %355 = arith.subf %345, %354 : vector<32x128xf32>
    %356 = arith.mulf %355, %355 : vector<32x128xf32>
    %cst_136 = arith.constant dense<0.000000e+00> : vector<32xf32>
    %357 = vector.multi_reduction <add>, %356, %cst_136 [1] : vector<32x128xf32> to vector<32xf32>
    %358 = vector.shape_cast %357 : vector<32xf32> to vector<32x1xf32>
    %cst_137 = arith.constant 1.280000e+02 : f32
    %359 = vector.broadcast %cst_137 : f32 to vector<32x1xf32>
    %360 = arith.divf %358, %359 : vector<32x1xf32>
    %361 = vector.broadcast %353 : vector<32x1xf32> to vector<32x128xf32>
    %362 = arith.subf %345, %361 : vector<32x128xf32>
    %cst_138 = arith.constant 9.99999996E-13 : f32
    %363 = vector.broadcast %cst_138 : f32 to vector<32x1xf32>
    %364 = arith.addf %360, %363 : vector<32x1xf32>
    %365 = math.rsqrt %364 : vector<32x1xf32>
    %366 = vector.broadcast %365 : vector<32x1xf32> to vector<32x128xf32>
    %367 = arith.mulf %362, %366 : vector<32x128xf32>
    %368 = vector.broadcast %347 : vector<1x128xf32> to vector<32x128xf32>
    %369 = arith.mulf %367, %368 : vector<32x128xf32>
    %370 = vector.broadcast %349 : vector<1x128xf32> to vector<32x128xf32>
    %371 = arith.addf %369, %370 : vector<32x128xf32>
    %372 = arith.truncf %371 : vector<32x128xf32> to vector<32x128xbf16>
    %c1_139 = arith.constant 1 : index
    %c0_140 = arith.constant 0 : index
    %c0_141 = arith.constant 0 : index
    %373 = vector.load %arg12[%c1_139, %c0_140, %c0_141] : memref<2x128x256xbf16, #tpu.memory_space<vmem>>, vector<1x128x256xbf16>
    %374 = vector.shape_cast %373 : vector<1x128x256xbf16> to vector<128x256xbf16>
    %cst_142 = arith.constant dense<0.000000e+00> : vector<32x256xf32>
    %375 = tpu.matmul %372, %374, %cst_142 {dimension_numbers = #tpu.dot_dimension_numbers<[1], [0], [0], [1], [0, 0, 1, 1], [], []>} : vector<32x128xbf16>, vector<128x256xbf16>, vector<32x256xf32> -> vector<32x256xf32>
    %c1_143 = arith.constant 1 : index
    %c0_144 = arith.constant 0 : index
    %c0_145 = arith.constant 0 : index
    %376 = vector.load %arg13[%c1_143, %c0_144, %c0_145] : memref<2x1x256xf32, #tpu.memory_space<vmem>>, vector<1x1x256xf32>
    %377 = vector.shape_cast %376 : vector<1x1x256xf32> to vector<1x256xf32>
    %378 = vector.broadcast %377 : vector<1x256xf32> to vector<32x256xf32>
    %379 = arith.addf %375, %378 : vector<32x256xf32>
    %cst_146 = arith.constant 5.000000e-01 : f32
    %380 = vector.broadcast %cst_146 : f32 to vector<32x256xf32>
    %381 = arith.mulf %380, %379 : vector<32x256xf32>
    %cst_147 = arith.constant 0.707106769 : f32
    %382 = vector.broadcast %cst_147 : f32 to vector<32x256xf32>
    %383 = arith.mulf %379, %382 : vector<32x256xf32>
    %384 = math.absf %383 : vector<32x256xf32>
    %cst_148 = arith.constant 0.327591091 : f32
    %385 = vector.broadcast %cst_148 : f32 to vector<32x256xf32>
    %386 = arith.mulf %385, %384 : vector<32x256xf32>
    %cst_149 = arith.constant 1.000000e+00 : f32
    %387 = vector.broadcast %cst_149 : f32 to vector<32x256xf32>
    %388 = arith.addf %387, %386 : vector<32x256xf32>
    %cst_150 = arith.constant 1.000000e+00 : f32
    %389 = vector.broadcast %cst_150 : f32 to vector<32x256xf32>
    %390 = arith.divf %389, %388 : vector<32x256xf32>
    %cst_151 = arith.constant 1.06140542 : f32
    %391 = vector.broadcast %cst_151 : f32 to vector<32x256xf32>
    %392 = arith.mulf %391, %390 : vector<32x256xf32>
    %cst_152 = arith.constant -1.45315206 : f32
    %393 = vector.broadcast %cst_152 : f32 to vector<32x256xf32>
    %394 = arith.addf %392, %393 : vector<32x256xf32>
    %395 = arith.mulf %394, %390 : vector<32x256xf32>
    %cst_153 = arith.constant 1.42141378 : f32
    %396 = vector.broadcast %cst_153 : f32 to vector<32x256xf32>
    %397 = arith.addf %395, %396 : vector<32x256xf32>
    %398 = arith.mulf %397, %390 : vector<32x256xf32>
    %cst_154 = arith.constant -0.284496725 : f32
    %399 = vector.broadcast %cst_154 : f32 to vector<32x256xf32>
    %400 = arith.addf %398, %399 : vector<32x256xf32>
    %401 = arith.mulf %400, %390 : vector<32x256xf32>
    %cst_155 = arith.constant 0.254829586 : f32
    %402 = vector.broadcast %cst_155 : f32 to vector<32x256xf32>
    %403 = arith.addf %401, %402 : vector<32x256xf32>
    %404 = arith.mulf %403, %390 : vector<32x256xf32>
    %cst_156 = arith.constant 0.000000e+00 : f32
    %405 = vector.broadcast %cst_156 : f32 to vector<32x256xf32>
    %406 = arith.subf %405, %384 : vector<32x256xf32>
    %407 = arith.mulf %406, %384 : vector<32x256xf32>
    %408 = math.exp %407 : vector<32x256xf32>
    %409 = arith.mulf %404, %408 : vector<32x256xf32>
    %cst_157 = arith.constant 1.000000e+00 : f32
    %410 = vector.broadcast %cst_157 : f32 to vector<32x256xf32>
    %411 = arith.subf %410, %409 : vector<32x256xf32>
    %cst_158 = arith.constant 0.000000e+00 : f32
    %412 = vector.broadcast %cst_158 : f32 to vector<32x256xf32>
    %413 = arith.cmpf oge, %383, %412 : vector<32x256xf32>
    %cst_159 = arith.constant 0.000000e+00 : f32
    %414 = vector.broadcast %cst_159 : f32 to vector<32x256xf32>
    %415 = arith.subf %414, %411 : vector<32x256xf32>
    %416 = arith.select %413, %411, %415 : vector<32x256xi1>, vector<32x256xf32>
    %cst_160 = arith.constant 1.000000e+00 : f32
    %417 = vector.broadcast %cst_160 : f32 to vector<32x256xf32>
    %418 = arith.addf %417, %416 : vector<32x256xf32>
    %419 = arith.mulf %381, %418 : vector<32x256xf32>
    %420 = arith.truncf %419 : vector<32x256xf32> to vector<32x256xbf16>
    %c1_161 = arith.constant 1 : index
    %c0_162 = arith.constant 0 : index
    %c0_163 = arith.constant 0 : index
    %421 = vector.load %arg14[%c1_161, %c0_162, %c0_163] : memref<2x256x128xbf16, #tpu.memory_space<vmem>>, vector<1x256x128xbf16>
    %422 = vector.shape_cast %421 : vector<1x256x128xbf16> to vector<256x128xbf16>
    %cst_164 = arith.constant dense<0.000000e+00> : vector<32x128xf32>
    %423 = tpu.matmul %420, %422, %cst_164 {dimension_numbers = #tpu.dot_dimension_numbers<[1], [0], [0], [1], [0, 0, 1, 1], [], []>} : vector<32x256xbf16>, vector<256x128xbf16>, vector<32x128xf32> -> vector<32x128xf32>
    %c1_165 = arith.constant 1 : index
    %c0_166 = arith.constant 0 : index
    %c0_167 = arith.constant 0 : index
    %424 = vector.load %arg15[%c1_165, %c0_166, %c0_167] : memref<2x1x128xf32, #tpu.memory_space<vmem>>, vector<1x1x128xf32>
    %425 = vector.shape_cast %424 : vector<1x1x128xf32> to vector<1x128xf32>
    %426 = vector.broadcast %425 : vector<1x128xf32> to vector<32x128xf32>
    %427 = arith.addf %423, %426 : vector<32x128xf32>
    %428 = arith.addf %345, %427 : vector<32x128xf32>
    %c0_168 = arith.constant 0 : index
    %c0_169 = arith.constant 0 : index
    %429 = vector.load %arg16[%c0_168, %c0_169] : memref<1x128xf32, #tpu.memory_space<vmem>>, vector<1x128xf32>
    %c0_170 = arith.constant 0 : index
    %c0_171 = arith.constant 0 : index
    %430 = vector.load %arg17[%c0_170, %c0_171] : memref<1x128xf32, #tpu.memory_space<vmem>>, vector<1x128xf32>
    %cst_172 = arith.constant dense<0.000000e+00> : vector<32xf32>
    %431 = vector.multi_reduction <add>, %428, %cst_172 [1] : vector<32x128xf32> to vector<32xf32>
    %432 = vector.shape_cast %431 : vector<32xf32> to vector<32x1xf32>
    %cst_173 = arith.constant 1.280000e+02 : f32
    %433 = vector.broadcast %cst_173 : f32 to vector<32x1xf32>
    %434 = arith.divf %432, %433 : vector<32x1xf32>
    %435 = vector.broadcast %434 : vector<32x1xf32> to vector<32x128xf32>
    %436 = arith.subf %428, %435 : vector<32x128xf32>
    %437 = arith.mulf %436, %436 : vector<32x128xf32>
    %cst_174 = arith.constant dense<0.000000e+00> : vector<32xf32>
    %438 = vector.multi_reduction <add>, %437, %cst_174 [1] : vector<32x128xf32> to vector<32xf32>
    %439 = vector.shape_cast %438 : vector<32xf32> to vector<32x1xf32>
    %cst_175 = arith.constant 1.280000e+02 : f32
    %440 = vector.broadcast %cst_175 : f32 to vector<32x1xf32>
    %441 = arith.divf %439, %440 : vector<32x1xf32>
    %442 = vector.broadcast %434 : vector<32x1xf32> to vector<32x128xf32>
    %443 = arith.subf %428, %442 : vector<32x128xf32>
    %cst_176 = arith.constant 9.99999996E-13 : f32
    %444 = vector.broadcast %cst_176 : f32 to vector<32x1xf32>
    %445 = arith.addf %441, %444 : vector<32x1xf32>
    %446 = math.rsqrt %445 : vector<32x1xf32>
    %447 = vector.broadcast %446 : vector<32x1xf32> to vector<32x128xf32>
    %448 = arith.mulf %443, %447 : vector<32x128xf32>
    %449 = vector.broadcast %429 : vector<1x128xf32> to vector<32x128xf32>
    %450 = arith.mulf %448, %449 : vector<32x128xf32>
    %451 = vector.broadcast %430 : vector<1x128xf32> to vector<32x128xf32>
    %452 = arith.addf %450, %451 : vector<32x128xf32>
    %453 = arith.truncf %452 : vector<32x128xf32> to vector<32x128xbf16>
    %c0_177 = arith.constant 0 : index
    %c0_178 = arith.constant 0 : index
    %454 = vector.load %arg18[%c0_177, %c0_178] : memref<128x128xbf16, #tpu.memory_space<vmem>>, vector<128x128xbf16>
    %cst_179 = arith.constant dense<0.000000e+00> : vector<32x128xf32>
    %455 = tpu.matmul %453, %454, %cst_179 {dimension_numbers = #tpu.dot_dimension_numbers<[1], [0], [0], [1], [0, 0, 1, 1], [], []>} : vector<32x128xbf16>, vector<128x128xbf16>, vector<32x128xf32> -> vector<32x128xf32>
    %c0_180 = arith.constant 0 : index
    %c0_181 = arith.constant 0 : index
    %456 = vector.load %arg19[%c0_180, %c0_181] : memref<1x128xf32, #tpu.memory_space<vmem>>, vector<1x128xf32>
    %457 = vector.broadcast %456 : vector<1x128xf32> to vector<32x128xf32>
    %458 = arith.addf %455, %457 : vector<32x128xf32>
    %c0_182 = arith.constant 0 : index
    %c0_183 = arith.constant 0 : index
    %459 = vector.load %arg20[%c0_182, %c0_183] : memref<32x128xf32, #tpu.memory_space<vmem>>, vector<32x128xf32>
    tpu.vector_store %arg20[%c0_182, %c0_183], %458 {strides = array<i32>} : memref<32x128xf32, #tpu.memory_space<vmem>>, vector<32x128xf32>,
    return
  }
  func.func @transform_0(%arg0: i32) -> (i32, i32) {
    %c0_i32 = arith.constant 0 : i32
    %c0_i32_0 = arith.constant 0 : i32
    return %arg0, %c0_i32 : i32, i32
  }
  func.func @transform_1(%arg0: i32) -> (i32, i32) {
    %c0_i32 = arith.constant 0 : i32
    %c0_i32_0 = arith.constant 0 : i32
    %c0_i32_1 = arith.constant 0 : i32
    return %c0_i32, %c0_i32_0 : i32, i32
  }
  func.func @transform_2(%arg0: i32) -> (i32, i32) {
    %c0_i32 = arith.constant 0 : i32
    %c0_i32_0 = arith.constant 0 : i32
    %c0_i32_1 = arith.constant 0 : i32
    return %c0_i32, %c0_i32_0 : i32, i32
  }
  func.func @transform_3(%arg0: i32) -> (i32, i32, i32) {
    %c0_i32 = arith.constant 0 : i32
    %c0_i32_0 = arith.constant 0 : i32
    %c0_i32_1 = arith.constant 0 : i32
    %c0_i32_2 = arith.constant 0 : i32
    return %c0_i32, %c0_i32_0, %c0_i32_1 : i32, i32, i32
  }
  func.func @transform_4(%arg0: i32) -> (i32, i32, i32) {
    %c0_i32 = arith.constant 0 : i32
    %c0_i32_0 = arith.constant 0 : i32
    %c0_i32_1 = arith.constant 0 : i32
    %c0_i32_2 = arith.constant 0 : i32
    return %c0_i32, %c0_i32_0, %c0_i32_1 : i32, i32, i32
  }
  func.func @transform_5(%arg0: i32) -> (i32, i32, i32) {
    %c0_i32 = arith.constant 0 : i32
    %c0_i32_0 = arith.constant 0 : i32
    %c0_i32_1 = arith.constant 0 : i32
    %c0_i32_2 = arith.constant 0 : i32
    return %c0_i32, %c0_i32_0, %c0_i32_1 : i32, i32, i32
  }
  func.func @transform_6(%arg0: i32) -> (i32, i32, i32) {
    %c0_i32 = arith.constant 0 : i32
    %c0_i32_0 = arith.constant 0 : i32
    %c0_i32_1 = arith.constant 0 : i32
    %c0_i32_2 = arith.constant 0 : i32
    return %c0_i32, %c0_i32_0, %c0_i32_1 : i32, i32, i32
  }
  func.func @transform_7(%arg0: i32) -> (i32, i32, i32) {
    %c0_i32 = arith.constant 0 : i32
    %c0_i32_0 = arith.constant 0 : i32
    %c0_i32_1 = arith.constant 0 : i32
    %c0_i32_2 = arith.constant 0 : i32
    return %c0_i32, %c0_i32_0, %c0_i32_1 : i32, i32, i32
  }
  func.func @transform_8(%arg0: i32) -> (i32, i32, i32) {
    %c0_i32 = arith.constant 0 : i32
    %c0_i32_0 = arith.constant 0 : i32
    %c0_i32_1 = arith.constant 0 : i32
    %c0_i32_2 = arith.constant 0 : i32
    return %c0_i32, %c0_i32_0, %c0_i32_1 : i32, i32, i32
  }
  func.func @transform_9(%arg0: i32) -> (i32, i32, i32) {
    %c0_i32 = arith.constant 0 : i32
    %c0_i32_0 = arith.constant 0 : i32
    %c0_i32_1 = arith.constant 0 : i32
    %c0_i32_2 = arith.constant 0 : i32
    return %c0_i32, %c0_i32_0, %c0_i32_1 : i32, i32, i32
  }
  func.func @transform_10(%arg0: i32) -> (i32, i32, i32) {
    %c0_i32 = arith.constant 0 : i32
    %c0_i32_0 = arith.constant 0 : i32
    %c0_i32_1 = arith.constant 0 : i32
    %c0_i32_2 = arith.constant 0 : i32
    return %c0_i32, %c0_i32_0, %c0_i32_1 : i32, i32, i32
  }
  func.func @transform_11(%arg0: i32) -> (i32, i32, i32) {
    %c0_i32 = arith.constant 0 : i32
    %c0_i32_0 = arith.constant 0 : i32
    %c0_i32_1 = arith.constant 0 : i32
    %c0_i32_2 = arith.constant 0 : i32
    return %c0_i32, %c0_i32_0, %c0_i32_1 : i32, i32, i32
  }
  func.func @transform_12(%arg0: i32) -> (i32, i32, i32) {
    %c0_i32 = arith.constant 0 : i32
    %c0_i32_0 = arith.constant 0 : i32
    %c0_i32_1 = arith.constant 0 : i32
    %c0_i32_2 = arith.constant 0 : i32
    return %c0_i32, %c0_i32_0, %c0_i32_1 : i32, i32, i32
  }
  func.func @transform_13(%arg0: i32) -> (i32, i32, i32) {
    %c0_i32 = arith.constant 0 : i32
    %c0_i32_0 = arith.constant 0 : i32
    %c0_i32_1 = arith.constant 0 : i32
    %c0_i32_2 = arith.constant 0 : i32
    return %c0_i32, %c0_i32_0, %c0_i32_1 : i32, i32, i32
  }
  func.func @transform_14(%arg0: i32) -> (i32, i32, i32) {
    %c0_i32 = arith.constant 0 : i32
    %c0_i32_0 = arith.constant 0 : i32
    %c0_i32_1 = arith.constant 0 : i32
    %c0_i32_2 = arith.constant 0 : i32
    return %c0_i32, %c0_i32_0, %c0_i32_1 : i32, i32, i32
  }
  func.func @transform_15(%arg0: i32) -> (i32, i32) {
    %c0_i32 = arith.constant 0 : i32
    %c0_i32_0 = arith.constant 0 : i32
    %c0_i32_1 = arith.constant 0 : i32
    return %c0_i32, %c0_i32_0 : i32, i32
  }
  func.func @transform_16(%arg0: i32) -> (i32, i32) {
    %c0_i32 = arith.constant 0 : i32
    %c0_i32_0 = arith.constant 0 : i32
    %c0_i32_1 = arith.constant 0 : i32
    return %c0_i32, %c0_i32_0 : i32, i32
  }
  func.func @transform_17(%arg0: i32) -> (i32, i32) {
    %c0_i32 = arith.constant 0 : i32
    %c0_i32_0 = arith.constant 0 : i32
    %c0_i32_1 = arith.constant 0 : i32
    return %c0_i32, %c0_i32_0 : i32, i32
  }
  func.func @transform_18(%arg0: i32) -> (i32, i32) {
    %c0_i32 = arith.constant 0 : i32
    %c0_i32_0 = arith.constant 0 : i32
    %c0_i32_1 = arith.constant 0 : i32
    return %c0_i32, %c0_i32_0 : i32, i32
  }
  func.func @transform_19(%arg0: i32) -> (i32, i32) {
    %c0_i32 = arith.constant 0 : i32
    %c0_i32_0 = arith.constant 0 : i32
    return %arg0, %c0_i32 : i32, i32
  }
}

</mosaic_0001>

<bundles_post_ra>
// kernel: vit_forward.1
= control target key start
LH: loop header
LB: loop body
LE: loop exit
PB: predicated region body
PF: predicated region fallthrough
CT: control target
= control target key end

     0   :  { %s11221_s0 = inlined_call_operand.vmem [shape: bf16[64,768], index: 0, kind: input, shape index: {}]   ;;  %s11222_s1 = inlined_call_operand.vmem [shape: bf16[768,128], index: 1, kind: input, shape index: {}]   ;;  %s11223_s2 = inlined_call_operand.vmem [shape: f32[32,128], index: 2, kind: input, shape index: {}]   ;;  %s11224_s3 = inlined_call_operand.vmem [shape: f32[2,1,128], index: 3, kind: input, shape index: {}]   ;;  %s11225_s4 = inlined_call_operand.vmem [shape: f32[2,1,128], index: 4, kind: input, shape index: {}]   ;;  %s11226_s5 = inlined_call_operand.vmem [shape: bf16[2,128,384], index: 5, kind: input, shape index: {}]   ;;  %s11227_s6 = inlined_call_operand.vmem [shape: f32[2,1,384], index: 6, kind: input, shape index: {}]   ;;  %s11228_s7 = inlined_call_operand.vmem [shape: bf16[2,128,128], index: 7, kind: input, shape index: {}]   ;;  %s11229_s8 = inlined_call_operand.vmem [shape: f32[2,1,128], index: 8, kind: input, shape index: {}]   ;;  %s11230_s9 = inlined_call_operand.vmem [shape: f32[2,1,128], index: 9, kind: input, shape index: {}]   ;;  %s11231_s10 = inlined_call_operand.vmem [shape: f32[2,1,128], index: 10, kind: input, shape index: {}]   ;;  %s11232_s11 = inlined_call_operand.vmem [shape: bf16[2,128,256], index: 11, kind: input, shape index: {}]   ;;  %s11233_s12 = inlined_call_operand.vmem [shape: f32[2,1,256], index: 12, kind: input, shape index: {}]   ;;  %s11234_s13 = inlined_call_operand.vmem [shape: bf16[2,256,128], index: 13, kind: input, shape index: {}]   ;;  %s11235_s14 = inlined_call_operand.vmem [shape: f32[2,1,128], index: 14, kind: input, shape index: {}]   ;;  %s11236_s15 = inlined_call_operand.vmem [shape: f32[1,128], index: 15, kind: input, shape index: {}]   ;;  %s11237_s16 = inlined_call_operand.vmem [shape: f32[1,128], index: 16, kind: input, shape index: {}]   ;;  %s11238_s17 = inlined_call_operand.vmem [shape: bf16[128,128], index: 17, kind: input, shape index: {}]   ;;  %s11239_s18 = inlined_call_operand.vmem [shape: f32[1,128], index: 18, kind: input, shape index: {}]   ;;  %s11240_s19 = inlined_call_operand.vmem [shape: f32[64,128], index: 19, kind: output, shape index: {}]  }
   0x1   :  { %11250 = sst [smem:[#allocation2_spill]] %s11221_s0  ;;  %s9308_s0 = smov 0  }
   0x2   :  { %11251 = sst [smem:[#allocation3_spill]] %s11222_s1 }
   0x3   :  { %11252 = sst [smem:[#allocation4_spill]] %s11223_s2 }
   0x4   :  { %11253 = sst [smem:[#allocation5_spill]] %s11224_s3 }
   0x5 LB: > { %s7467_s30 = sadd.s32 4294967295, %s9199_s0   ;;  %p7471_p0 = scmp.ge.s32.totalorder %s9199_s0, 1  ;;  %s9199_s0 = sphi %s9308_s0, %s29_s0  }
   0x6   : > { %p539_p1 = scmp.lt.s32.totalorder %s9199_s0, 3 }
   0x8   : > { %p540_p2 = pnand %p7471_p0, %p539_p1 }
   0x9   : > { %s11254_s1 = sld [smem:[#allocation3_spill]] (!%p540_p2)  ;;  %s7472_s25 = sshll.u32 (!%p540_p2), %s7467_s30, 2  ;;  %vm9203_vm0 = vmmov (!%p540_p2), 0   ;;  %vm1606_vm1 = vcmask (!%p540_p2), 261120   ;;  %vm1846_vm2 = vcmask (!%p540_p2), 1043456   ;;  %vm1794_vm4 = vcmask (!%p540_p2), 64512  }
   0xa   : > { %543 = sbr.rel (%p540_p2) target bundleno = 9286 (0x2446), region = 96  ;;  %p597_p3 = scmp.lt.s32.totalorder (!%p540_p2), %s7472_s25, 7  ;;  %vm3428_vm5 = vcmask (!%p540_p2), 523264   ;;  %vm3437_vm6 = vcmask (!%p540_p2), 785408  }
   0xb   : > { %s11255_s2 = sld [smem:[#allocation2_spill]] (!%p540_p2)  ;;  %s11257_s20 = sld [smem:[#allocation5_spill]] (!%p540_p2) }
   0xc   : > { %s11248_s3 = smov (!%p540_p2), 96   ;;  %s11246_s26 = smov (!%p540_p2), 64  }
   0xd   : > { %s11244_s27 = smov (!%p540_p2), 32   ;;  %s11260_s29 = smov (!%p540_p2), 32  }
   0xf   : > { %v8727_v0 = vld [vmem:[%s11254_s1 + $0x40] sm:$0xff] (!%p540_p2)   ;;  %v8731_v4 = vld [vmem:[%s11254_s1 + $0x48] sm:$0xff] (!%p540_p2)   ;;  %v8735_v8 = vld [vmem:[%s11254_s1 + $0x50] sm:$0xff] (!%p540_p2)  }
  0x10   : > { %v8728_v1 = vld [vmem:[%s11254_s1 + $0xc0] sm:$0xff] (!%p540_p2)   ;;  %7909 = vmatprep.subr.bf16.mxu0 (!%p540_p2), %v8727_v0  ;;  %v8732_v5 = vld [vmem:[%s11254_s1 + $0xc8] sm:$0xff] (!%p540_p2)   ;;  %v8736_v9 = vld [vmem:[%s11254_s1 + $0xd0] sm:$0xff] (!%p540_p2)  }
  0x11   : > { %v8729_v2 = vld [vmem:[%s11254_s1] sm:$0xff]   ;;  %7937 = vmatprep.subr.bf16.mxu1 %v8728_v1  ;;  %v8733_v6 = vld [vmem:[%s11254_s1 + $0x8] sm:$0xff]   ;;  %v8737_v10 = vld [vmem:[%s11254_s1 + $0x10] sm:$0xff]   ;;  %s11262_s25 = smov (!%p597_p3, %s7472_s25), 7 }
  0x12   : > { %v8730_v3 = vld [vmem:[%s11254_s1 + $0x80] sm:$0xff]   ;;  %7910 = vmatpush3.bf16.msra.mxu0 %v8729_v2  ;;  %v8734_v7 = vld [vmem:[%s11254_s1 + $0x88] sm:$0xff]   ;;  %v8738_v11 = vld [vmem:[%s11254_s1 + $0x90] sm:$0xff]   ;;  %s8711_s23 = smul.u32 24, %s11262_s25  ;;  %s7475_s22 = sshll.u32 %s11262_s25, 3 }
  0x13   : > { %7938 = vmatpush3.bf16.msra.mxu1 %v8730_v3  ;;  %7911 = vmatprep.subr.bf16.mxu0 %v8731_v4  ;;  %v8739_v12 = vld [vmem:[%s11254_s1 + $0x58] sm:$0xff]   ;;  %v8743_v16 = vld [vmem:[%s11254_s1 + $0x60] sm:$0xff]   ;;  %v8747_v20 = vld [vmem:[%s11254_s1 + $0x68] sm:$0xff]   ;;  %s607_s28 = scalar_lea.vmem %s11240_s19, %s7475_s22 }
  0x14   : > { %7939 = vmatprep.subr.bf16.mxu1 %v8732_v5  ;;  %v8740_v13 = vld [vmem:[%s11254_s1 + $0xd8] sm:$0xff]   ;;  %v8744_v17 = vld [vmem:[%s11254_s1 + $0xe0] sm:$0xff]   ;;  %v8748_v21 = vld [vmem:[%s11254_s1 + $0xe8] sm:$0xff]   ;;  %s9414_s24 = scalar_lea.vmem %s11255_s2, %s8711_s23  ;;  %s11256_s23 = sld [smem:[#allocation4_spill]] }
  0x15   : > { %v8741_v14 = vld [vmem:[%s11254_s1 + $0x18] sm:$0xff]   ;;  %v8745_v18 = vld [vmem:[%s11254_s1 + $0x20] sm:$0xff]   ;;  %v8749_v22 = vld [vmem:[%s11254_s1 + $0x28] sm:$0xff]  }
  0x16   : > { %7912 = vmatpush3.bf16.msra.mxu0 %v8733_v6  ;;  %v8742_v15 = vld [vmem:[%s11254_s1 + $0x98] sm:$0xff]   ;;  %v8746_v19 = vld [vmem:[%s11254_s1 + $0xa0] sm:$0xff]   ;;  %v8750_v23 = vld [vmem:[%s11254_s1 + $0xa8] sm:$0xff]  }
  0x17   : > { %7940 = vmatpush3.bf16.msra.mxu1 %v8734_v7  ;;  %7913 = vmatprep.subr.bf16.mxu0 %v8735_v8  ;;  %v8751_v24 = vld [vmem:[%s11254_s1 + $0x70] sm:$0xff]   ;;  %v8755_v28 = vld [vmem:[%s11254_s1 + $0x78] sm:$0xff]   ;;  %v8762_v34 = vld [vmem:[%s9414_s24 + $0x8] ss:$24 sps:$4 sm:$0xff]  }
  0x18   : > { %7941 = vmatprep.subr.bf16.mxu1 %v8736_v9  ;;  %v8752_v25 = vld [vmem:[%s11254_s1 + $0xf0] sm:$0xff]   ;;  %v8756_v29 = vld [vmem:[%s11254_s1 + $0xf8] sm:$0xff]   ;;  %v8764_v35 = vld [vmem:[%s9414_s24 + $0xc] ss:$24 sps:$4 sm:$0xff]  }
  0x19   : > { %v8753_v26 = vld [vmem:[%s11254_s1 + $0x30] sm:$0xff]   ;;  %v8757_v30 = vld [vmem:[%s11254_s1 + $0x38] sm:$0xff]   ;;  %v8765_v36 = vld [vmem:[%s11254_s1 + $0x140] sm:$0xff]   ;;  %1151 = vmatprep.mubr.bf16.mxu1 %v8764_v35 }
  0x1a   : > { %7914 = vmatpush3.bf16.msra.mxu0 %v8737_v10  ;;  %v8754_v27 = vld [vmem:[%s11254_s1 + $0xb0] sm:$0xff]   ;;  %v8758_v31 = vld [vmem:[%s11254_s1 + $0xb8] sm:$0xff]   ;;  %v8766_v37 = vld [vmem:[%s11254_s1 + $0x100] sm:$0xff]  }
  0x1b   : > { %7942 = vmatpush3.bf16.msra.mxu1 %v8738_v11  ;;  %7915 = vmatprep.subr.bf16.mxu0 %v8739_v12  ;;  %v8759_v32 = vld [vmem:[%s9414_s24] ss:$24 sps:$4 sm:$0xff]   ;;  %v8761_v33 = vld [vmem:[%s9414_s24 + $0x4] ss:$24 sps:$4 sm:$0xff]   ;;  %v8767_v38 = vld [vmem:[%s11254_s1 + $0x148] sm:$0xff]  }
  0x1c   : > { %7943 = vmatprep.subr.bf16.mxu1 %v8740_v13  ;;  %1102 = vmatprep.mubr.bf16.mxu0 %v8761_v33  ;;  %v8768_v39 = vld [vmem:[%s11254_s1 + $0x108] sm:$0xff]   ;;  %v8769_v40 = vld [vmem:[%s11254_s1 + $0x150] sm:$0xff]   ;;  %v8771_v42 = vld [vmem:[%s11254_s1 + $0x158] sm:$0xff]  }
  0x1d   : > { %v8770_v41 = vld [vmem:[%s11254_s1 + $0x110] sm:$0xff]   ;;  %v8772_v43 = vld [vmem:[%s11254_s1 + $0x118] sm:$0xff]   ;;  %v8773_v46 = vld [vmem:[%s11254_s1 + $0x160] sm:$0xff]  }
  0x1e   : > { %7916 = vmatpush3.bf16.msra.mxu0 %v8741_v14  ;;  %v8775_v44 = vld [vmem:[%s9414_s24 + $0x34] ss:$24 sps:$4 sm:$0xff]   ;;  %v8780_v47 = vld [vmem:[%s9414_s24 + $0x30] ss:$24 sps:$4 sm:$0xff]   ;;  %v8774_v49 = vld [vmem:[%s11254_s1 + $0x120] sm:$0xff]  }
  0x1f   : > { %7944 = vmatpush3.bf16.msra.mxu1 %v8742_v15  ;;  %7917 = vmatprep.subr.bf16.mxu0 %v8743_v16  ;;  %v8777_v45 = vld [vmem:[%s9414_s24 + $0x3c] ss:$24 sps:$4 sm:$0xff]   ;;  %v8781_v48 = vld [vmem:[%s9414_s24 + $0x38] ss:$24 sps:$4 sm:$0xff]   ;;  %v8779_v50 = vld [vmem:[%s11254_s1 + $0x168] sm:$0xff]  }
  0x20   : > { %7945 = vmatprep.subr.bf16.mxu1 %v8744_v17  ;;  %v8782_v51 = vld [vmem:[%s11254_s1 + $0x128] sm:$0xff]   ;;  %v8783_v53 = vld [vmem:[%s11254_s1 + $0x170] sm:$0xff]   ;;  %v8785_v55 = vld [vmem:[%s11254_s1 + $0x178] sm:$0xff]  }
  0x21   : > { %v8789_v52 = vld [vmem:[%s9414_s24 + $0x14] ss:$24 sps:$4 sm:$0xff]   ;;  %v8786_v56 = vld [vmem:[%s11254_s1 + $0x138] sm:$0xff]   ;;  %v8787_v57 = vld [vmem:[%s9414_s24 + $0x10] ss:$24 sps:$4 sm:$0xff]  }
  0x22   : > { %7918 = vmatpush3.bf16.msra.mxu0 %v8745_v18  ;;  %v8784_v54 = vld [vmem:[%s11254_s1 + $0x130] sm:$0xff]   ;;  %v8790_v58 = vld [vmem:[%s9414_s24 + $0x44] ss:$24 sps:$4 sm:$0xff]   ;;  %v8792_v59 = vld [vmem:[%s9414_s24 + $0x40] ss:$24 sps:$4 sm:$0xff]  }
  0x23   : > { %7946 = vmatpush3.bf16.msra.mxu1 %v8746_v19  ;;  %7919 = vmatprep.subr.bf16.mxu0 %v8747_v20 }
  0x24   : > { %7947 = vmatprep.subr.bf16.mxu1 %v8748_v21 }
  0x26   : > { %7920 = vmatpush3.bf16.msra.mxu0 %v8749_v22 }
  0x27   : > { %7948 = vmatpush3.bf16.msra.mxu1 %v8750_v23  ;;  %7921 = vmatprep.subr.bf16.mxu0 %v8751_v24 }
  0x28   : > { %7949 = vmatprep.subr.bf16.mxu1 %v8752_v25 }
  0x2a   : > { %7922 = vmatpush3.bf16.msra.mxu0 %v8753_v26 }
  0x2b   : > { %7950 = vmatpush3.bf16.msra.mxu1 %v8754_v27  ;;  %7923 = vmatprep.subr.bf16.mxu0 %v8755_v28 }
  0x2c   : > { %7951 = vmatprep.subr.bf16.mxu1 %v8756_v29  ;;  %v610_v29 = vld [vmem:[%s11256_s23] sm:$0xff] }
  0x2e   : > { %7924 = vmatpush3.bf16.msra.mxu0 %v8757_v30 }
  0x2f   : > { %7952 = vmatpush3.bf16.msra.mxu1 %v8758_v31  ;;  %7965 = vmatprep.subr.bf16.mxu0 %v8765_v36 }
  0x31   : > { %1103 = vmatmul.mubr.bf16.vlgmr.msra.gmra.mrb[0].mxu0 %v8759_v32 }
  0x32   : > { %1152 = vmatmul.mubr.bf16.vlgmr.msra.gmra.mrb[0].mxu1 %v8762_v34  ;;  %7966 = vmatpush3.bf16.msra.mxu0 %v8766_v37  ;;  %v611_v34 = vld [vmem:[%s11256_s23 + $0x8] sm:$0xff] }
  0x33   : > { %7967 = vmatprep.subr.bf16.mxu0 %v8767_v38  ;;  %1110 = vmatprep.mubr.bf16.mxu0 %v8775_v44 }
  0x34   : > { %1159 = vmatprep.mubr.bf16.mxu1 %v8777_v45 }
  0x36   : > { %7968 = vmatpush3.bf16.msra.mxu0 %v8768_v39 }
  0x37   : > { %7969 = vmatprep.subr.bf16.mxu0 %v8769_v40 }
  0x39   : > { %1111 = vmatmul.mubr.bf16.gmra.mrb[4].mxu0 %v8780_v47 }
  0x3a   : > { %7970 = vmatpush3.bf16.msra.mxu0 %v8770_v41  ;;  %1160 = vmatmul.mubr.bf16.gmra.mrb[4].mxu1 %v8781_v48  ;;  %v612_v41 = vld [vmem:[%s11256_s23 + $0x10] sm:$0xff]  ;;  %v8793_v48 = vld [vmem:[%s11226_s5] ss:$12 sps:$4 sm:$0xff]  }
  0x3b   : > { %7971 = vmatprep.subr.bf16.mxu0 %v8771_v42  ;;  %1200 = vmatprep.mubr.bf16.mxu0 %v8789_v52 }
  0x3e   : > { %7972 = vmatpush3.bf16.msra.mxu0 %v8772_v43 }
  0x3f   : > { %7973 = vmatprep.subr.bf16.mxu0 %v8773_v46  ;;  %v613_v46 = vld [vmem:[%s11256_s23 + $0x18] sm:$0xff] }
  0x42   : > { %7974 = vmatpush3.bf16.msra.mxu0 %v8774_v49  ;;  %v8795_v49 = vld [vmem:[%s11226_s5 + $0x4] ss:$12 sps:$4 sm:$0xff]  }
  0x43   : > { %7975 = vmatprep.subr.bf16.mxu0 %v8779_v50  ;;  %v8798_v50 = vld [vmem:[%s11226_s5 + $0x1c] ss:$12 sps:$4 sm:$0xff]   ;;  %1471 = vmatprep.subr.bf16.mxu1 %v8795_v49 }
  0x44   : > { %1472 = vmatpush1.bf16.msra.mxu1 %v8793_v48 }
  0x45   : > { %1473 = vmatprep.subr.bf16.mxu1 %v8798_v50 }
  0x46   : > { %7976 = vmatpush3.bf16.msra.mxu0 %v8782_v51  ;;  %v8796_v51 = vld [vmem:[%s11226_s5 + $0x18] ss:$12 sps:$4 sm:$0xff]  }
  0x47   : > { %7977 = vmatprep.subr.bf16.mxu0 %v8783_v53 }
  0x48   : > { %1474 = vmatpush1.bf16.msra.mxu1 %v8796_v51 }
  0x4a   : > { %7978 = vmatpush3.bf16.msra.mxu0 %v8784_v54 }
  0x4b   : > { %7979 = vmatprep.subr.bf16.mxu0 %v8785_v55 }
  0x4e   : > { %7980 = vmatpush3.bf16.msra.mxu0 %v8786_v56 }
  0x51   : > { %1201 = vmatmul.mubr.bf16.vlgmr.msra.gmra.mrb[8].mxu0 %v8787_v57 }
  0x52   : > { %1208 = vmatprep.mubr.bf16.mxu0 %v8790_v58 }
  0x59   : > { %1209 = vmatmul.mubr.bf16.gmra.mrb[12].mxu0 %v8792_v59 }
 0x104   : > { %v7925_v60 = vpop.f32.mrb[0].mxu0 }
 0x105   : > { %v7953_v61 = vpop.f32.mrb[0].mxu1  ;;  %v7926_v62 = vpop.f32.mrb[1].mxu0 }
 0x106   : > { %v7927_v63 = vadd.f32 %v7926_v62, %v7925_v60  ;;  %v7954_v0 = vpop.f32.mrb[1].mxu1  ;;  %v7928_v1 = vpop.f32.mrb[2].mxu0 }
 0x107   : > { %v7955_v2 = vadd.f32 %v7954_v0, %v7953_v61  ;;  %v7956_v3 = vpop.f32.mrb[2].mxu1  ;;  %v7929_v4 = vpop.f32.mrb[3].mxu0 }
 0x108   : > { %v7930_v5 = vadd.f32 %v7929_v4, %v7928_v1  ;;  %v7957_v6 = vpop.f32.mrb[3].mxu1  ;;  %v8801_v4 = vld [vmem:[%s11226_s5 + $0x34] ss:$12 sps:$4 sm:$0xff]  }
 0x109   : > { %v1154_v7 = vadd.f32 %v7955_v2, %v7927_v63  ;;  %v7958_v8 = vadd.f32 %v7957_v6, %v7956_v3  ;;  %v8799_v6 = vld [vmem:[%s11226_s5 + $0x30] ss:$12 sps:$4 sm:$0xff]   ;;  %1475 = vmatprep.subr.bf16.mxu1 %v8801_v4 }
 0x10a   : > { %1476 = vmatpush1.bf16.msra.mxu1 %v8799_v6 }
 0x10b   : > { %v1157_v9 = vadd.f32 %v7958_v8, %v7930_v5  ;;  %v8802_v5 = vld [vmem:[%s11226_s5 + $0x8] ss:$12 sps:$4 sm:$0xff]   ;;  %v8806_v8 = vld [vmem:[%s11226_s5 + $0x20] ss:$12 sps:$4 sm:$0xff]  }
 0x10c   : > { %v7931_v10 = vpop.f32.mrb[4].mxu0  ;;  %8227 = vmatprep.subr.bf16.mxu0 %v8802_v5 }
 0x10d   : > { %v7959_v11 = vpop.f32.mrb[4].mxu1  ;;  %v7932_v12 = vpop.f32.mrb[5].mxu0  ;;  %8228 = vmatpush3.bf16.msra.mxu0 %v8802_v5 }
 0x10e   : > { %v7933_v13 = vadd.f32 %v7932_v12, %v7931_v10  ;;  %v7960_v14 = vpop.f32.mrb[5].mxu1  ;;  %v7934_v15 = vpop.f32.mrb[6].mxu0  ;;  %8229 = vmatprep.subr.bf16.mxu0 %v8806_v8  ;;  %v8809_v10 = vld [vmem:[%s11226_s5 + $0x64] ss:$12 sps:$4 sm:$0xff]   ;;  %v8807_v12 = vld [vmem:[%s11226_s5 + $0x60] ss:$12 sps:$4 sm:$0xff]  }
 0x10f   : > { %v7961_v16 = vadd.f32 %v7960_v14, %v7959_v11  ;;  %v7962_v17 = vpop.f32.mrb[6].mxu1  ;;  %v7935_v18 = vpop.f32.mrb[7].mxu0  ;;  %v8810_v11 = vld [vmem:[%s11226_s5 + $0x38] ss:$12 sps:$4 sm:$0xff]   ;;  %v8814_v14 = vld [vmem:[%s11226_s5 + $0x50] ss:$12 sps:$4 sm:$0xff]  }
 0x110   : > { %v7936_v19 = vadd.f32 %v7935_v18, %v7934_v15  ;;  %v7963_v20 = vpop.f32.mrb[7].mxu1  ;;  %v8811_v15 = vld [vmem:[%s11226_s5 + $0x78] ss:$12 sps:$4 sm:$0xff]   ;;  %v8815_v18 = vld [vmem:[%s11226_s5 + $0x90] ss:$12 sps:$4 sm:$0xff]  }
 0x111   : > { %v1162_v21 = vadd.f32 %v7961_v16, %v7933_v13  ;;  %v7964_v22 = vadd.f32 %v7963_v20, %v7962_v17  ;;  %8230 = vmatpush3.bf16.msra.mxu0 %v8806_v8  ;;  %v8813_v13 = vld [vmem:[%s11226_s5 + $0x7c] ss:$12 sps:$4 sm:$0xff]   ;;  %v8817_v16 = vld [vmem:[%s11226_s5 + $0x94] ss:$12 sps:$4 sm:$0xff]   ;;  %v8821_v20 = vld [vmem:[%s11226_s5 + $0xac] ss:$12 sps:$4 sm:$0xff]  }
 0x112   : > { %8231 = vmatprep.subr.bf16.mxu0 %v8810_v11  ;;  %v8818_v17 = vld [vmem:[%s11226_s5 + $0x68] ss:$12 sps:$4 sm:$0xff]  }
 0x113   : > { %v1165_v23 = vadd.f32 %v7964_v22, %v7936_v19  ;;  %v8819_v19 = vld [vmem:[%s11226_s5 + $0xa8] ss:$12 sps:$4 sm:$0xff]   ;;  %v9201_v22 = vmov 0  }
 0x114   : > { %1503 = vmatprep.mubr.bf16.mxu1 %v9201_v22 }
 0x115   : > { %8232 = vmatpush3.bf16.msra.mxu0 %v8810_v11 }
 0x116   : > { %8233 = vmatprep.subr.bf16.mxu0 %v8814_v14 }
 0x119   : > { %8234 = vmatpush3.bf16.msra.mxu0 %v8814_v14 }
 0x11a   : > { %8235 = vmatprep.subr.bf16.mxu0 %v8818_v17 }
 0x11d   : > { %8236 = vmatpush3.bf16.msra.mxu0 %v8818_v17 }
 0x124   : > { %v7981_v24 = vpop.f32.mrb[8].mxu0 }
 0x125   : > { %v7982_v25 = vpop.f32.mrb[9].mxu0 }
 0x126   : > { %v7983_v26 = vadd.f32 %v7982_v25, %v7981_v24  ;;  %v7984_v27 = vpop.f32.mrb[10].mxu0  ;;  %v8824_v24 = vld [vmem:[%s11226_s5 + $0xb0] ss:$12 sps:$4 sm:$0xff]  }
 0x127   : > { %v7985_v28 = vpop.f32.mrb[11].mxu0 }
 0x128   : > { %v1203_v30 = vadd.f32 %v7983_v26, %v1154_v7  ;;  %v7986_v31 = vadd.f32 %v7985_v28, %v7984_v27  ;;  %v8805_v7 = vld [vmem:[%s11226_s5 + $0x4c] ss:$12 sps:$4 sm:$0xff]  }
 0x129   : > { %1477 = vmatprep.subr.bf16.mxu1 %v8805_v7 }
 0x12a   : > { %v1206_v32 = vadd.f32 %v7986_v31, %v1157_v9  ;;  %v9485_v33 = vadd.f32 %v1203_v30, %v610_v29  ;;  %v8803_v9 = vld [vmem:[%s11226_s5 + $0x48] ss:$12 sps:$4 sm:$0xff]  }
 0x12b   : > { %1478 = vmatpush1.bf16.msra.mxu1 %v8803_v9 }
 0x12c   : > { %v7987_v35 = vpop.f32.mrb[12].mxu0  ;;  %1227 = vadd.xlane.f32.xlu0 %v9485_v33  ;;  %v9491_v39 = vadd.f32 %v1206_v32, %v611_v34  ;;  %1479 = vmatprep.subr.bf16.mxu1 %v8809_v10 }
 0x12d   : > { %v7988_v36 = vpop.f32.mrb[13].mxu0 }
 0x12e   : > { %v7989_v37 = vadd.f32 %v7988_v36, %v7987_v35  ;;  %v7990_v38 = vpop.f32.mrb[14].mxu0 }
 0x12f   : > { %v7991_v40 = vpop.f32.mrb[15].mxu0  ;;  %1480 = vmatpush1.bf16.msra.mxu1 %v8807_v12 }
 0x130   : > { %v1211_v42 = vadd.f32 %v7989_v37, %v1162_v21  ;;  %v7992_v43 = vadd.f32 %v7991_v40, %v7990_v38  ;;  %1229 = vadd.xlane.f32.xlu0 %v9491_v39  ;;  %1481 = vmatprep.subr.bf16.mxu1 %v8813_v13  ;;  %v8822_v21 = vld [vmem:[%s11226_s5 + $0x80] ss:$12 sps:$4 sm:$0xff]  }
 0x131   : > { %8237 = vmatprep.subr.bf16.mxu0 %v8822_v21 }
 0x132   : > { %v1214_v44 = vadd.f32 %v7992_v43, %v1165_v23  ;;  %v9497_v45 = vadd.f32 %v1211_v42, %v612_v41  ;;  %8238 = vmatpush3.bf16.msra.mxu0 %v8822_v21  ;;  %v8823_v23 = vld [vmem:[%s11226_s5 + $0x98] ss:$12 sps:$4 sm:$0xff]   ;;  %v7536_v41 = vld [vmem:[%s11257_s20] ss:$0 sm:$0xff] }
 0x133   : > { %1482 = vmatpush1.bf16.msra.mxu1 %v8811_v15  ;;  %8239 = vmatprep.subr.bf16.mxu0 %v8823_v23 }
 0x134   : > { %1231 = vadd.xlane.f32.xlu1 %v9497_v45  ;;  %v9503_v47 = vadd.f32 %v1214_v44, %v613_v46  ;;  %1483 = vmatprep.subr.bf16.mxu1 %v8817_v16  ;;  %v7537_v46 = vld [vmem:[%s11225_s4] ss:$0 sm:$0xff] }
 0x136   : > { %8240 = vmatpush3.bf16.msra.mxu0 %v8823_v23 }
 0x137   : > { %1484 = vmatpush1.bf16.msra.mxu1 %v8815_v18  ;;  %8241 = vmatprep.subr.bf16.mxu0 %v8824_v24 }
 0x138   : > { %1233 = vadd.xlane.f32.xlu1 %v9503_v47  ;;  %1485 = vmatprep.subr.bf16.mxu1 %v8821_v20 }
 0x13a   : > { %8242 = vmatpush3.bf16.msra.mxu0 %v8824_v24 }
 0x13b   : > { %1486 = vmatpush1.bf16.msra.mxu1 %v8819_v19 }
 0x1b9   : > { %v1228_v52 = vpop.xlane.xlu0 %1227 }
 0x1ba   : > { %v1236_v53 = vmul.f32 0.0078125, %v1228_v52 }
 0x1bc   : > { %v9519_v54 = vsub.f32 %v9485_v33, %v1236_v53 }
 0x1bd   : > { %v1230_v55 = vpop.xlane.xlu0 %1229 }
 0x1be   : > { %v1237_v56 = vmul.f32 0.0078125, %v1230_v55  ;;  %v1244_v57 = vmul.f32 %v9519_v54, %v9519_v54 }
 0x1c0   : > { %1248 = vadd.xlane.f32.xlu0 %v1244_v57  ;;  %v9524_v58 = vsub.f32 %v9491_v39, %v1237_v56 }
 0x1c1   : > { %v1232_v59 = vpop.xlane.xlu1 %1231 }
 0x1c2   : > { %v1238_v60 = vmul.f32 0.0078125, %v1232_v59  ;;  %v1245_v61 = vmul.f32 %v9524_v58, %v9524_v58 }
 0x1c4   : > { %1250 = vadd.xlane.f32.xlu1 %v1245_v61  ;;  %v9529_v62 = vsub.f32 %v9497_v45, %v1238_v60  ;;  %v9202_v61 = vmov 0.0  }
 0x1c5   : > { %v1234_v63 = vpop.xlane.xlu1 %1233  ;;  %8247 = vmatprep.subr.bf16.mxu1 %v9202_v61  ;;  %8265 = vmatprep.subr.bf16.mxu0 %v9202_v61 }
 0x1c6   : > { %v1239_v0 = vmul.f32 0.0078125, %v1234_v63  ;;  %v1246_v1 = vmul.f32 %v9529_v62, %v9529_v62 }
 0x1c8   : > { %1252 = vadd.xlane.f32.xlu0 %v1246_v1  ;;  %v9534_v2 = vsub.f32 %v9503_v47, %v1239_v0  ;;  %v1326_v1 = vld [vmem:[%s11227_s6] sm:$0x7] }
 0x1ca   : > { %v1247_v3 = vmul.f32 %v9534_v2, %v9534_v2 }
 0x1cc   : > { %1254 = vadd.xlane.f32.xlu1 %v1247_v3 }
 0x24d   : > { %v1249_v25 = vpop.xlane.xlu0 %1248 }
 0x24e   : > { %v1256_v26 = vmul.f32 0.0078125, %v1249_v25 }
 0x250   : > { %v1260_v27 = vadd.f32 1e-12, %v1256_v26 }
 0x251   : > { %v1251_v28 = vpop.xlane.xlu1 %1250 }
 0x252   : > { %8961 = vrsqrt.f32 %v1260_v27  ;;  %v1257_v29 = vmul.f32 0.0078125, %v1251_v28 }
 0x254   : > { %v1261_v30 = vadd.f32 1e-12, %v1257_v29 }
 0x255   : > { %v1253_v31 = vpop.xlane.xlu0 %1252 }
 0x256   : > { %8963 = vrsqrt.f32 %v1261_v30  ;;  %v1258_v32 = vmul.f32 0.0078125, %v1253_v31 }
 0x258   : > { %v1262_v34 = vadd.f32 1e-12, %v1258_v32 }
 0x259   : > { %v1255_v35 = vpop.xlane.xlu1 %1254 }
 0x25a   : > { %8965 = vrsqrt.f32 %v1262_v34  ;;  %v1259_v36 = vmul.f32 0.0078125, %v1255_v35 }
 0x25c   : > { %v8962_v37 = vpop.eup %8961  ;;  %v1263_v38 = vadd.f32 1e-12, %v1259_v36 }
 0x25d   : > { %v1268_v40 = vmul.f32 %v8962_v37, %v9519_v54 }
 0x25e   : > { %8967 = vrsqrt.f32 %v1263_v38 }
 0x25f   : > { %v1278_v43 = vmul.f32 %v7536_v41, %v1268_v40 }
 0x260   : > { %v8964_v42 = vpop.eup %8963 }
 0x261   : > { %v1269_v44 = vmul.f32 %v8964_v42, %v9524_v58  ;;  %v1288_v50 = vadd.f32 %v7537_v46, %v1278_v43 }
 0x263   : > { %v1279_v48 = vmul.f32 %v7536_v41, %v1269_v44 }
 0x264   : > { %v8966_v49 = vpop.eup %8965 }
 0x265   : > { %v1289_v51 = vadd.f32 %v7537_v46, %v1279_v48  ;;  %v1270_v52 = vmul.f32 %v8966_v49, %v9529_v62  ;;  %v1221_v62 = vlaneseq }
 0x267   : > { %v1292_v53 = vpack.c.bf16 %v1289_v51, %v1288_v50  ;;  %v1280_v56 = vmul.f32 %v7536_v41, %v1270_v52  ;;  %v9617_v63 = vshrl.u32 %v1221_v62, 7  ;;  %v1222_v52 = vand.u32 127, %v1221_v62 }
 0x268   : > { %v8968_v54 = vpop.eup %8967 }
 0x269   : > { %1504 = vmatmul.mubr.bf16.vlgmr.msra.gmra.mrb[8].mxu1 %v1292_v53  ;;  %8243 = vmatprep.mubr.bf16.mxu0 %v1292_v53  ;;  %v1271_v55 = vmul.f32 %v8968_v54, %v9534_v2  ;;  %v1290_v58 = vadd.f32 %v7537_v46, %v1280_v56  ;;  %v9620_v0 = vsub.s32 0, %v9617_v63  ;;  %v9626_v2 = vsub.s32 1, %v9617_v63 }
 0x26a   : > { %1513 = vmatprep.mubr.bf16.mxu1 %v9201_v22  ;;  %v1338_v8 = vsub.s32 2, %v9617_v63  ;;  %vm1223_vm3 = vcmp.lt.s32.totalorder %v1222_v52, 5  ;;  %v9204_v53 = vmov -1e+30  }
 0x26b   : > { %v1281_v57 = vmul.f32 %v7536_v41, %v1271_v55  ;;  %v1331_v3 = vrot.slane %v1326_v1, %v9620_v0  ;;  %v1335_v4 = vrot.slane %v1326_v1, %v9626_v2  ;;  %v9696_v54 = vsel %vm1223_vm3, 0.0, %v9204_v53 }
 0x26c   : > { %v1339_v15 = vrot.slane %v1326_v1, %v1338_v8 }
 0x26d   : > { %v1291_v59 = vadd.f32 %v7537_v46, %v1281_v57 }
 0x26f   : > { %v1293_v60 = vpack.c.bf16 %v1291_v59, %v1290_v58 }
 0x271   : > { %1514 = vmatmul.mubr.bf16.gmra.mrb[12].mxu1 %v1293_v60  ;;  %8244 = vmatmul.mubr.bf16.vlgmr.msra.gmra.mrb[16].mxu0 %v1293_v60 }
 0x272   : > { %8249 = vmatprep.mubr.msk.bf16.mxu1 %vm9203_vm0, %v9202_v61  ;;  %8267 = vmatprep.mubr.msk.bf16.mxu0 %vm9203_vm0, %v9202_v61 }
 0x33c   : > { %v1505_v5 = vpop.f32.mrb[8].mxu1 }
 0x33d   : > { %v9630_v6 = vadd.f32 %v1505_v5, %v1331_v3  ;;  %v1507_v7 = vpop.f32.mrb[9].mxu1 }
 0x33e   : > { %v1508_v9 = vadd.f32 %v1507_v7, %v1335_v4  ;;  %v1509_v10 = vpop.f32.mrb[10].mxu1 }
 0x33f   : > { %v9633_v11 = vadd.f32 %v1509_v10, %v1331_v3  ;;  %v1511_v12 = vpop.f32.mrb[11].mxu1 }
 0x340   : > { %v9636_v13 = vpack.c.bf16 %v1508_v9, %v9630_v6  ;;  %v1512_v14 = vadd.f32 %v1511_v12, %v1335_v4 }
 0x342   : > { %v9641_v16 = vpack.c.bf16 %v1512_v14, %v9633_v11  ;;  %v1605_v17 = vrot.slane %v9636_v13, 4 }
 0x344   : > { %v1515_v18 = vpop.f32.mrb[12].mxu1  ;;  %v8245_v19 = vpop.f32.mrb[16].mxu0  ;;  %v1611_v20 = vsel %vm1606_vm1, %v1605_v17, 0  ;;  %v1653_v36 = vrot.slane %v9641_v16, 4 }
 0x345   : > { %v9645_v21 = vadd.f32 %v1515_v18, %v1331_v3  ;;  %v9647_v23 = vadd.f32 %v8245_v19, %v1339_v15  ;;  %v1517_v24 = vpop.f32.mrb[13].mxu1  ;;  %v1558_v25 = vpop.f32.mrb[17].mxu0  ;;  %8248 = vmatpush3.bf16.xpose.msra.mxu1 %v1611_v20 }
 0x346   : > { %v1518_v26 = vadd.f32 %v1517_v24, %v1335_v4  ;;  %v1519_v27 = vpop.f32.mrb[14].mxu1  ;;  %v8246_v28 = vpop.f32.mrb[18].mxu0  ;;  %8253 = vmatprep.subr.bf16.mxu1 %v9202_v61  ;;  %v1658_v38 = vsel %vm1606_vm1, %v1653_v36, 0  ;;  %v1559_v46 = vadd.f32 %v1558_v25, %v1339_v15 }
 0x347   : > { %v9650_v29 = vadd.f32 %v1519_v27, %v1331_v3  ;;  %v9652_v30 = vadd.f32 %v8246_v28, %v1339_v15  ;;  %v1521_v31 = vpop.f32.mrb[15].mxu1  ;;  %v1561_v32 = vpop.f32.mrb[19].mxu0 }
 0x348   : > { %v9655_v34 = vpack.c.bf16 %v1518_v26, %v9645_v21  ;;  %v1522_v35 = vadd.f32 %v1521_v31, %v1335_v4  ;;  %v1562_v41 = vadd.f32 %v1561_v32, %v1339_v15  ;;  %v9685_v50 = vpack.c.bf16 %v1559_v46, %v1559_v46 }
 0x34a   : > { %v9659_v37 = vpack.c.bf16 %v1522_v35, %v9650_v29  ;;  %v1700_v43 = vrot.slane %v9655_v34, 4  ;;  %v9671_v44 = vpack.c.bf16 %v1562_v41, %v1562_v41  ;;  %v1848_v51 = vsel %vm1846_vm2, %v9685_v50, 0 }
 0x34c   : > { %8250 = vmatmul.mubr.msk.bf16.vlgmr.msra.gmra.mrb[16].mxu1 %vm1606_vm1, %v9636_v13  ;;  %v1747_v40 = vrot.slane %v9659_v37, 4  ;;  %v1705_v48 = vsel %vm1606_vm1, %v1700_v43, 0  ;;  %v1894_v49 = vsel %vm1846_vm2, %v9671_v44, 0 }
 0x34d   : > { %8254 = vmatpush3.bf16.xpose.msra.mxu1 %v1658_v38  ;;  %8255 = vmatprep.mubr.msk.bf16.mxu1 %vm9203_vm0, %v9202_v61 }
 0x34e   : > { %v1752_v42 = vsel %vm1606_vm1, %v1747_v40, 0  ;;  %8259 = vmatprep.subr.bf16.mxu1 %v9202_v61 }
 0x34f   : > { %8266 = vmatpush3.bf16.xpose.msra.mxu0 %v1752_v42 }
 0x350   : > { %8277 = vmatprep.subr.bf16.mxu0 %v9202_v61 }
 0x354   : > { %8256 = vmatmul.mubr.msk.bf16.vlgmr.msra.gmra.mrb[20].mxu1 %vm1606_vm1, %v9641_v16 }
 0x355   : > { %8260 = vmatpush3.bf16.xpose.msra.mxu1 %v1705_v48  ;;  %8261 = vmatprep.mubr.msk.bf16.mxu1 %vm9203_vm0, %v9202_v61 }
 0x356   : > { %8268 = vmatmul.mubr.msk.bf16.vlgmr.msra.gmra.mrb[20].mxu0 %vm1606_vm1, %v9659_v37  ;;  %8271 = vmatprep.subr.bf16.mxu1 %v9202_v61 }
 0x357   : > { %8278 = vmatpush3.bf16.msra.mxu0 %v1894_v49  ;;  %8279 = vmatprep.mubr.msk.bf16.mxu0 %vm9203_vm0, %v9202_v61 }
 0x358   : > { %8289 = vmatprep.subr.bf16.mxu0 %v9202_v61 }
 0x35c   : > { %8262 = vmatmul.mubr.msk.bf16.vlgmr.msra.gmra.mrb[24].mxu1 %vm1606_vm1, %v9655_v34 }
 0x35d   : > { %8272 = vmatpush3.bf16.msra.mxu1 %v1848_v51  ;;  %8273 = vmatprep.mubr.msk.bf16.mxu1 %vm9203_vm0, %v9202_v61 }
 0x35e   : > { %8283 = vmatprep.subr.bf16.mxu1 %v9202_v61 }
 0x41f   : > { %v1647_v55 = vpop.f32.mrb[16].mxu1 }
 0x420   : > { %v1648_v56 = vadd.f32 %v1647_v55, %v9696_v54  ;;  %v8251_v57 = vpop.f32.mrb[17].mxu1 }
 0x421   : > { %v1650_v58 = vpop.f32.mrb[18].mxu1 }
 0x422   : > { %v8252_v59 = vpop.f32.mrb[19].mxu1  ;;  %v1795_v60 = vsel %vm1794_vm4, %v1648_v56, -inf  ;;  %v9720_v58 = vpack.c.bf16 %v9633_v11, %v9633_v11 }
 0x423   : > { %1796 = vmax.xlane.f32.xlu0 %v1795_v60  ;;  %v9724_v59 = vpack.c.bf16 %v9630_v6, %v9630_v6  ;;  %v9732_v60 = vpack.c.bf16 %v9650_v29, %v9650_v29 }
 0x427   : > { %v1694_v1 = vpop.f32.mrb[20].mxu1 }
 0x428   : > { %v1695_v3 = vadd.f32 %v1694_v1, %v9696_v54  ;;  %v8257_v4 = vpop.f32.mrb[21].mxu1  ;;  %v9736_v1 = vpack.c.bf16 %v9645_v21, %v9645_v21 }
 0x429   : > { %v1697_v5 = vpop.f32.mrb[22].mxu1  ;;  %v1788_v62 = vpop.f32.mrb[20].mxu0  ;;  %v9744_v4 = vpack.c.bf16 %v9647_v23, %v9647_v23  ;;  %v9754_v23 = vpack.c.bf16 %v9652_v30, %v9652_v30 }
 0x42a   : > { %v1789_v7 = vadd.f32 %v1788_v62, %v9696_v54  ;;  %v8258_v9 = vpop.f32.mrb[23].mxu1  ;;  %v8269_v10 = vpop.f32.mrb[21].mxu0  ;;  %v1798_v12 = vsel %vm1794_vm4, %v1695_v3, -inf }
 0x42b   : > { %1799 = vmax.xlane.f32.xlu1 %v1798_v12  ;;  %v1791_v14 = vpop.f32.mrb[22].mxu0  ;;  %v1940_v62 = vsel %vm1846_vm2, %v9744_v4, 0 }
 0x42c   : > { %v8270_v15 = vpop.f32.mrb[23].mxu0  ;;  %v1804_v17 = vsel %vm1794_vm4, %v1789_v7, -inf }
 0x42f   : > { %1805 = vmax.xlane.f32.xlu1 %v1804_v17  ;;  %v1741_v18 = vpop.f32.mrb[24].mxu1  ;;  %v1986_v17 = vsel %vm1846_vm2, %v9754_v23, 0 }
 0x430   : > { %v1742_v19 = vadd.f32 %v1741_v18, %v9696_v54  ;;  %v8263_v20 = vpop.f32.mrb[25].mxu1 }
 0x431   : > { %v1744_v24 = vpop.f32.mrb[26].mxu1 }
 0x432   : > { %v8264_v25 = vpop.f32.mrb[27].mxu1  ;;  %v1801_v26 = vsel %vm1794_vm4, %v1742_v19, -inf }
 0x433   : > { %1802 = vmax.xlane.f32.xlu0 %v1801_v26 }
 0x4b0   : > { %v1797_v27 = vpop.xlane.xlu0 %1796 }
 0x4b1   : > { %v1807_v28 = vsub.f32 %v1648_v56, %v1797_v27 }
 0x4b3   : > { %v1811_v31 = vmul.f32 1.442695, %v1807_v28 }
 0x4b5   : > { %8969 = vpow2.f32 %v1811_v31 }
 0x4b8   : > { %v1800_v32 = vpop.xlane.xlu1 %1799 }
 0x4b9   : > { %v1808_v35 = vsub.f32 %v1695_v3, %v1800_v32 }
 0x4bb   : > { %v1813_v36 = vmul.f32 1.442695, %v1808_v35 }
 0x4bc   : > { %v1806_v38 = vpop.xlane.xlu1 %1805 }
 0x4bd   : > { %8971 = vpow2.f32 %v1813_v36  ;;  %v1810_v40 = vsub.f32 %v1789_v7, %v1806_v38 }
 0x4bf   : > { %v8970_v41 = vpop.eup %8969  ;;  %v1817_v42 = vmul.f32 1.442695, %v1810_v40 }
 0x4c0   : > { %v1803_v43 = vpop.xlane.xlu0 %1802  ;;  %v1819_v46 = vsel %vm1794_vm4, %v8970_v41, 0.0 }
 0x4c1   : > { %8973 = vpow2.f32 %v1817_v42  ;;  %v1809_v48 = vsub.f32 %v1742_v19, %v1803_v43  ;;  %1820 = vadd.xlane.f32.xlu0 %v1819_v46 }
 0x4c3   : > { %v1815_v49 = vmul.f32 1.442695, %v1809_v48 }
 0x4c5   : > { %8975 = vpow2.f32 %v1815_v49 }
 0x4c7   : > { %v8972_v51 = vpop.eup %8971 }
 0x4c8   : > { %v1822_v52 = vsel %vm1794_vm4, %v8972_v51, 0.0 }
 0x4c9   : > { %1823 = vadd.xlane.f32.xlu1 %v1822_v52 }
 0x4cb   : > { %v8974_v53 = vpop.eup %8973 }
 0x4cc   : > { %v1828_v55 = vsel %vm1794_vm4, %v8974_v53, 0.0 }
 0x4cd   : > { %1829 = vadd.xlane.f32.xlu1 %v1828_v55 }
 0x4cf   : > { %v8976_v56 = vpop.eup %8975 }
 0x4d0   : > { %v1825_v57 = vsel %vm1794_vm4, %v8976_v56, 0.0 }
 0x4d1   : > { %1826 = vadd.xlane.f32.xlu0 %v1825_v57 }
 0x4de   : > { %2084 = vrot.lane.b32.xlu1 %v9641_v16, %s11248_s3 }
 0x4e2   : > { %2136 = vrot.lane.b32.xlu1 %v9655_v34, %s11248_s3 }
 0x4e6   : > { %2188 = vrot.lane.b32.xlu1 %v9659_v37, %s11248_s3 }
 0x4e7   : > { %2032 = vrot.lane.b32.xlu0 %v9636_v13, %s11248_s3 }
 0x4ea   : > { %2088 = vrot.lane.b32.xlu1 %v9720_v58, %s11248_s3 }
 0x4eb   : > { %2036 = vrot.lane.b32.xlu0 %v9724_v59, %s11248_s3 }
 0x4ee   : > { %2192 = vrot.lane.b32.xlu1 %v9732_v60, %s11248_s3 }
 0x4ef   : > { %2140 = vrot.lane.b32.xlu0 %v9736_v1, %s11248_s3 }
 0x54e   : > { %v1821_v6 = vpop.xlane.xlu0 %1820 }
 0x54f   : > { %8977 = vrcp.f32 %v1821_v6 }
 0x556   : > { %v1824_v11 = vpop.xlane.xlu1 %1823 }
 0x557   : > { %8979 = vrcp.f32 %v1824_v11 }
 0x559   : > { %v8978_v3 = vpop.eup %8977 }
 0x55a   : > { %v1830_v29 = vpop.xlane.xlu1 %1829  ;;  %v1835_v5 = vmul.f32 %v8978_v3, %v8970_v41 }
 0x55b   : > { %8981 = vrcp.f32 %v1830_v29 }
 0x55c   : > { %v1839_v21 = vpack.c.bf16 %v1835_v5, %v1835_v5 }
 0x55e   : > { %8274 = vmatmul.mubr.msk.bf16.vlgmr.msra.gmra.mrb[28].mxu1 %vm1794_vm4, %v1839_v21  ;;  %v1827_v7 = vpop.xlane.xlu0 %1826  ;;  %v2085_v12 = vpop.permute.xlu1 %2084 }
 0x55f   : > { %8284 = vmatpush3.bf16.msra.mxu1 %v1940_v62  ;;  %8983 = vrcp.f32 %v1827_v7  ;;  %8285 = vmatprep.mubr.msk.bf16.mxu1 %vm9203_vm0, %v9202_v61  ;;  %v2086_v26 = vrot.slane %v2085_v12, 4 }
 0x560   : > { %8295 = vmatprep.subr.bf16.mxu1 %v9202_v61 }
 0x561   : > { %v8980_v9 = vpop.eup %8979  ;;  %v2094_v32 = vsel %vm1606_vm1, %v2086_v26, 0 }
 0x562   : > { %v1836_v10 = vmul.f32 %v8980_v9, %v8972_v51  ;;  %v2033_v18 = vpop.permute.xlu0 %2032  ;;  %v2137_v30 = vpop.permute.xlu1 %2136 }
 0x563   : > { %v2034_v24 = vrot.slane %v2033_v18, 4  ;;  %v2138_v36 = vrot.slane %v2137_v30, 4 }
 0x564   : > { %v1840_v14 = vpack.c.bf16 %v1836_v10, %v1836_v10 }
 0x565   : > { %v8982_v15 = vpop.eup %8981  ;;  %v2042_v31 = vsel %vm1606_vm1, %v2034_v24, 0  ;;  %v2146_v42 = vsel %vm1606_vm1, %v2138_v36, 0 }
 0x566   : > { %8280 = vmatmul.mubr.msk.bf16.vlgmr.msra.gmra.mrb[24].mxu0 %vm1794_vm4, %v1840_v14  ;;  %v1838_v19 = vmul.f32 %v8982_v15, %v8974_v53  ;;  %v2189_v35 = vpop.permute.xlu1 %2188  ;;  %v2037_v40 = vpop.permute.xlu0 %2036 }
 0x567   : > { %8290 = vmatpush3.bf16.msra.mxu0 %v1986_v17  ;;  %8291 = vmatprep.mubr.msk.bf16.mxu0 %vm9203_vm0, %v9202_v61  ;;  %v2190_v38 = vrot.slane %v2189_v35, 4 }
 0x568   : > { %8301 = vmatprep.subr.bf16.mxu0 %v9202_v61  ;;  %v1842_v27 = vpack.c.bf16 %v1838_v19, %v1838_v19 }
 0x569   : > { %v8984_v20 = vpop.eup %8983  ;;  %v2198_v43 = vsel %vm1606_vm1, %v2190_v38, 0 }
 0x56a   : > { %v1837_v25 = vmul.f32 %v8984_v20, %v8976_v56  ;;  %v2089_v41 = vpop.permute.xlu1 %2088  ;;  %v2141_v46 = vpop.permute.xlu0 %2140 }
 0x56c   : > { %v1841_v28 = vpack.c.bf16 %v1837_v25, %v1837_v25 }
 0x56e   : > { %8292 = vmatmul.mubr.msk.bf16.vlgmr.msra.gmra.mrb[28].mxu0 %vm1794_vm4, %v1842_v27  ;;  %8286 = vmatmul.mubr.msk.bf16.vlgmr.msra.gmra.mrb[32].mxu1 %vm1794_vm4, %v1841_v28  ;;  %v2193_v48 = vpop.permute.xlu1 %2192 }
 0x56f   : > { %8296 = vmatpush3.bf16.xpose.msra.mxu1 %v2042_v31  ;;  %8297 = vmatprep.mubr.msk.bf16.mxu1 %vm9203_vm0, %v9202_v61 }
 0x570   : > { %8302 = vmatpush3.bf16.xpose.msra.mxu0 %v2094_v32  ;;  %8303 = vmatprep.mubr.msk.bf16.mxu0 %vm9203_vm0, %v9202_v61 }
 0x571   : > { %8307 = vmatprep.subr.bf16.mxu1 %v9202_v61  ;;  %8313 = vmatprep.subr.bf16.mxu0 %v9202_v61 }
 0x576   : > { %8298 = vmatmul.mubr.msk.bf16.vlgmr.msra.gmra.mrb[36].mxu1 %vm1606_vm1, %v2037_v40 }
 0x577   : > { %8304 = vmatmul.mubr.msk.bf16.vlgmr.msra.gmra.mrb[32].mxu0 %vm1606_vm1, %v2089_v41  ;;  %8308 = vmatpush3.bf16.xpose.msra.mxu1 %v2146_v42 }
 0x578   : > { %8314 = vmatpush3.bf16.xpose.msra.mxu0 %v2198_v43  ;;  %8309 = vmatprep.mubr.msk.bf16.mxu1 %vm9203_vm0, %v9202_v61 }
 0x579   : > { %8315 = vmatprep.mubr.msk.bf16.mxu0 %vm9203_vm0, %v9202_v61  ;;  %8325 = vmatprep.subr.bf16.mxu0 %v9202_v61 }
 0x57a   : > { %8319 = vmatprep.subr.bf16.mxu1 %v9202_v61 }
 0x57e   : > { %8310 = vmatmul.mubr.msk.bf16.vlgmr.msra.gmra.mrb[40].mxu1 %vm1606_vm1, %v2141_v46 }
 0x57f   : > { %8316 = vmatmul.mubr.msk.bf16.vlgmr.msra.gmra.mrb[36].mxu0 %vm1606_vm1, %v2193_v48  ;;  %8321 = vmatprep.mubr.msk.bf16.mxu1 %vm9203_vm0, %v9202_v61 }
 0x580   : > { %8327 = vmatprep.mubr.msk.bf16.mxu0 %vm9203_vm0, %v9202_v61 }
 0x631   : > { %v9788_v49 = vpop.f32.mrb[28].mxu1 }
 0x632   : > { %v8275_v51 = vpop.f32.mrb[29].mxu1 }
 0x633   : > { %v1887_v52 = vpop.f32.mrb[30].mxu1 }
 0x634   : > { %v8276_v53 = vpop.f32.mrb[31].mxu1 }
 0x639   : > { %v9790_v55 = vpop.f32.mrb[24].mxu0 }
 0x63a   : > { %v8281_v56 = vpop.f32.mrb[25].mxu0 }
 0x63b   : > { %v1933_v57 = vpop.f32.mrb[26].mxu0 }
 0x63c   : > { %v8282_v6 = vpop.f32.mrb[27].mxu0 }
 0x641   : > { %v9792_v11 = vpop.f32.mrb[32].mxu1  ;;  %v9794_v3 = vpop.f32.mrb[28].mxu0 }
 0x642   : > { %v8287_v29 = vpop.f32.mrb[33].mxu1  ;;  %v8293_v5 = vpop.f32.mrb[29].mxu0 }
 0x643   : > { %v1979_v21 = vpop.f32.mrb[34].mxu1  ;;  %v2025_v62 = vpop.f32.mrb[30].mxu0 }
 0x644   : > { %v8288_v7 = vpop.f32.mrb[35].mxu1  ;;  %v8294_v9 = vpop.f32.mrb[31].mxu0 }
 0x649   : > { %v2078_v10 = vpop.f32.mrb[36].mxu1 }
 0x64a   : > { %v2079_v12 = vadd.f32 %v2078_v10, %v9696_v54  ;;  %v2130_v14 = vpop.f32.mrb[32].mxu0  ;;  %v8299_v15 = vpop.f32.mrb[37].mxu1 }
 0x64b   : > { %v2131_v17 = vadd.f32 %v2130_v14, %v9696_v54  ;;  %v8305_v18 = vpop.f32.mrb[33].mxu0  ;;  %v2081_v19 = vpop.f32.mrb[38].mxu1 }
 0x64c   : > { %v2133_v20 = vpop.f32.mrb[34].mxu0  ;;  %v8300_v30 = vpop.f32.mrb[39].mxu1  ;;  %v2240_v24 = vsel %vm1794_vm4, %v2079_v12, -inf }
 0x64d   : > { %v8306_v25 = vpop.f32.mrb[35].mxu0  ;;  %v2243_v26 = vsel %vm1794_vm4, %v2131_v17, -inf  ;;  %2241 = vmax.xlane.f32.xlu0 %v2240_v24 }
 0x64e   : > { %2244 = vmax.xlane.f32.xlu1 %v2243_v26 }
 0x651   : > { %v2182_v27 = vpop.f32.mrb[40].mxu1 }
 0x652   : > { %v2183_v28 = vadd.f32 %v2182_v27, %v9696_v54  ;;  %v2234_v31 = vpop.f32.mrb[36].mxu0  ;;  %v8311_v32 = vpop.f32.mrb[41].mxu1 }
 0x653   : > { %v8317_v35 = vpop.f32.mrb[37].mxu0  ;;  %v2185_v36 = vpop.f32.mrb[42].mxu1  ;;  %v2235_v38 = vadd.f32 %v2234_v31, %v9696_v54 }
 0x654   : > { %v2237_v40 = vpop.f32.mrb[38].mxu0  ;;  %v8312_v41 = vpop.f32.mrb[43].mxu1  ;;  %v2246_v42 = vsel %vm1794_vm4, %v2183_v28, -inf }
 0x655   : > { %v8318_v43 = vpop.f32.mrb[39].mxu0  ;;  %2247 = vmax.xlane.f32.xlu0 %v2246_v42  ;;  %v2249_v46 = vsel %vm1794_vm4, %v2235_v38, -inf }
 0x659   : > { %2250 = vmax.xlane.f32.xlu0 %v2249_v46 }
 0x65f   : > { %2336 = vrot.lane.b32.xlu1 %v9671_v44, %s11248_s3 }
 0x663   : > { %2384 = vrot.lane.b32.xlu1 %v9744_v4, %s11248_s3 }
 0x667   : > { %2432 = vrot.lane.b32.xlu1 %v9754_v23, %s11248_s3 }
 0x66f   : > { %2288 = vrot.lane.b32.xlu0 %v9685_v50, %s11248_s3 }
 0x6da   : > { %v2242_v48 = vpop.xlane.xlu0 %2241 }
 0x6db   : > { %v2245_v51 = vpop.xlane.xlu1 %2244  ;;  %v2252_v52 = vsub.f32 %v2079_v12, %v2242_v48 }
 0x6dc   : > { %v2253_v53 = vsub.f32 %v2131_v17, %v2245_v51 }
 0x6dd   : > { %v2256_v56 = vmul.f32 1.442695, %v2252_v52 }
 0x6de   : > { %v2258_v57 = vmul.f32 1.442695, %v2253_v53 }
 0x6df   : > { %8985 = vpow2.f32 %v2256_v56  ;;  %v2337_v6 = vpop.permute.xlu1 %2336 }
 0x6e0   : > { %8987 = vpow2.f32 %v2258_v57  ;;  %v2342_v29 = vsel %vm1846_vm2, %v2337_v6, 0 }
 0x6e1   : > { %8326 = vmatpush3.bf16.msra.mxu0 %v2342_v29 }
 0x6e2   : > { %v2248_v5 = vpop.xlane.xlu0 %2247  ;;  %8337 = vmatprep.subr.bf16.mxu0 %v9202_v61 }
 0x6e3   : > { %v2254_v21 = vsub.f32 %v2183_v28, %v2248_v5  ;;  %v2385_v26 = vpop.permute.xlu1 %2384 }
 0x6e4   : > { %v2390_v43 = vsel %vm1846_vm2, %v2385_v26, 0 }
 0x6e5   : > { %v2260_v62 = vmul.f32 1.442695, %v2254_v21 }
 0x6e6   : > { %v2251_v7 = vpop.xlane.xlu0 %2250 }
 0x6e7   : > { %8989 = vpow2.f32 %v2260_v62  ;;  %v2255_v20 = vsub.f32 %v2235_v38, %v2251_v7  ;;  %v2433_v27 = vpop.permute.xlu1 %2432 }
 0x6e8   : > { %v2438_v46 = vsel %vm1846_vm2, %v2433_v27, 0 }
 0x6e9   : > { %v8986_v9 = vpop.eup %8985  ;;  %v2262_v30 = vmul.f32 1.442695, %v2255_v20 }
 0x6ea   : > { %v8988_v10 = vpop.eup %8987  ;;  %v2289_v14 = vpop.permute.xlu0 %2288  ;;  %v2264_v12 = vsel %vm1794_vm4, %v8986_v9, 0.0 }
 0x6eb   : > { %v2294_v15 = vsel %vm1846_vm2, %v2289_v14, 0  ;;  %v2267_v17 = vsel %vm1794_vm4, %v8988_v10, 0.0  ;;  %2265 = vadd.xlane.f32.xlu0 %v2264_v12  ;;  %8991 = vpow2.f32 %v2262_v30 }
 0x6ec   : > { %2268 = vadd.xlane.f32.xlu1 %v2267_v17  ;;  %8320 = vmatpush3.bf16.msra.mxu1 %v2294_v15 }
 0x6ed   : > { %8331 = vmatprep.subr.bf16.mxu1 %v9202_v61 }
 0x6f1   : > { %v8990_v18 = vpop.eup %8989 }
 0x6f2   : > { %v2270_v19 = vsel %vm1794_vm4, %v8990_v18, 0.0 }
 0x6f3   : > { %2271 = vadd.xlane.f32.xlu0 %v2270_v19 }
 0x6f5   : > { %v8992_v24 = vpop.eup %8991 }
 0x6f6   : > { %v2273_v25 = vsel %vm1794_vm4, %v8992_v24, 0.0 }
 0x6fd   : > { %2535 = vrot.lane.b32.xlu1 %v9641_v16, %s11246_s26 }
 0x709   : > { %2484 = vrot.lane.b32.xlu0 %v9636_v13, %s11246_s26 }
 0x70d   : > { %2586 = vrot.lane.b32.xlu0 %v9655_v34, %s11246_s26 }
 0x711   : > { %2487 = vrot.lane.b32.xlu0 %v9724_v59, %s11246_s26 }
 0x715   : > { %2589 = vrot.lane.b32.xlu0 %v9736_v1, %s11246_s26 }
 0x721   : > { %2274 = vadd.xlane.f32.xlu1 %v2273_v25 }
 0x732   : > { %2637 = vrot.lane.b32.xlu1 %v9659_v37, %s11246_s26 }
 0x736   : > { %2538 = vrot.lane.b32.xlu1 %v9720_v58, %s11246_s26 }
 0x73a   : > { %2640 = vrot.lane.b32.xlu1 %v9732_v60, %s11246_s26 }
 0x778   : > { %v2266_v28 = vpop.xlane.xlu0 %2265 }
 0x779   : > { %v2269_v31 = vpop.xlane.xlu1 %2268  ;;  %8993 = vrcp.f32 %v2266_v28 }
 0x77a   : > { %8995 = vrcp.f32 %v2269_v31 }
 0x77d   : > { %v2536_v7 = vpop.permute.xlu1 %2535 }
 0x77e   : > { %v2537_v14 = vrot.slane %v2536_v7, 4 }
 0x780   : > { %v2272_v32 = vpop.xlane.xlu0 %2271  ;;  %v2544_v17 = vsel %vm1606_vm1, %v2537_v14, 0 }
 0x781   : > { %8997 = vrcp.f32 %v2272_v32 }
 0x783   : > { %v8994_v35 = vpop.eup %8993 }
 0x784   : > { %v8996_v36 = vpop.eup %8995  ;;  %v2280_v38 = vmul.f32 %v8994_v35, %v8986_v9  ;;  %v2485_v48 = vpop.permute.xlu0 %2484 }
 0x785   : > { %v2281_v40 = vmul.f32 %v8996_v36, %v8988_v10  ;;  %v2486_v53 = vrot.slane %v2485_v48, 4 }
 0x786   : > { %v2284_v41 = vpack.c.bf16 %v2280_v38, %v2280_v38 }
 0x787   : > { %v2285_v42 = vpack.c.bf16 %v2281_v40, %v2281_v40  ;;  %v2493_v57 = vsel %vm1606_vm1, %v2486_v53, 0 }
 0x788   : > { %8322 = vmatmul.mubr.msk.bf16.vlgmr.msra.gmra.mrb[44].mxu1 %vm1794_vm4, %v2284_v41  ;;  %v2587_v6 = vpop.permute.xlu0 %2586 }
 0x789   : > { %8328 = vmatmul.mubr.msk.bf16.vlgmr.msra.gmra.mrb[40].mxu0 %vm1794_vm4, %v2285_v42  ;;  %8332 = vmatpush3.bf16.msra.mxu1 %v2390_v43  ;;  %v2588_v29 = vrot.slane %v2587_v6, 4 }
 0x78a   : > { %8338 = vmatpush3.bf16.msra.mxu0 %v2438_v46  ;;  %8333 = vmatprep.mubr.msk.bf16.mxu1 %vm9203_vm0, %v9202_v61 }
 0x78b   : > { %v8998_v51 = vpop.eup %8997  ;;  %8343 = vmatprep.subr.bf16.mxu1 %v9202_v61  ;;  %8339 = vmatprep.mubr.msk.bf16.mxu0 %vm9203_vm0, %v9202_v61  ;;  %v2595_v21 = vsel %vm1606_vm1, %v2588_v29, 0 }
 0x78c   : > { %v2282_v52 = vmul.f32 %v8998_v51, %v8990_v18  ;;  %8349 = vmatprep.subr.bf16.mxu0 %v9202_v61  ;;  %v2488_v5 = vpop.permute.xlu0 %2487 }
 0x78e   : > { %v2286_v56 = vpack.c.bf16 %v2282_v52, %v2282_v52 }
 0x790   : > { %8334 = vmatmul.mubr.msk.bf16.vlgmr.msra.gmra.mrb[48].mxu1 %vm1794_vm4, %v2286_v56  ;;  %v2590_v62 = vpop.permute.xlu0 %2589 }
 0x791   : > { %8345 = vmatprep.mubr.msk.bf16.mxu1 %vm9203_vm0, %v9202_v61 }
 0x792   : > { %8344 = vmatpush3.bf16.xpose.msra.mxu1 %v2493_v57 }
 0x793   : > { %8355 = vmatprep.subr.bf16.mxu1 %v9202_v61 }
 0x799   : > { %8346 = vmatmul.mubr.msk.bf16.vlgmr.msra.gmra.mrb[52].mxu1 %vm1606_vm1, %v2488_v5 }
 0x79a   : > { %8356 = vmatpush3.bf16.xpose.msra.mxu1 %v2595_v21  ;;  %8357 = vmatprep.mubr.msk.bf16.mxu1 %vm9203_vm0, %v9202_v61 }
 0x79b   : > { %8367 = vmatprep.subr.bf16.mxu1 %v9202_v61 }
 0x7a1   : > { %8358 = vmatmul.mubr.msk.bf16.vlgmr.msra.gmra.mrb[56].mxu1 %vm1606_vm1, %v2590_v62 }
 0x7a2   : > { %8369 = vmatprep.mubr.msk.bf16.mxu1 %vm9203_vm0, %v9202_v61 }
 0x7ae   : > { %v2275_v9 = vpop.xlane.xlu1 %2274 }
 0x7af   : > { %8999 = vrcp.f32 %v2275_v9 }
 0x7b2   : > { %v2638_v18 = vpop.permute.xlu1 %2637 }
 0x7b3   : > { %v2639_v19 = vrot.slane %v2638_v18, 4 }
 0x7b5   : > { %v2646_v30 = vsel %vm1606_vm1, %v2639_v19, 0 }
 0x7b6   : > { %v2539_v20 = vpop.permute.xlu1 %2538 }
 0x7b9   : > { %v9000_v10 = vpop.eup %8999 }
 0x7ba   : > { %v2283_v12 = vmul.f32 %v9000_v10, %v8992_v24  ;;  %v2641_v24 = vpop.permute.xlu1 %2640 }
 0x7bc   : > { %v2287_v15 = vpack.c.bf16 %v2283_v12, %v2283_v12 }
 0x7be   : > { %8340 = vmatmul.mubr.msk.bf16.vlgmr.msra.gmra.mrb[44].mxu0 %vm1794_vm4, %v2287_v15 }
 0x7bf   : > { %8350 = vmatpush3.bf16.xpose.msra.mxu0 %v2544_v17  ;;  %8351 = vmatprep.mubr.msk.bf16.mxu0 %vm9203_vm0, %v9202_v61 }
 0x7c0   : > { %8361 = vmatprep.subr.bf16.mxu0 %v9202_v61 }
 0x7c6   : > { %8352 = vmatmul.mubr.msk.bf16.vlgmr.msra.gmra.mrb[48].mxu0 %vm1606_vm1, %v2539_v20 }
 0x7c7   : > { %8362 = vmatpush3.bf16.xpose.msra.mxu0 %v2646_v30  ;;  %8363 = vmatprep.mubr.msk.bf16.mxu0 %vm9203_vm0, %v9202_v61 }
 0x7c8   : > { %8373 = vmatprep.subr.bf16.mxu0 %v9202_v61 }
 0x7ce   : > { %8364 = vmatmul.mubr.msk.bf16.vlgmr.msra.gmra.mrb[52].mxu0 %vm1606_vm1, %v2641_v24 }
 0x7cf   : > { %8375 = vmatprep.mubr.msk.bf16.mxu0 %vm9203_vm0, %v9202_v61 }
 0x85b   : > { %v9872_v25 = vpop.f32.mrb[44].mxu1 }
 0x85c   : > { %v9874_v26 = vpop.f32.mrb[40].mxu0  ;;  %v8323_v27 = vpop.f32.mrb[45].mxu1 }
 0x85d   : > { %v8329_v28 = vpop.f32.mrb[41].mxu0  ;;  %v2333_v31 = vpop.f32.mrb[46].mxu1 }
 0x85e   : > { %v2381_v32 = vpop.f32.mrb[42].mxu0  ;;  %v8324_v35 = vpop.f32.mrb[47].mxu1 }
 0x85f   : > { %v8330_v36 = vpop.f32.mrb[43].mxu0 }
 0x863   : > { %v9876_v38 = vpop.f32.mrb[48].mxu1 }
 0x864   : > { %v8335_v40 = vpop.f32.mrb[49].mxu1 }
 0x865   : > { %v2429_v41 = vpop.f32.mrb[50].mxu1 }
 0x866   : > { %v8336_v42 = vpop.f32.mrb[51].mxu1 }
 0x86c   : > { %v2529_v43 = vpop.f32.mrb[52].mxu1 }
 0x86d   : > { %v2530_v46 = vadd.f32 %v2529_v43, %v9696_v54  ;;  %v8347_v48 = vpop.f32.mrb[53].mxu1 }
 0x86e   : > { %v2532_v51 = vpop.f32.mrb[54].mxu1 }
 0x86f   : > { %v8348_v52 = vpop.f32.mrb[55].mxu1  ;;  %v2688_v53 = vsel %vm1794_vm4, %v2530_v46, -inf }
 0x870   : > { %2689 = vmax.xlane.f32.xlu0 %v2688_v53 }
 0x874   : > { %v2631_v56 = vpop.f32.mrb[56].mxu1 }
 0x875   : > { %v2632_v57 = vadd.f32 %v2631_v56, %v9696_v54  ;;  %v8359_v6 = vpop.f32.mrb[57].mxu1 }
 0x876   : > { %v2634_v29 = vpop.f32.mrb[58].mxu1 }
 0x877   : > { %v8360_v5 = vpop.f32.mrb[59].mxu1  ;;  %v2694_v21 = vsel %vm1794_vm4, %v2632_v57, -inf }
 0x878   : > { %2695 = vmax.xlane.f32.xlu0 %v2694_v21 }
 0x891   : > { %v9882_v62 = vpop.f32.mrb[44].mxu0 }
 0x892   : > { %v8341_v7 = vpop.f32.mrb[45].mxu0 }
 0x893   : > { %v2477_v9 = vpop.f32.mrb[46].mxu0 }
 0x894   : > { %v8342_v10 = vpop.f32.mrb[47].mxu0 }
 0x899   : > { %v2580_v14 = vpop.f32.mrb[48].mxu0 }
 0x89a   : > { %v2581_v12 = vadd.f32 %v2580_v14, %v9696_v54  ;;  %v8353_v15 = vpop.f32.mrb[49].mxu0 }
 0x89b   : > { %v2583_v17 = vpop.f32.mrb[50].mxu0 }
 0x89c   : > { %v8354_v18 = vpop.f32.mrb[51].mxu0  ;;  %v2691_v19 = vsel %vm1794_vm4, %v2581_v12, -inf }
 0x89d   : > { %2692 = vmax.xlane.f32.xlu1 %v2691_v19 }
 0x8a1   : > { %v2682_v20 = vpop.f32.mrb[52].mxu0 }
 0x8a2   : > { %v2683_v30 = vadd.f32 %v2682_v20, %v9696_v54  ;;  %v8365_v24 = vpop.f32.mrb[53].mxu0 }
 0x8a3   : > { %v2685_v27 = vpop.f32.mrb[54].mxu0 }
 0x8a4   : > { %v8366_v28 = vpop.f32.mrb[55].mxu0  ;;  %v2697_v31 = vsel %vm1794_vm4, %v2683_v30, -inf }
 0x8a5   : > { %2698 = vmax.xlane.f32.xlu0 %v2697_v31 }
 0x8ae   : > { %2784 = vrot.lane.b32.xlu1 %v9671_v44, %s11246_s26 }
 0x8b2   : > { %2832 = vrot.lane.b32.xlu1 %v9744_v4, %s11246_s26 }
 0x8b6   : > { %2880 = vrot.lane.b32.xlu1 %v9754_v23, %s11246_s26 }
 0x8bb   : > { %2736 = vrot.lane.b32.xlu0 %v9685_v50, %s11246_s26 }
 0x8fd   : > { %v2690_v32 = vpop.xlane.xlu0 %2689 }
 0x8fe   : > { %v2700_v35 = vsub.f32 %v2530_v46, %v2690_v32 }
 0x900   : > { %v2704_v36 = vmul.f32 1.442695, %v2700_v35 }
 0x902   : > { %9001 = vpow2.f32 %v2704_v36 }
 0x905   : > { %v2696_v40 = vpop.xlane.xlu0 %2695 }
 0x906   : > { %v2702_v41 = vsub.f32 %v2632_v57, %v2696_v40 }
 0x908   : > { %v2708_v42 = vmul.f32 1.442695, %v2702_v41 }
 0x90a   : > { %9003 = vpow2.f32 %v2708_v42 }
 0x90c   : > { %v9002_v43 = vpop.eup %9001 }
 0x90d   : > { %v2712_v48 = vsel %vm1794_vm4, %v9002_v43, 0.0 }
 0x90e   : > { %2713 = vadd.xlane.f32.xlu0 %v2712_v48 }
 0x914   : > { %v9004_v51 = vpop.eup %9003 }
 0x915   : > { %v2718_v52 = vsel %vm1794_vm4, %v9004_v51, 0.0 }
 0x916   : > { %2719 = vadd.xlane.f32.xlu0 %v2718_v52 }
 0x92a   : > { %v2693_v53 = vpop.xlane.xlu1 %2692 }
 0x92b   : > { %v2701_v56 = vsub.f32 %v2581_v12, %v2693_v53 }
 0x92c   : > { %2932 = vrot.lane.b32.xlu0 %v9636_v13, %s11244_s27 }
 0x92d   : > { %v2706_v46 = vmul.f32 1.442695, %v2701_v56 }
 0x92e   : > { %v2785_v6 = vpop.permute.xlu1 %2784 }
 0x92f   : > { %9005 = vpow2.f32 %v2706_v46  ;;  %v2790_v57 = vsel %vm1846_vm2, %v2785_v6, 0 }
 0x930   : > { %8374 = vmatpush3.bf16.msra.mxu0 %v2790_v57  ;;  %3034 = vrot.lane.b32.xlu0 %v9655_v34, %s11244_s27 }
 0x931   : > { %8385 = vmatprep.subr.bf16.mxu0 %v9202_v61 }
 0x932   : > { %v2699_v29 = vpop.xlane.xlu0 %2698  ;;  %v2833_v15 = vpop.permute.xlu1 %2832 }
 0x933   : > { %v2703_v34 = vsub.f32 %v2683_v30, %v2699_v29  ;;  %v2838_v18 = vsel %vm1846_vm2, %v2833_v15, 0 }
 0x934   : > { %2935 = vrot.lane.b32.xlu0 %v9724_v59, %s11244_s27 }
 0x935   : > { %v2710_v9 = vmul.f32 1.442695, %v2703_v34 }
 0x936   : > { %v2737_v5 = vpop.permute.xlu0 %2736  ;;  %v2881_v35 = vpop.permute.xlu1 %2880 }
 0x937   : > { %v2742_v21 = vsel %vm1846_vm2, %v2737_v5, 0  ;;  %9007 = vpow2.f32 %v2710_v9 }
 0x938   : > { %3037 = vrot.lane.b32.xlu0 %v9736_v1, %s11244_s27  ;;  %8368 = vmatpush3.bf16.msra.mxu1 %v2742_v21 }
 0x939   : > { %v9006_v13 = vpop.eup %9005  ;;  %8379 = vmatprep.subr.bf16.mxu1 %v9202_v61 }
 0x93a   : > { %v2715_v7 = vsel %vm1794_vm4, %v9006_v13, 0.0 }
 0x93b   : > { %2716 = vadd.xlane.f32.xlu1 %v2715_v7 }
 0x941   : > { %v9008_v59 = vpop.eup %9007 }
 0x942   : > { %v2721_v10 = vsel %vm1794_vm4, %v9008_v59, 0.0 }
 0x94c   : > { %2983 = vrot.lane.b32.xlu1 %v9641_v16, %s11244_s27 }
 0x970   : > { %2722 = vadd.xlane.f32.xlu1 %v2721_v10 }
 0x981   : > { %3085 = vrot.lane.b32.xlu1 %v9659_v37, %s11244_s27 }
 0x985   : > { %2986 = vrot.lane.b32.xlu1 %v9720_v58, %s11244_s27 }
 0x989   : > { %3088 = vrot.lane.b32.xlu1 %v9732_v60, %s11244_s27 }
 0x99b   : > { %v2714_v1 = vpop.xlane.xlu0 %2713 }
 0x99c   : > { %9009 = vrcp.f32 %v2714_v1 }
 0x9a3   : > { %v2720_v14 = vpop.xlane.xlu0 %2719 }
 0x9a4   : > { %9011 = vrcp.f32 %v2720_v14 }
 0x9a6   : > { %v9010_v16 = vpop.eup %9009 }
 0x9a7   : > { %v2728_v12 = vmul.f32 %v9010_v16, %v9002_v43  ;;  %v2933_v37 = vpop.permute.xlu0 %2932  ;;  %v2886_v43 = vsel %vm1846_vm2, %v2881_v35, 0 }
 0x9a8   : > { %v2934_v19 = vrot.slane %v2933_v37, 4 }
 0x9a9   : > { %v2732_v17 = vpack.c.bf16 %v2728_v12, %v2728_v12 }
 0x9aa   : > { %v2941_v30 = vsel %vm1606_vm1, %v2934_v19, 0 }
 0x9ab   : > { %8370 = vmatmul.mubr.msk.bf16.vlgmr.msra.gmra.mrb[60].mxu1 %vm1794_vm4, %v2732_v17  ;;  %v3035_v24 = vpop.permute.xlu0 %3034 }
 0x9ac   : > { %8380 = vmatpush3.bf16.msra.mxu1 %v2838_v18  ;;  %8381 = vmatprep.mubr.msk.bf16.mxu1 %vm9203_vm0, %v9202_v61  ;;  %v3036_v27 = vrot.slane %v3035_v24, 4 }
 0x9ad   : > { %8391 = vmatprep.subr.bf16.mxu1 %v9202_v61 }
 0x9ae   : > { %v9012_v58 = vpop.eup %9011  ;;  %v3043_v31 = vsel %vm1606_vm1, %v3036_v27, 0 }
 0x9af   : > { %v2730_v60 = vmul.f32 %v9012_v58, %v9004_v51  ;;  %v2936_v28 = vpop.permute.xlu0 %2935 }
 0x9b1   : > { %v2734_v20 = vpack.c.bf16 %v2730_v60, %v2730_v60 }
 0x9b3   : > { %8382 = vmatmul.mubr.msk.bf16.vlgmr.msra.gmra.mrb[64].mxu1 %vm1794_vm4, %v2734_v20  ;;  %v3038_v32 = vpop.permute.xlu0 %3037 }
 0x9b4   : > { %8393 = vmatprep.mubr.msk.bf16.mxu1 %vm9203_vm0, %v9202_v61 }
 0x9b5   : > { %8392 = vmatpush3.bf16.xpose.msra.mxu1 %v2941_v30 }
 0x9b6   : > { %8403 = vmatprep.subr.bf16.mxu1 %v9202_v61 }
 0x9bc   : > { %8394 = vmatmul.mubr.msk.bf16.vlgmr.msra.gmra.mrb[68].mxu1 %vm1606_vm1, %v2936_v28 }
 0x9bd   : > { %8404 = vmatpush3.bf16.xpose.msra.mxu1 %v3043_v31  ;;  %8405 = vmatprep.mubr.msk.bf16.mxu1 %vm9203_vm0, %v9202_v61 }
 0x9be   : > { %8415 = vmatprep.subr.bf16.mxu1 %v9202_v61 }
 0x9c4   : > { %8406 = vmatmul.mubr.msk.bf16.vlgmr.msra.gmra.mrb[72].mxu1 %vm1606_vm1, %v3038_v32 }
 0x9c5   : > { %8417 = vmatprep.mubr.msk.bf16.mxu1 %vm9203_vm0, %v9202_v61 }
 0x9c8   : > { %v2717_v36 = vpop.xlane.xlu1 %2716 }
 0x9c9   : > { %9013 = vrcp.f32 %v2717_v36 }
 0x9cc   : > { %v2984_v48 = vpop.permute.xlu1 %2983 }
 0x9cd   : > { %v2985_v53 = vrot.slane %v2984_v48, 4 }
 0x9cf   : > { %v2992_v6 = vsel %vm1606_vm1, %v2985_v53, 0 }
 0x9d3   : > { %v9014_v40 = vpop.eup %9013 }
 0x9d4   : > { %v2729_v41 = vmul.f32 %v9014_v40, %v9006_v13 }
 0x9d6   : > { %v2733_v42 = vpack.c.bf16 %v2729_v41, %v2729_v41 }
 0x9d8   : > { %8376 = vmatmul.mubr.msk.bf16.vlgmr.msra.gmra.mrb[56].mxu0 %vm1794_vm4, %v2733_v42 }
 0x9d9   : > { %8386 = vmatpush3.bf16.msra.mxu0 %v2886_v43  ;;  %8387 = vmatprep.mubr.msk.bf16.mxu0 %vm9203_vm0, %v9202_v61 }
 0x9da   : > { %8397 = vmatprep.subr.bf16.mxu0 %v9202_v61 }
 0x9fd   : > { %v2723_v51 = vpop.xlane.xlu1 %2722 }
 0x9fe   : > { %9015 = vrcp.f32 %v2723_v51 }
 0xa01   : > { %v3086_v57 = vpop.permute.xlu1 %3085 }
 0xa02   : > { %v3087_v29 = vrot.slane %v3086_v57, 4 }
 0xa04   : > { %v3094_v21 = vsel %vm1606_vm1, %v3087_v29, 0 }
 0xa05   : > { %v2987_v5 = vpop.permute.xlu1 %2986 }
 0xa08   : > { %v9016_v52 = vpop.eup %9015 }
 0xa09   : > { %v2731_v56 = vmul.f32 %v9016_v52, %v9008_v59  ;;  %v3089_v13 = vpop.permute.xlu1 %3088 }
 0xa0b   : > { %v2735_v46 = vpack.c.bf16 %v2731_v56, %v2731_v56 }
 0xa0d   : > { %8388 = vmatmul.mubr.msk.bf16.vlgmr.msra.gmra.mrb[60].mxu0 %vm1794_vm4, %v2735_v46 }
 0xa0e   : > { %8398 = vmatpush3.bf16.xpose.msra.mxu0 %v2992_v6  ;;  %8399 = vmatprep.mubr.msk.bf16.mxu0 %vm9203_vm0, %v9202_v61 }
 0xa0f   : > { %8409 = vmatprep.subr.bf16.mxu0 %v9202_v61 }
 0xa15   : > { %8400 = vmatmul.mubr.msk.bf16.vlgmr.msra.gmra.mrb[64].mxu0 %vm1606_vm1, %v2987_v5 }
 0xa16   : > { %8410 = vmatpush3.bf16.xpose.msra.mxu0 %v3094_v21  ;;  %8411 = vmatprep.mubr.msk.bf16.mxu0 %vm9203_vm0, %v9202_v61 }
 0xa17   : > { %8421 = vmatprep.subr.bf16.mxu0 %v9202_v61 }
 0xa1d   : > { %8412 = vmatmul.mubr.msk.bf16.vlgmr.msra.gmra.mrb[68].mxu0 %vm1606_vm1, %v3089_v13 }
 0xa1e   : > { %8423 = vmatprep.mubr.msk.bf16.mxu0 %vm9203_vm0, %v9202_v61 }
 0xa7e   : > { %v9956_v7 = vpop.f32.mrb[60].mxu1 }
 0xa7f   : > { %v8371_v34 = vpop.f32.mrb[61].mxu1 }
 0xa80   : > { %v2781_v9 = vpop.f32.mrb[62].mxu1 }
 0xa81   : > { %v8372_v59 = vpop.f32.mrb[63].mxu1 }
 0xa86   : > { %v2874_v10 = vpop.f32.mrb[64].mxu1 }
 0xa87   : > { %v8383_v1 = vpop.f32.mrb[65].mxu1 }
 0xa88   : > { %v2877_v14 = vpop.f32.mrb[66].mxu1 }
 0xa89   : > { %v8384_v16 = vpop.f32.mrb[67].mxu1 }
 0xa8f   : > { %v2977_v12 = vpop.f32.mrb[68].mxu1 }
 0xa90   : > { %v2978_v15 = vadd.f32 %v2977_v12, %v9696_v54  ;;  %v8395_v17 = vpop.f32.mrb[69].mxu1 }
 0xa91   : > { %v2980_v18 = vpop.f32.mrb[70].mxu1 }
 0xa92   : > { %v8396_v37 = vpop.f32.mrb[71].mxu1  ;;  %v3136_v58 = vsel %vm1794_vm4, %v2978_v15, -inf }
 0xa93   : > { %3137 = vmax.xlane.f32.xlu0 %v3136_v58  ;;  %v2482_v37 = vpack.c.bf16 %v9876_v38, %v9876_v38  ;;  %v2928_v58 = vpack.c.bf16 %v9956_v7, %v9956_v7 }
 0xa97   : > { %v3079_v60 = vpop.f32.mrb[72].mxu1 }
 0xa98   : > { %v3080_v19 = vadd.f32 %v3079_v60, %v9696_v54  ;;  %v8407_v20 = vpop.f32.mrb[73].mxu1  ;;  %v2930_v60 = vpack.c.bf16 %v2874_v10, %v2874_v10 }
 0xa99   : > { %v3082_v30 = vpop.f32.mrb[74].mxu1 }
 0xa9a   : > { %v8408_v24 = vpop.f32.mrb[75].mxu1  ;;  %v3142_v27 = vsel %vm1794_vm4, %v3080_v19, -inf }
 0xa9b   : > { %3143 = vmax.xlane.f32.xlu0 %v3142_v27 }
 0xaab   : > { %v9962_v28 = vpop.f32.mrb[56].mxu0 }
 0xaac   : > { %v8377_v31 = vpop.f32.mrb[57].mxu0 }
 0xaad   : > { %v2829_v32 = vpop.f32.mrb[58].mxu0 }
 0xaae   : > { %v8378_v35 = vpop.f32.mrb[59].mxu0 }
 0xae0   : > { %v9964_v36 = vpop.f32.mrb[60].mxu0 }
 0xae1   : > { %v8389_v40 = vpop.f32.mrb[61].mxu0 }
 0xae2   : > { %v2925_v41 = vpop.f32.mrb[62].mxu0 }
 0xae3   : > { %v8390_v42 = vpop.f32.mrb[63].mxu0 }
 0xae8   : > { %v3028_v43 = vpop.f32.mrb[64].mxu0 }
 0xae9   : > { %v3029_v48 = vadd.f32 %v3028_v43, %v9696_v54  ;;  %v8401_v51 = vpop.f32.mrb[65].mxu0  ;;  %v2483_v43 = vpack.c.bf16 %v9882_v62, %v9882_v62 }
 0xaea   : > { %v3031_v52 = vpop.f32.mrb[66].mxu0  ;;  %v2931_v51 = vpack.c.bf16 %v9964_v36, %v9964_v36 }
 0xaeb   : > { %v8402_v53 = vpop.f32.mrb[67].mxu0  ;;  %v3139_v56 = vsel %vm1794_vm4, %v3029_v48, -inf }
 0xaec   : > { %3140 = vmax.xlane.f32.xlu1 %v3139_v56 }
 0xaf0   : > { %v3130_v46 = vpop.f32.mrb[68].mxu0 }
 0xaf1   : > { %v3131_v6 = vadd.f32 %v3130_v46, %v9696_v54  ;;  %v8413_v57 = vpop.f32.mrb[69].mxu0 }
 0xaf2   : > { %v3133_v29 = vpop.f32.mrb[70].mxu0 }
 0xaf3   : > { %v8414_v5 = vpop.f32.mrb[71].mxu0  ;;  %v3145_v21 = vsel %vm1794_vm4, %v3131_v6, -inf }
 0xaf4   : > { %3146 = vmax.xlane.f32.xlu0 %v3145_v21 }
 0xb20   : > { %v3138_v13 = vpop.xlane.xlu0 %3137 }
 0xb21   : > { %v3148_v34 = vsub.f32 %v2978_v15, %v3138_v13  ;;  %v2480_v15 = vpack.c.bf16 %v9872_v25, %v9872_v25 }
 0xb23   : > { %v3152_v9 = vmul.f32 1.442695, %v3148_v34 }
 0xb25   : > { %9017 = vpow2.f32 %v3152_v9 }
 0xb28   : > { %v3144_v59 = vpop.xlane.xlu0 %3143 }
 0xb29   : > { %v3150_v1 = vsub.f32 %v3080_v19, %v3144_v59 }
 0xb2b   : > { %v3156_v14 = vmul.f32 1.442695, %v3150_v1 }
 0xb2d   : > { %9019 = vpow2.f32 %v3156_v14 }
 0xb2f   : > { %v9018_v16 = vpop.eup %9017 }
 0xb30   : > { %v3160_v12 = vsel %vm1794_vm4, %v9018_v16, 0.0 }
 0xb31   : > { %3161 = vadd.xlane.f32.xlu0 %v3160_v12 }
 0xb37   : > { %v9020_v17 = vpop.eup %9019 }
 0xb38   : > { %v3166_v18 = vsel %vm1794_vm4, %v9020_v17, 0.0 }
 0xb39   : > { %3167 = vadd.xlane.f32.xlu0 %v3166_v18  ;;  %v8826_v18 = vld [vmem:[%s11228_s7 + $0x8] sm:$0xff]  }
 0xb4f   : > { %3184 = vrot.lane.b32.xlu0 %v9685_v50, %s11244_s27 }
 0xb53   : > { %3384 = vrot.lane.b32.xlu0 %v2480_v15, %s11244_s27 }
 0xb57   : > { %3388 = vrot.lane.b32.xlu0 %v2482_v37, %s11244_s27  ;;  %v8827_v37 = vld [vmem:[%s11228_s7 + $0x10] sm:$0xff]  }
 0xb5b   : > { %3396 = vrot.lane.b32.xlu0 %v2928_v58, %s11246_s26 }
 0xb5f   : > { %3400 = vrot.lane.b32.xlu0 %v2930_v60, %s11246_s26 }
 0xb79   : > { %v3141_v19 = vpop.xlane.xlu1 %3140 }
 0xb7a   : > { %v3149_v50 = vsub.f32 %v3029_v48, %v3141_v19  ;;  %v2929_v48 = vpack.c.bf16 %v9962_v28, %v9962_v28 }
 0xb7c   : > { %v3154_v20 = vmul.f32 1.442695, %v3149_v50 }
 0xb7e   : > { %9021 = vpow2.f32 %v3154_v20 }
 0xb81   : > { %v3147_v38 = vpop.xlane.xlu0 %3146 }
 0xb82   : > { %v3151_v7 = vsub.f32 %v3131_v6, %v3147_v38  ;;  %v8828_v38 = vld [vmem:[%s11228_s7 + $0x18] sm:$0xff]  }
 0xb84   : > { %v3158_v24 = vmul.f32 1.442695, %v3151_v7 }
 0xb86   : > { %9023 = vpow2.f32 %v3158_v24 }
 0xb88   : > { %v9022_v25 = vpop.eup %9021 }
 0xb89   : > { %v3163_v30 = vsel %vm1794_vm4, %v9022_v25, 0.0 }
 0xb8a   : > { %3164 = vadd.xlane.f32.xlu1 %v3163_v30 }
 0xb90   : > { %v9024_v27 = vpop.eup %9023 }
 0xb91   : > { %v3169_v31 = vsel %vm1794_vm4, %v9024_v27, 0.0 }
 0xb9b   : > { %3232 = vrot.lane.b32.xlu1 %v9671_v44, %s11244_s27 }
 0xb9f   : > { %3280 = vrot.lane.b32.xlu1 %v9744_v4, %s11244_s27  ;;  %v2481_v4 = vpack.c.bf16 %v9874_v26, %v9874_v26 }
 0xbbe   : > { %v3162_v10 = vpop.xlane.xlu0 %3161 }
 0xbbf   : > { %9025 = vrcp.f32 %v3162_v10  ;;  %v8829_v10 = vld [vmem:[%s11228_s7 + $0x20] sm:$0xff]  }
 0xbc3   : > { %3170 = vadd.xlane.f32.xlu1 %v3169_v31  ;;  %v8831_v31 = vld [vmem:[%s11228_s7 + $0x30] sm:$0xff]  }
 0xbc6   : > { %v3168_v32 = vpop.xlane.xlu0 %3167 }
 0xbc7   : > { %9027 = vrcp.f32 %v3168_v32  ;;  %v8832_v32 = vld [vmem:[%s11228_s7 + $0x38] sm:$0xff]  }
 0xbc9   : > { %v9026_v35 = vpop.eup %9025 }
 0xbca   : > { %v3185_v40 = vpop.permute.xlu0 %3184  ;;  %v3176_v41 = vmul.f32 %v9026_v35, %v9018_v16 }
 0xbcb   : > { %v3190_v42 = vsel %vm1846_vm2, %v3185_v40, 0 }
 0xbcc   : > { %8416 = vmatpush3.bf16.msra.mxu1 %v3190_v42  ;;  %v3180_v44 = vpack.c.bf16 %v3176_v41, %v3176_v41 }
 0xbcd   : > { %8427 = vmatprep.subr.bf16.mxu1 %v9202_v61 }
 0xbcf   : > { %8418 = vmatmul.mubr.msk.bf16.vlgmr.msra.gmra.mrb[76].mxu1 %vm1794_vm4, %v3180_v44 }
 0xbd0   : > { %8429 = vmatprep.mubr.msk.bf16.mxu1 %vm9203_vm0, %v9202_v61 }
 0xbd1   : > { %v9028_v26 = vpop.eup %9027 }
 0xbd2   : > { %v3178_v62 = vmul.f32 %v9028_v26, %v9020_v17  ;;  %v8825_v17 = vld [vmem:[%s11228_s7] sm:$0xff]  }
 0xbd4   : > { %3328 = vrot.lane.b32.xlu1 %v9754_v23, %s11244_s27  ;;  %v3182_v6 = vpack.c.bf16 %v3178_v62, %v3178_v62  ;;  %v2028_v62 = vpack.c.bf16 %v9788_v49, %v9788_v49 }
 0xbd8   : > { %3386 = vrot.lane.b32.xlu1 %v2481_v4, %s11244_s27  ;;  %v3385_v4 = vpop.permute.xlu0 %3384 }
 0xbdc   : > { %3390 = vrot.lane.b32.xlu1 %v2483_v43, %s11244_s27 }
 0xbe0   : > { %3398 = vrot.lane.b32.xlu1 %v2929_v48, %s11246_s26  ;;  %v3389_v48 = vpop.permute.xlu0 %3388 }
 0xbe4   : > { %3402 = vrot.lane.b32.xlu1 %v2931_v51, %s11246_s26  ;;  %s11259_s26 = smov 64  }
 0xc17   : > { %v3165_v23 = vpop.xlane.xlu1 %3164 }
 0xc18   : > { %9029 = vrcp.f32 %v3165_v23  ;;  %v3397_v23 = vpop.permute.xlu0 %3396 }
 0xc1b   : > { %v3233_v52 = vpop.permute.xlu1 %3232 }
 0xc1c   : > { %v3238_v53 = vsel %vm1846_vm2, %v3233_v52, 0  ;;  %v3401_v52 = vpop.permute.xlu0 %3400 }
 0xc1d   : > { %8422 = vmatpush3.bf16.msra.mxu0 %v3238_v53 }
 0xc1e   : > { %8433 = vmatprep.subr.bf16.mxu0 %v9202_v61 }
 0xc1f   : > { %v3281_v56 = vpop.permute.xlu1 %3280 }
 0xc20   : > { %v3286_v28 = vsel %vm1846_vm2, %v3281_v56, 0  ;;  %v2029_v56 = vpack.c.bf16 %v9790_v55, %v9790_v55  ;;  %v2030_v55 = vpack.c.bf16 %v9792_v11, %v9792_v11  ;;  %v7606_v11 = vld [vmem:[%s11229_s8] ss:$0 sm:$0xff] }
 0xc21   : > { %8428 = vmatpush3.bf16.msra.mxu1 %v3286_v28 }
 0xc22   : > { %v9030_v46 = vpop.eup %9029  ;;  %8439 = vmatprep.subr.bf16.mxu1 %v8825_v17 }
 0xc23   : > { %v3177_v36 = vmul.f32 %v9030_v46, %v9022_v25  ;;  %v3418_v46 = vsel %vm1606_vm1, %v2028_v62, %v3385_v4  ;;  %v8844_v62 = vld [vmem:[%s11232_s11 + $0x34] ss:$8 sps:$4 sm:$0xff]  }
 0xc24   : > { %8430 = vmatmul.mubr.msk.bf16.vlgmr.msra.gmra.mrb[80].mxu1 %vm1794_vm4, %v3182_v6 }
 0xc25   : > { %v3181_v57 = vpack.c.bf16 %v3177_v36, %v3177_v36  ;;  %8440 = vmatpush3.bf16.msra.mxu1 %v8825_v17  ;;  %v3430_v36 = vsel %vm3428_vm5, %v3418_v46, %v3397_v23  ;;  %v8845_v46 = vld [vmem:[%s11232_s11 + $0x40] ss:$8 sps:$4 sm:$0xff]  }
 0xc26   : > { %8441 = vmatprep.subr.bf16.mxu1 %v8826_v18 }
 0xc27   : > { %8424 = vmatmul.mubr.msk.bf16.vlgmr.msra.gmra.mrb[72].mxu0 %vm1794_vm4, %v3181_v57 }
 0xc28   : > { %8435 = vmatprep.mubr.msk.bf16.mxu0 %vm9203_vm0, %v9202_v61 }
 0xc29   : > { %8442 = vmatpush3.bf16.msra.mxu1 %v8826_v18 }
 0xc2a   : > { %8443 = vmatprep.subr.bf16.mxu1 %v8827_v37 }
 0xc2d   : > { %8444 = vmatpush3.bf16.msra.mxu1 %v8827_v37 }
 0xc2e   : > { %8445 = vmatprep.subr.bf16.mxu1 %v8828_v38 }
 0xc31   : > { %8446 = vmatpush3.bf16.msra.mxu1 %v8828_v38 }
 0xc32   : > { %8447 = vmatprep.subr.bf16.mxu1 %v8829_v10 }
 0xc35   : > { %8448 = vmatpush3.bf16.msra.mxu1 %v8829_v10 }
 0xc50   : > { %v3171_v29 = vpop.xlane.xlu1 %3170 }
 0xc51   : > { %9031 = vrcp.f32 %v3171_v29 }
 0xc54   : > { %v3329_v5 = vpop.permute.xlu1 %3328 }
 0xc55   : > { %v3334_v21 = vsel %vm1846_vm2, %v3329_v5, 0 }
 0xc56   : > { %8434 = vmatpush3.bf16.msra.mxu0 %v3334_v21 }
 0xc58   : > { %v3387_v43 = vpop.permute.xlu1 %3386 }
 0xc59   : > { %v3421_v6 = vsel %vm1606_vm1, %v2029_v56, %v3387_v43  ;;  %v8842_v56 = vld [vmem:[%s11232_s11 + $0x30] ss:$8 sps:$4 sm:$0xff]  }
 0xc5b   : > { %v9032_v13 = vpop.eup %9031 }
 0xc5c   : > { %v3179_v34 = vmul.f32 %v9032_v13, %v9024_v27  ;;  %v8830_v27 = vld [vmem:[%s11228_s7 + $0x28] sm:$0xff]   ;;  %v3391_v51 = vpop.permute.xlu1 %3390  ;;  %v2031_v13 = vpack.c.bf16 %v9794_v3, %v9794_v3 }
 0xc5d   : > { %8449 = vmatprep.subr.bf16.mxu1 %v8830_v27 }
 0xc5e   : > { %v3183_v9 = vpack.c.bf16 %v3179_v34, %v3179_v34  ;;  %8450 = vmatpush3.bf16.msra.mxu1 %v8830_v27 }
 0xc5f   : > { %8451 = vmatprep.subr.bf16.mxu1 %v8831_v31 }
 0xc60   : > { %8436 = vmatmul.mubr.msk.bf16.vlgmr.msra.gmra.mrb[76].mxu0 %vm1794_vm4, %v3183_v9  ;;  %v3399_v26 = vpop.permute.xlu1 %3398  ;;  %v3424_v9 = vsel %vm1606_vm1, %v2030_v55, %v3389_v48 }
 0xc61   : > { %3790 = vmatprep.mubr.bf16.mxu0 %v9201_v22  ;;  %v3432_v57 = vsel %vm3428_vm5, %v3421_v6, %v3399_v26  ;;  %v8848_v6 = vld [vmem:[%s11232_s11 + $0x50] ss:$8 sps:$4 sm:$0xff]  }
 0xc62   : > { %8452 = vmatpush3.bf16.msra.mxu1 %v8831_v31 }
 0xc63   : > { %8453 = vmatprep.subr.bf16.mxu1 %v8832_v32 }
 0xc64   : > { %v3403_v53 = vpop.permute.xlu1 %3402 }
 0xc66   : > { %8454 = vmatpush3.bf16.msra.mxu1 %v8832_v32 }
 0xca2   : > { %v3226_v59 = vpop.f32.mrb[76].mxu1 }
 0xca3   : > { %v3376_v1 = vpack.c.bf16 %v3226_v59, %v3226_v59  ;;  %v8419_v14 = vpop.f32.mrb[77].mxu1  ;;  %v3427_v59 = vsel %vm1606_vm1, %v2031_v13, %v3391_v51 }
 0xca4   : > { %v3229_v16 = vpop.f32.mrb[78].mxu1  ;;  %v3436_v14 = vsel %vm3428_vm5, %v3427_v59, %v3403_v53  ;;  %v8839_v53 = vld [vmem:[%s11232_s11 + $0x20] ss:$8 sps:$4 sm:$0xff]  }
 0xca5   : > { %3408 = vrot.lane.b32.xlu0 %v3376_v1, %s11248_s3  ;;  %v8420_v12 = vpop.f32.mrb[79].mxu1  ;;  %v3434_v1 = vsel %vm3428_vm5, %v3424_v9, %v3401_v52  ;;  %v8841_v52 = vld [vmem:[%s11232_s11 + $0x24] ss:$8 sps:$4 sm:$0xff]  }
 0xcf7   : > { %v3322_v15 = vpop.f32.mrb[80].mxu1 }
 0xcf8   : > { %v3378_v58 = vpack.c.bf16 %v3322_v15, %v3322_v15  ;;  %v8431_v60 = vpop.f32.mrb[81].mxu1 }
 0xcf9   : > { %v3325_v19 = vpop.f32.mrb[82].mxu1 }
 0xcfa   : > { %v3274_v50 = vpop.f32.mrb[72].mxu0  ;;  %3412 = vrot.lane.b32.xlu0 %v3378_v58, %s11248_s3  ;;  %v8432_v20 = vpop.f32.mrb[83].mxu1 }
 0xcfb   : > { %v3377_v25 = vpack.c.bf16 %v3274_v50, %v3274_v50  ;;  %v8425_v30 = vpop.f32.mrb[73].mxu0 }
 0xcfc   : > { %v3277_v7 = vpop.f32.mrb[74].mxu0 }
 0xcfd   : > { %v8426_v24 = vpop.f32.mrb[75].mxu0  ;;  %3410 = vrot.lane.b32.xlu1 %v3377_v25, %s11248_s3 }
 0xd17   : > { %v3409_v28 = vpop.permute.xlu0 %3408 }
 0xd18   : > { %v3439_v5 = vsel %vm3437_vm6, %v3430_v36, %v3409_v28  ;;  %v8847_v28 = vld [vmem:[%s11232_s11 + $0x44] ss:$8 sps:$4 sm:$0xff]   ;;  %v8850_v36 = vld [vmem:[%s11232_s11 + $0x54] ss:$8 sps:$4 sm:$0xff]  }
 0xd33   : > { %v3370_v35 = vpop.f32.mrb[76].mxu0 }
 0xd34   : > { %v3379_v40 = vpack.c.bf16 %v3370_v35, %v3370_v35  ;;  %v8437_v41 = vpop.f32.mrb[77].mxu0 }
 0xd35   : > { %v3373_v42 = vpop.f32.mrb[78].mxu0 }
 0xd36   : > { %3414 = vrot.lane.b32.xlu1 %v3379_v40, %s11248_s3  ;;  %v8438_v44 = vpop.f32.mrb[79].mxu0  ;;  %s11258_s3 = smov 96  }
 0xd6c   : > { %v3413_v34 = vpop.permute.xlu0 %3412 }
 0xd6d   : > { %v3443_v12 = vsel %vm3437_vm6, %v3434_v1, %v3413_v34 }
 0xd6f   : > { %v3411_v29 = vpop.permute.xlu1 %3410 }
 0xd70   : > { %v3441_v21 = vsel %vm3437_vm6, %v3432_v57, %v3411_v29  ;;  %v8853_v57 = vld [vmem:[%s11232_s11 + $0x64] ss:$8 sps:$4 sm:$0xff]   ;;  %v8851_v29 = vld [vmem:[%s11232_s11 + $0x60] ss:$8 sps:$4 sm:$0xff]  }
 0xd71   : > { %v7607_v49 = vcombine.low %v3439_v5, %v3441_v21  ;;  %v8856_v5 = vld [vmem:[%s11232_s11 + $0x74] ss:$8 sps:$4 sm:$0xff]   ;;  %v8854_v21 = vld [vmem:[%s11232_s11 + $0x70] ss:$8 sps:$4 sm:$0xff]  }
 0xd73   : > { %8455 = vmatprep.mubr.bf16.mxu1 %v7607_v49 }
 0xda8   : > { %v3415_v16 = vpop.permute.xlu1 %3414 }
 0xda9   : > { %v3445_v17 = vsel %vm3437_vm6, %v3436_v14, %v3415_v16 }
 0xdaa   : > { %v7608_v18 = vcombine.low %v3443_v12, %v3445_v17 }
 0xdac   : > { %8456 = vmatmul.mubr.bf16.vlgmr.msra.gmra.mrb[84].mxu1 %v7608_v18 }
 0xe7f   : > { %v8457_v3 = vpop.f32.mrb[84].mxu1 }
 0xe80   : > { %v3563_v15 = vpop.f32.mrb[85].mxu1  ;;  %v3572_v19 = vadd.f32 %v8457_v3, %v7606_v11  ;;  %v7617_v3 = vld [vmem:[%s11230_s9] ss:$0 sm:$0xff] }
 0xe81   : > { %v3564_v37 = vadd.f32 %v7606_v11, %v3563_v15  ;;  %v8458_v58 = vpop.f32.mrb[86].mxu1 }
 0xe82   : > { %v3566_v60 = vpop.f32.mrb[87].mxu1  ;;  %v10078_v30 = vadd.f32 %v3572_v19, %v9497_v45  ;;  %v3575_v38 = vadd.f32 %v8458_v58, %v7606_v11  ;;  %v8838_v45 = vld [vmem:[%s11232_s11 + $0x14] ss:$8 sps:$4 sm:$0xff]  }
 0xe83   : > { %v10071_v50 = vadd.f32 %v3564_v37, %v9485_v33  ;;  %v3567_v20 = vadd.f32 %v7606_v11, %v3566_v60  ;;  %v8833_v33 = vld [vmem:[%s11232_s11] ss:$8 sps:$4 sm:$0xff]  }
 0xe84   : > { %v10083_v7 = vadd.f32 %v3575_v38, %v9503_v47  ;;  %v8836_v47 = vld [vmem:[%s11232_s11 + $0x10] ss:$8 sps:$4 sm:$0xff]  }
 0xe85   : > { %v10074_v25 = vadd.f32 %v3567_v20, %v9491_v39  ;;  %3584 = vadd.xlane.f32.xlu0 %v10071_v50  ;;  %v8835_v39 = vld [vmem:[%s11232_s11 + $0x4] ss:$8 sps:$4 sm:$0xff]   ;;  %v7618_v20 = vld [vmem:[%s11231_s10] ss:$0 sm:$0xff] }
 0xe86   : > { %3758 = vmatprep.subr.bf16.mxu0 %v8835_v39 }
 0xe87   : > { %3586 = vadd.xlane.f32.xlu1 %v10074_v25  ;;  %3759 = vmatpush1.bf16.msra.mxu0 %v8833_v33 }
 0xe88   : > { %3760 = vmatprep.subr.bf16.mxu0 %v8838_v45 }
 0xe89   : > { %3588 = vadd.xlane.f32.xlu0 %v10078_v30 }
 0xe8b   : > { %3761 = vmatpush1.bf16.msra.mxu0 %v8836_v47 }
 0xe8c   : > { %3762 = vmatprep.subr.bf16.mxu0 %v8841_v52  ;;  %v8866_v52 = vld [vmem:[%s11234_s13 + $0x20] sm:$0xff]  }
 0xe8d   : > { %3590 = vadd.xlane.f32.xlu0 %v10083_v7 }
 0xe8f   : > { %3763 = vmatpush1.bf16.msra.mxu0 %v8839_v53  ;;  %v8867_v53 = vld [vmem:[%s11234_s13 + $0x68] sm:$0xff]  }
 0xe90   : > { %3764 = vmatprep.subr.bf16.mxu0 %v8844_v62  ;;  %v8868_v62 = vld [vmem:[%s11234_s13 + $0x28] sm:$0xff]  }
 0xe93   : > { %3765 = vmatpush1.bf16.msra.mxu0 %v8842_v56  ;;  %v8869_v56 = vld [vmem:[%s11234_s13 + $0x70] sm:$0xff]  }
 0xe94   : > { %3766 = vmatprep.subr.bf16.mxu0 %v8847_v28  ;;  %v8870_v28 = vld [vmem:[%s11234_s13 + $0x30] sm:$0xff]  }
 0xe97   : > { %3767 = vmatpush1.bf16.msra.mxu0 %v8845_v46  ;;  %v8871_v46 = vld [vmem:[%s11234_s13 + $0x78] sm:$0xff]  }
 0xe98   : > { %3768 = vmatprep.subr.bf16.mxu0 %v8850_v36  ;;  %v3666_v36 = vld [vmem:[%s11233_s12] sm:$0x3] }
 0xe9b   : > { %3769 = vmatpush1.bf16.msra.mxu0 %v8848_v6  ;;  %v8872_v6 = vld [vmem:[%s11234_s13 + $0x38] sm:$0xff]  }
 0xe9c   : > { %3770 = vmatprep.subr.bf16.mxu0 %v8853_v57  ;;  %v3671_v57 = vrot.slane %v3666_v36, %v9620_v0 }
 0xe9f   : > { %3771 = vmatpush1.bf16.msra.mxu0 %v8851_v29  ;;  %v3675_v29 = vrot.slane %v3666_v36, %v9626_v2 }
 0xea0   : > { %3772 = vmatprep.subr.bf16.mxu0 %v8856_v5 }
 0xea3   : > { %3773 = vmatpush1.bf16.msra.mxu0 %v8854_v21 }
 0xf12   : > { %v3585_v24 = vpop.xlane.xlu0 %3584 }
 0xf13   : > { %v3592_v10 = vmul.f32 0.0078125, %v3585_v24 }
 0xf14   : > { %v3587_v27 = vpop.xlane.xlu1 %3586 }
 0xf15   : > { %v3593_v31 = vmul.f32 0.0078125, %v3587_v27  ;;  %v3596_v32 = vsub.f32 %v10071_v50, %v3592_v10 }
 0xf16   : > { %v3589_v35 = vpop.xlane.xlu0 %3588 }
 0xf17   : > { %v3594_v40 = vmul.f32 0.0078125, %v3589_v35  ;;  %v3600_v41 = vmul.f32 %v3596_v32, %v3596_v32  ;;  %v3597_v42 = vsub.f32 %v10074_v25, %v3593_v31 }
 0xf19   : > { %3604 = vadd.xlane.f32.xlu0 %v3600_v41  ;;  %v3601_v44 = vmul.f32 %v3597_v42, %v3597_v42  ;;  %v3598_v4 = vsub.f32 %v10078_v30, %v3594_v40  ;;  %v8857_v41 = vld [vmem:[%s11234_s13 + $0x40] sm:$0xff]  }
 0xf1a   : > { %v3591_v43 = vpop.xlane.xlu0 %3590  ;;  %8077 = vmatprep.subr.bf16.mxu1 %v8857_v41 }
 0xf1b   : > { %v3595_v48 = vmul.f32 0.0078125, %v3591_v43  ;;  %3606 = vadd.xlane.f32.xlu1 %v3601_v44  ;;  %v3602_v51 = vmul.f32 %v3598_v4, %v3598_v4  ;;  %v8859_v44 = vld [vmem:[%s11234_s13 + $0x48] sm:$0xff]   ;;  %v8861_v43 = vld [vmem:[%s11234_s13 + $0x50] sm:$0xff]  }
 0xf1d   : > { %3608 = vadd.xlane.f32.xlu0 %v3602_v51  ;;  %v3599_v23 = vsub.f32 %v10083_v7, %v3595_v48  ;;  %v8862_v48 = vld [vmem:[%s11234_s13 + $0x10] sm:$0xff]   ;;  %v8863_v51 = vld [vmem:[%s11234_s13 + $0x58] sm:$0xff]  }
 0xf1f   : > { %v3603_v26 = vmul.f32 %v3599_v23, %v3599_v23 }
 0xf21   : > { %3610 = vadd.xlane.f32.xlu1 %v3603_v26  ;;  %v8865_v26 = vld [vmem:[%s11234_s13 + $0x60] sm:$0xff]  }
 0xfa6   : > { %v3605_v49 = vpop.xlane.xlu0 %3604 }
 0xfa7   : > { %v3612_v55 = vmul.f32 0.0078125, %v3605_v49 }
 0xfa8   : > { %v3607_v13 = vpop.xlane.xlu1 %3606 }
 0xfa9   : > { %v3616_v34 = vadd.f32 1e-12, %v3612_v55  ;;  %v3613_v9 = vmul.f32 0.0078125, %v3607_v13 }
 0xfaa   : > { %v3609_v59 = vpop.xlane.xlu0 %3608 }
 0xfab   : > { %9033 = vrsqrt.f32 %v3616_v34  ;;  %v3617_v1 = vadd.f32 1e-12, %v3613_v9  ;;  %v3614_v14 = vmul.f32 0.0078125, %v3609_v59 }
 0xfad   : > { %9035 = vrsqrt.f32 %v3617_v1  ;;  %v3618_v16 = vadd.f32 1e-12, %v3614_v14 }
 0xfae   : > { %v3611_v12 = vpop.xlane.xlu1 %3610 }
 0xfaf   : > { %9037 = vrsqrt.f32 %v3618_v16  ;;  %v3615_v17 = vmul.f32 0.0078125, %v3611_v12 }
 0xfb1   : > { %v3619_v18 = vadd.f32 1e-12, %v3615_v17 }
 0xfb3   : > { %9039 = vrsqrt.f32 %v3619_v18 }
 0xfb5   : > { %v9034_v11 = vpop.eup %9033 }
 0xfb6   : > { %v3624_v15 = vmul.f32 %v9034_v11, %v3596_v32 }
 0xfb7   : > { %v9036_v37 = vpop.eup %9035 }
 0xfb8   : > { %v3625_v58 = vmul.f32 %v9036_v37, %v3597_v42  ;;  %v3634_v60 = vmul.f32 %v7617_v3, %v3624_v15  ;;  %v8858_v42 = vld [vmem:[%s11234_s13] sm:$0xff]  }
 0xfb9   : > { %v9038_v19 = vpop.eup %9037  ;;  %8078 = vmatpush3.bf16.msra.mxu1 %v8858_v42 }
 0xfba   : > { %v3635_v38 = vmul.f32 %v7617_v3, %v3625_v58  ;;  %v3644_v33 = vadd.f32 %v7618_v20, %v3634_v60  ;;  %v3626_v45 = vmul.f32 %v9038_v19, %v3598_v4  ;;  %v8860_v4 = vld [vmem:[%s11234_s13 + $0x8] sm:$0xff]   ;;  %8079 = vmatprep.subr.bf16.mxu1 %v8859_v44 }
 0xfbc   : > { %v3645_v39 = vadd.f32 %v7618_v20, %v3635_v38  ;;  %v3636_v27 = vmul.f32 %v7617_v3, %v3626_v45 }
 0xfbd   : > { %v9040_v47 = vpop.eup %9039  ;;  %8080 = vmatpush3.bf16.msra.mxu1 %v8860_v4 }
 0xfbe   : > { %v3648_v24 = vpack.c.bf16 %v3645_v39, %v3644_v33  ;;  %v3627_v10 = vmul.f32 %v9040_v47, %v3599_v23  ;;  %v3646_v35 = vadd.f32 %v7618_v20, %v3636_v27  ;;  %8081 = vmatprep.subr.bf16.mxu1 %v8861_v43  ;;  %v8864_v23 = vld [vmem:[%s11234_s13 + $0x18] sm:$0xff]  }
 0xfc0   : > { %3791 = vmatmul.mubr.bf16.vlgmr.msra.gmra.mrb[80].mxu0 %v3648_v24  ;;  %v3637_v31 = vmul.f32 %v7617_v3, %v3627_v10 }
 0xfc1   : > { %3800 = vmatprep.mubr.bf16.mxu0 %v9201_v22  ;;  %8082 = vmatpush3.bf16.msra.mxu1 %v8862_v48 }
 0xfc2   : > { %v3647_v32 = vadd.f32 %v7618_v20, %v3637_v31  ;;  %8083 = vmatprep.subr.bf16.mxu1 %v8863_v51 }
 0xfc4   : > { %v3649_v40 = vpack.c.bf16 %v3647_v32, %v3646_v35 }
 0xfc5   : > { %8084 = vmatpush3.bf16.msra.mxu1 %v8864_v23 }
 0xfc6   : > { %8085 = vmatprep.subr.bf16.mxu1 %v8865_v26 }
 0xfc8   : > { %3801 = vmatmul.mubr.bf16.gmra.mrb[84].mxu0 %v3649_v40 }
 0xfc9   : > { %4500 = vmatprep.mubr.bf16.mxu0 %v9201_v22  ;;  %8086 = vmatpush3.bf16.msra.mxu1 %v8866_v52 }
 0xfca   : > { %8087 = vmatprep.subr.bf16.mxu1 %v8867_v53 }
 0xfcd   : > { %8088 = vmatpush3.bf16.msra.mxu1 %v8868_v62 }
 0xfce   : > { %8089 = vmatprep.subr.bf16.mxu1 %v8869_v56 }
 0xfd1   : > { %8090 = vmatpush3.bf16.msra.mxu1 %v8870_v28 }
 0xfd2   : > { %8091 = vmatprep.subr.bf16.mxu1 %v8871_v46 }
 0xfd5   : > { %8092 = vmatpush3.bf16.msra.mxu1 %v8872_v6 }
0x1093   : > { %v3792_v5 = vpop.f32.mrb[80].mxu0 }
0x1094   : > { %v3793_v21 = vadd.f32 %v3792_v5, %v3671_v57  ;;  %v3794_v49 = vpop.f32.mrb[81].mxu0 }
0x1095   : > { %v10199_v55 = vadd.f32 %v3794_v49, %v3675_v29  ;;  %v3796_v13 = vpop.f32.mrb[82].mxu0 }
0x1096   : > { %v10201_v34 = vmul.f32 0.70710677, %v3793_v21  ;;  %v10203_v9 = vadd.f32 %v3796_v13, %v3671_v57  ;;  %v3798_v59 = vpop.f32.mrb[83].mxu0  ;;  %v10243_v53 = vmul.f32 0.5, %v3793_v21 }
0x1097   : > { %v10206_v1 = vmul.f32 0.70710677, %v10199_v55  ;;  %v10208_v14 = vadd.f32 %v3798_v59, %v3675_v29 }
0x1098   : > { %v3827_v16 = vand.u32 2147483647, %v10201_v34  ;;  %v10212_v12 = vmul.f32 0.70710677, %v10203_v9  ;;  %vm3987_vm7 = vcmp.ge.f32.partialorder %v10201_v34, 0.0 }
0x1099   : > { %v3828_v17 = vand.u32 2147483647, %v10206_v1  ;;  %v10216_v18 = vmul.f32 0.70710677, %v10208_v14  ;;  %vm3988_vm8 = vcmp.ge.f32.partialorder %v10206_v1, 0.0 }
0x109a   : > { %v3835_v11 = vmul.f32 0.3275911, %v3827_v16  ;;  %v3829_v3 = vand.u32 2147483647, %v10212_v12  ;;  %v3939_v40 = vsub.f32 0.0, %v3827_v16  ;;  %vm3989_vm9 = vcmp.ge.f32.partialorder %v10212_v12, 0.0 }
0x109b   : > { %v3836_v15 = vmul.f32 0.3275911, %v3828_v17  ;;  %v3830_v37 = vand.u32 2147483647, %v10216_v18  ;;  %v3802_v19 = vpop.f32.mrb[84].mxu0  ;;  %v3940_v44 = vsub.f32 0.0, %v3828_v17 }
0x109c   : > { %v3843_v58 = vadd.f32 1.0, %v3835_v11  ;;  %v3837_v60 = vmul.f32 0.3275911, %v3829_v3  ;;  %v3804_v33 = vpop.f32.mrb[85].mxu0  ;;  %v10220_v10 = vadd.f32 %v3802_v19, %v3671_v57  ;;  %v3941_v43 = vsub.f32 0.0, %v3829_v3 }
0x109d   : > { %v3844_v20 = vadd.f32 1.0, %v3836_v15  ;;  %v3838_v38 = vmul.f32 0.3275911, %v3830_v37  ;;  %v3806_v45 = vpop.f32.mrb[86].mxu0  ;;  %v10222_v27 = vadd.f32 %v3804_v33, %v3675_v29  ;;  %v3942_v48 = vsub.f32 0.0, %v3830_v37 }
0x109e   : > { %9041 = vrcp.f32 %v3843_v58  ;;  %v3845_v39 = vadd.f32 1.0, %v3837_v60  ;;  %v3808_v47 = vpop.f32.mrb[87].mxu0  ;;  %v10224_v31 = vadd.f32 %v3806_v45, %v3671_v57  ;;  %v10227_v32 = vmul.f32 0.70710677, %v10220_v10 }
0x109f   : > { %9043 = vrcp.f32 %v3844_v20  ;;  %v3846_v24 = vadd.f32 1.0, %v3838_v38  ;;  %v10229_v35 = vadd.f32 %v3808_v47, %v3675_v29  ;;  %v10232_v41 = vmul.f32 0.70710677, %v10222_v27 }
0x10a0   : > { %9045 = vrcp.f32 %v3845_v39  ;;  %v10235_v42 = vmul.f32 0.70710677, %v10224_v31  ;;  %v3831_v4 = vand.u32 2147483647, %v10227_v32  ;;  %v3947_v62 = vmul.f32 %v3939_v40, %v3827_v16 }
0x10a1   : > { %9047 = vrcp.f32 %v3846_v24  ;;  %v3832_v51 = vand.u32 2147483647, %v10232_v41  ;;  %v10241_v52 = vmul.f32 0.70710677, %v10229_v35  ;;  %v3948_v6 = vmul.f32 %v3940_v44, %v3828_v17 }
0x10a2   : > { %v3833_v23 = vand.u32 2147483647, %v10235_v42  ;;  %v3839_v26 = vmul.f32 0.3275911, %v3831_v4  ;;  %v3943_v57 = vsub.f32 0.0, %v3831_v4  ;;  %v3949_v13 = vmul.f32 %v3941_v43, %v3829_v3 }
0x10a3   : > { %v3840_v56 = vmul.f32 0.3275911, %v3832_v51  ;;  %v3834_v29 = vand.u32 2147483647, %v10241_v52  ;;  %v3950_v59 = vmul.f32 %v3942_v48, %v3830_v37  ;;  %v3944_v16 = vsub.f32 0.0, %v3832_v51 }
0x10a4   : > { %v3841_v28 = vmul.f32 0.3275911, %v3833_v23  ;;  %v3847_v36 = vadd.f32 1.0, %v3839_v26  ;;  %v3955_v60 = vmul.f32 1.442695, %v3947_v62  ;;  %v3951_v33 = vmul.f32 %v3943_v57, %v3831_v4 }
0x10a5   : > { %v3848_v11 = vadd.f32 1.0, %v3840_v56  ;;  %v3842_v17 = vmul.f32 0.3275911, %v3834_v29  ;;  %v3957_v38 = vmul.f32 1.442695, %v3948_v6  ;;  %v3945_v39 = vsub.f32 0.0, %v3833_v23 }
0x10a6   : > { %9049 = vrcp.f32 %v3847_v36  ;;  %v3849_v15 = vadd.f32 1.0, %v3841_v28  ;;  %v3959_v37 = vmul.f32 1.442695, %v3949_v13  ;;  %v3961_v44 = vmul.f32 1.442695, %v3950_v59 }
0x10a7   : > { %9051 = vrcp.f32 %v3848_v11  ;;  %v3850_v47 = vadd.f32 1.0, %v3842_v17  ;;  %v3952_v43 = vmul.f32 %v3944_v16, %v3832_v51  ;;  %v3963_v56 = vmul.f32 1.442695, %v3951_v33 }
0x10a8   : > { %v10245_v46 = vpop.eup %9041  ;;  %9053 = vrcp.f32 %v3849_v15  ;;  %v3953_v28 = vmul.f32 %v3945_v39, %v3833_v23  ;;  %v3946_v13 = vsub.f32 0.0, %v3834_v29  ;;  %v10267_v23 = vmul.f32 0.5, %v10199_v55 }
0x10a9   : > { %v10248_v5 = vpop.eup %9043  ;;  %v3867_v49 = vmul.f32 1.0614054, %v10245_v46  ;;  %9055 = vpow2.f32 %v3955_v60  ;;  %v3965_v51 = vmul.f32 1.442695, %v3952_v43  ;;  %vm3990_vm10 = vcmp.ge.f32.partialorder %v10216_v18, 0.0 }
0x10aa   : > { %v3868_v21 = vmul.f32 1.0614054, %v10248_v5  ;;  %v10252_v19 = vpop.eup %9045  ;;  %9057 = vrcp.f32 %v3850_v47  ;;  %vm3991_vm11 = vcmp.ge.f32.partialorder %v10227_v32, 0.0  ;;  %vm3993_vm12 = vcmp.ge.f32.partialorder %v10235_v42, 0.0 }
0x10ab   : > { %v3875_v58 = vadd.f32 -1.4531521, %v3867_v49  ;;  %v3869_v3 = vmul.f32 1.0614054, %v10252_v19  ;;  %v10256_v24 = vpop.eup %9047  ;;  %9059 = vpow2.f32 %v3957_v38  ;;  %vm3992_vm13 = vcmp.ge.f32.partialorder %v10232_v41, 0.0 }
0x10ac   : > { %v3876_v20 = vadd.f32 -1.4531521, %v3868_v21  ;;  %v3870_v62 = vmul.f32 1.0614054, %v10256_v24  ;;  %9061 = vpow2.f32 %v3959_v37  ;;  %vm3994_vm14 = vcmp.ge.f32.partialorder %v10241_v52, 0.0 }
0x10ad   : > { %v3883_v45 = vmul.f32 %v10245_v46, %v3875_v58  ;;  %v3877_v26 = vadd.f32 -1.4531521, %v3869_v3  ;;  %9063 = vpow2.f32 %v3961_v44  ;;  %v3967_v58 = vmul.f32 1.442695, %v3953_v28 }
0x10ae   : > { %v3884_v40 = vmul.f32 %v10248_v5, %v3876_v20  ;;  %v3878_v57 = vadd.f32 -1.4531521, %v3870_v62  ;;  %9065 = vpow2.f32 %v3963_v56  ;;  %v3954_v3 = vmul.f32 %v3946_v13, %v3834_v29 }
0x10af   : > { %v3891_v48 = vadd.f32 1.4214138, %v3883_v45  ;;  %v3885_v36 = vmul.f32 %v10252_v19, %v3877_v26  ;;  %9067 = vpow2.f32 %v3965_v51  ;;  %v3816_v42 = vmul.f32 0.5, %v10222_v27 }
0x10b0   : > { %v3892_v4 = vadd.f32 1.4214138, %v3884_v40  ;;  %v3886_v21 = vmul.f32 %v10256_v24, %v3878_v57  ;;  %v10264_v16 = vpop.eup %9049  ;;  %9069 = vpow2.f32 %v3967_v58 }
0x10b1   : > { %v3899_v6 = vmul.f32 %v10245_v46, %v3891_v48  ;;  %v3893_v11 = vadd.f32 1.4214138, %v3885_v36  ;;  %v10269_v60 = vpop.eup %9051  ;;  %v3871_v33 = vmul.f32 1.0614054, %v10264_v16  ;;  %v10281_v48 = vmul.f32 0.5, %v10203_v9 }
0x10b2   : > { %v3900_v49 = vmul.f32 %v10248_v5, %v3892_v4  ;;  %v3894_v38 = vadd.f32 1.4214138, %v3886_v21  ;;  %v3872_v45 = vmul.f32 1.0614054, %v10269_v60  ;;  %v10277_v44 = vpop.eup %9053 }
0x10b3   : > { %v3907_v59 = vadd.f32 -0.28449672, %v3899_v6  ;;  %v3901_v20 = vmul.f32 %v10252_v19, %v3893_v11  ;;  %v3879_v40 = vadd.f32 -1.4531521, %v3871_v33  ;;  %v9056_v62 = vpop.eup %9055  ;;  %v3873_v9 = vmul.f32 1.0614054, %v10277_v44 }
0x10b4   : > { %v3908_v15 = vadd.f32 -0.28449672, %v3900_v49  ;;  %v3902_v47 = vmul.f32 %v10256_v24, %v3894_v38  ;;  %v3880_v26 = vadd.f32 -1.4531521, %v3872_v45  ;;  %v10287_v6 = vpop.eup %9057  ;;  %v3969_v49 = vmul.f32 1.442695, %v3954_v3 }
0x10b5   : > { %v3915_v17 = vmul.f32 %v10245_v46, %v3907_v59  ;;  %v3909_v37 = vadd.f32 -0.28449672, %v3901_v20  ;;  %v3887_v28 = vmul.f32 %v10264_v16, %v3879_v40  ;;  %v9060_v51 = vpop.eup %9059  ;;  %v3874_v20 = vmul.f32 1.0614054, %v10287_v6 }
0x10b6   : > { %v3916_v39 = vmul.f32 %v10248_v5, %v3908_v15  ;;  %v3910_v56 = vadd.f32 -0.28449672, %v3902_v47  ;;  %v3888_v57 = vmul.f32 %v10269_v60, %v3880_v26  ;;  %v9062_v21 = vpop.eup %9061  ;;  %9071 = vpow2.f32 %v3969_v49 }
0x10b7   : > { %v3923_v55 = vadd.f32 0.2548296, %v3915_v17  ;;  %v3917_v29 = vmul.f32 %v10252_v19, %v3909_v37  ;;  %v3895_v11 = vadd.f32 1.4214138, %v3887_v28  ;;  %v3881_v17 = vadd.f32 -1.4531521, %v3873_v9 }
0x10b8   : > { %v3924_v43 = vadd.f32 0.2548296, %v3916_v39  ;;  %v3896_v58 = vadd.f32 1.4214138, %v3888_v57  ;;  %v3882_v40 = vadd.f32 -1.4531521, %v3874_v20 }
0x10b9   : > { %v3931_v4 = vmul.f32 %v10245_v46, %v3923_v55  ;;  %v3925_v59 = vadd.f32 0.2548296, %v3917_v29  ;;  %v3918_v46 = vmul.f32 %v10256_v24, %v3910_v56  ;;  %v3903_v45 = vmul.f32 %v10264_v16, %v3895_v11 }
0x10ba   : > { %v3932_v36 = vmul.f32 %v10248_v5, %v3924_v43  ;;  %v9064_v5 = vpop.eup %9063  ;;  %v3904_v37 = vmul.f32 %v10269_v60, %v3896_v58  ;;  %v3889_v47 = vmul.f32 %v10277_v44, %v3881_v17 }
0x10bb   : > { %v3971_v13 = vmul.f32 %v9056_v62, %v3931_v4  ;;  %v3933_v33 = vmul.f32 %v10252_v19, %v3925_v59  ;;  %v3926_v39 = vadd.f32 0.2548296, %v3918_v46  ;;  %v9066_v3 = vpop.eup %9065  ;;  %v3911_v4 = vadd.f32 -0.28449672, %v3903_v45 }
0x10bc   : > { %v3972_v15 = vmul.f32 %v9060_v51, %v3932_v36  ;;  %v9068_v29 = vpop.eup %9067  ;;  %v3912_v28 = vadd.f32 -0.28449672, %v3904_v37  ;;  %v3897_v36 = vadd.f32 1.4214138, %v3889_v47  ;;  %v3890_v19 = vmul.f32 %v10287_v6, %v3882_v40 }
0x10bd   : > { %v3979_v38 = vsub.f32 1.0, %v3971_v13  ;;  %v3973_v26 = vmul.f32 %v9062_v21, %v3933_v33  ;;  %v3934_v62 = vmul.f32 %v10256_v24, %v3926_v39  ;;  %v3919_v13 = vmul.f32 %v10264_v16, %v3911_v4  ;;  %v9070_v59 = vpop.eup %9069 }
0x10be   : > { %v3980_v55 = vsub.f32 1.0, %v3972_v15  ;;  %v3920_v24 = vmul.f32 %v10269_v60, %v3912_v28  ;;  %v3905_v11 = vmul.f32 %v10277_v44, %v3897_v36 }
0x10bf   : > { %v3995_v43 = vsub.f32 0.0, %v3979_v38  ;;  %v3981_v9 = vsub.f32 1.0, %v3973_v26  ;;  %v3974_v51 = vmul.f32 %v9064_v5, %v3934_v62  ;;  %v3927_v17 = vadd.f32 0.2548296, %v3919_v13 }
0x10c0   : > { %v3996_v56 = vsub.f32 0.0, %v3980_v55  ;;  %v3928_v34 = vadd.f32 0.2548296, %v3920_v24  ;;  %v3913_v20 = vadd.f32 -0.28449672, %v3905_v11 }
0x10c1   : > { %v4003_v57 = vsel %vm3987_vm7, %v3979_v38, %v3995_v43  ;;  %v3997_v15 = vsub.f32 0.0, %v3981_v9  ;;  %v3982_v58 = vsub.f32 1.0, %v3974_v51  ;;  %v3898_v38 = vadd.f32 1.4214138, %v3890_v19 }
0x10c2   : > { %v4004_v46 = vsel %vm3988_vm8, %v3980_v55, %v3996_v56  ;;  %v4011_v21 = vadd.f32 1.0, %v4003_v57  ;;  %v3935_v39 = vmul.f32 %v10264_v16, %v3927_v17  ;;  %v3936_v55 = vmul.f32 %v10269_v60, %v3928_v34 }
0x10c3   : > { %v4012_v5 = vadd.f32 1.0, %v4004_v46  ;;  %v4005_v33 = vsel %vm3989_vm9, %v3981_v9, %v3997_v15  ;;  %v3998_v1 = vsub.f32 0.0, %v3982_v58  ;;  %v3921_v37 = vmul.f32 %v10277_v44, %v3913_v20 }
0x10c4   : > { %v4013_v45 = vadd.f32 1.0, %v4005_v33  ;;  %v3906_v47 = vmul.f32 %v10287_v6, %v3898_v38  ;;  %v4019_v40 = vmul.f32 %v4011_v21, %v10243_v53  ;;  %v3814_v43 = vmul.f32 0.5, %v10208_v14 }
0x10c5   : > { %v4006_v49 = vsel %vm3990_vm10, %v3982_v58, %v3998_v1  ;;  %v3975_v26 = vmul.f32 %v9066_v3, %v3935_v39  ;;  %v3976_v4 = vmul.f32 %v9068_v29, %v3936_v55  ;;  %v3929_v16 = vadd.f32 0.2548296, %v3921_v37  ;;  %v9072_v3 = vpop.eup %9071  ;;  %v7635_v55 = vld [vmem:[%s11235_s14] ss:$0 sm:$0xff] }
0x10c6   : > { %v4021_v12 = vmul.f32 %v4013_v45, %v10281_v48  ;;  %v4014_v62 = vadd.f32 1.0, %v4006_v49  ;;  %v3914_v28 = vadd.f32 -0.28449672, %v3906_v47  ;;  %v4020_v60 = vmul.f32 %v4012_v5, %v10267_v23 }
0x10c7   : > { %v3983_v56 = vsub.f32 1.0, %v3975_v26  ;;  %v3937_v57 = vmul.f32 %v10277_v44, %v3929_v16  ;;  %v3984_v9 = vsub.f32 1.0, %v3976_v4  ;;  %v3815_v21 = vmul.f32 0.5, %v10220_v10 }
0x10c8   : > { %v4027_v36 = vpack.c.bf16 %v4021_v12, %v4019_v40  ;;  %v4022_v19 = vmul.f32 %v4014_v62, %v3814_v43  ;;  %v3922_v14 = vmul.f32 %v10287_v6, %v3914_v28  ;;  %v3817_v15 = vmul.f32 0.5, %v10224_v31 }
0x10c9   : > { %v3999_v53 = vsub.f32 0.0, %v3983_v56  ;;  %v3977_v18 = vmul.f32 %v9070_v59, %v3937_v57  ;;  %v4000_v46 = vsub.f32 0.0, %v3984_v9  ;;  %v3818_v10 = vmul.f32 0.5, %v10229_v35  ;;  %v8875_v57 = vld [vmem:[%s11226_s5 + $0xc4] ss:$12 sps:$4 sm:$0xff]  }
0x10ca   : > { %v4028_v51 = vpack.c.bf16 %v4022_v19, %v4020_v60  ;;  %v3930_v48 = vadd.f32 0.2548296, %v3922_v14  ;;  %4468 = vmatprep.subr.bf16.mxu0 %v8875_v57 }
0x10cb   : > { %v4007_v29 = vsel %vm3991_vm11, %v3983_v56, %v3999_v53  ;;  %v3985_v13 = vsub.f32 1.0, %v3977_v18  ;;  %v4008_v32 = vsel %vm3992_vm13, %v3984_v9, %v4000_v46 }
0x10cc   : > { %4198 = vmatprep.mubr.bf16.mxu1 %v4028_v51  ;;  %v3938_v23 = vmul.f32 %v10287_v6, %v3930_v48  ;;  %v4015_v11 = vadd.f32 1.0, %v4007_v29  ;;  %v4016_v6 = vadd.f32 1.0, %v4008_v32  ;;  %v8881_v32 = vld [vmem:[%s11226_s5 + $0xf4] ss:$12 sps:$4 sm:$0xff]  }
0x10cd   : > { %4199 = vmatmul.mubr.bf16.vlgmr.msra.gmra.mrb[88].mxu1 %v4027_v36  ;;  %v4001_v24 = vsub.f32 0.0, %v3985_v13 }
0x10ce   : > { %v3978_v44 = vmul.f32 %v9072_v3, %v3938_v23  ;;  %v4023_v34 = vmul.f32 %v4015_v11, %v3815_v21  ;;  %v4024_v41 = vmul.f32 %v4016_v6, %v3816_v42  ;;  %v8890_v6 = vld [vmem:[%s11226_s5 + $0xf8] ss:$12 sps:$4 sm:$0xff]   ;;  %v8894_v42 = vld [vmem:[%s11226_s5 + $0x110] ss:$12 sps:$4 sm:$0xff]  }
0x10cf   : > { %v4009_v59 = vsel %vm3993_vm12, %v3985_v13, %v4001_v24 }
0x10d0   : > { %v4017_v58 = vadd.f32 1.0, %v4009_v59  ;;  %v3986_v17 = vsub.f32 1.0, %v3978_v44 }
0x10d2   : > { %v4025_v20 = vmul.f32 %v4017_v58, %v3817_v15  ;;  %v4002_v38 = vsub.f32 0.0, %v3986_v17  ;;  %v8882_v15 = vld [vmem:[%s11226_s5 + $0xc8] ss:$12 sps:$4 sm:$0xff]   ;;  %v8879_v58 = vld [vmem:[%s11226_s5 + $0xf0] ss:$12 sps:$4 sm:$0xff]  }
0x10d3   : > { %8459 = vmatprep.subr.bf16.mxu1 %v8882_v15 }
0x10d4   : > { %v4010_v5 = vsel %vm3994_vm14, %v3986_v17, %v4002_v38  ;;  %v4029_v33 = vpack.c.bf16 %v4025_v20, %v4023_v34  ;;  %8460 = vmatpush3.bf16.msra.mxu1 %v8882_v15  ;;  %v8885_v17 = vld [vmem:[%s11226_s5 + $0x10c] ss:$12 sps:$4 sm:$0xff]   ;;  %v8883_v20 = vld [vmem:[%s11226_s5 + $0x108] ss:$12 sps:$4 sm:$0xff]   ;;  %v8889_v38 = vld [vmem:[%s11226_s5 + $0x124] ss:$12 sps:$4 sm:$0xff]  }
0x10d5   : > { %v4018_v1 = vadd.f32 1.0, %v4010_v5  ;;  %v8886_v34 = vld [vmem:[%s11226_s5 + $0xe0] ss:$12 sps:$4 sm:$0xff]  }
0x10d6   : > { %8461 = vmatprep.subr.bf16.mxu1 %v8886_v34  ;;  %v8887_v5 = vld [vmem:[%s11226_s5 + $0x120] ss:$12 sps:$4 sm:$0xff]  }
0x10d7   : > { %v4026_v39 = vmul.f32 %v4018_v1, %v3818_v10  ;;  %v8891_v10 = vld [vmem:[%s11226_s5 + $0x138] ss:$12 sps:$4 sm:$0xff]   ;;  %v8895_v1 = vld [vmem:[%s11226_s5 + $0x150] ss:$12 sps:$4 sm:$0xff]  }
0x10d8   : > { %8462 = vmatpush3.bf16.msra.mxu1 %v8886_v34 }
0x10d9   : > { %v4030_v45 = vpack.c.bf16 %v4026_v39, %v4024_v41  ;;  %8463 = vmatprep.subr.bf16.mxu1 %v8890_v6  ;;  %v8897_v41 = vld [vmem:[%s11226_s5 + $0x154] ss:$12 sps:$4 sm:$0xff]  }
0x10da   : > { %v8898_v39 = vld [vmem:[%s11226_s5 + $0x128] ss:$12 sps:$4 sm:$0xff]  }
0x10db   : > { %4206 = vmatprep.mubr.bf16.mxu1 %v4030_v45  ;;  %v8901_v45 = vld [vmem:[%s11226_s5 + $0x16c] ss:$12 sps:$4 sm:$0xff]  }
0x10dc   : > { %4207 = vmatmul.mubr.bf16.gmra.mrb[92].mxu1 %v4029_v33  ;;  %v8893_v33 = vld [vmem:[%s11226_s5 + $0x13c] ss:$12 sps:$4 sm:$0xff]  }
0x10dd   : > { %8464 = vmatpush3.bf16.msra.mxu1 %v8890_v6 }
0x10de   : > { %8465 = vmatprep.subr.bf16.mxu1 %v8894_v42 }
0x10e1   : > { %8466 = vmatpush3.bf16.msra.mxu1 %v8894_v42 }
0x10e2   : > { %8467 = vmatprep.subr.bf16.mxu1 %v8898_v39 }
0x10e5   : > { %8468 = vmatpush3.bf16.msra.mxu1 %v8898_v39 }
0x11a0   : > { %v8093_v31 = vpop.f32.mrb[88].mxu1 }
0x11a1   : > { %v8094_v37 = vpop.f32.mrb[89].mxu1 }
0x11a2   : > { %v8095_v47 = vadd.f32 %v8094_v37, %v8093_v31  ;;  %v8096_v52 = vpop.f32.mrb[90].mxu1  ;;  %v8902_v31 = vld [vmem:[%s11226_s5 + $0x140] ss:$12 sps:$4 sm:$0xff]   ;;  %v8903_v37 = vld [vmem:[%s11226_s5 + $0x158] ss:$12 sps:$4 sm:$0xff]  }
0x11a3   : > { %v8097_v40 = vpop.f32.mrb[91].mxu1  ;;  %8469 = vmatprep.subr.bf16.mxu1 %v8902_v31 }
0x11a4   : > { %v4201_v43 = vadd.f32 %v8095_v47, %v7635_v55  ;;  %v8098_v49 = vadd.f32 %v8097_v40, %v8096_v52  ;;  %8470 = vmatpush3.bf16.msra.mxu1 %v8902_v31  ;;  %v8904_v47 = vld [vmem:[%s11226_s5 + $0x170] ss:$12 sps:$4 sm:$0xff]  }
0x11a5   : > { %8471 = vmatprep.subr.bf16.mxu1 %v8903_v37 }
0x11a6   : > { %v4204_v27 = vadd.f32 %v8098_v49, %v7635_v55  ;;  %v10336_v35 = vadd.f32 %v4201_v43, %v10071_v50 }
0x11a8   : > { %4223 = vadd.xlane.f32.xlu0 %v10336_v35  ;;  %v10340_v26 = vadd.f32 %v4204_v27, %v10074_v25  ;;  %v8873_v25 = vld [vmem:[%s11226_s5 + $0xc0] ss:$12 sps:$4 sm:$0xff]   ;;  %8472 = vmatpush3.bf16.msra.mxu1 %v8903_v37 }
0x11a9   : > { %4469 = vmatpush1.bf16.msra.mxu0 %v8873_v25  ;;  %8473 = vmatprep.subr.bf16.mxu1 %v8904_v47 }
0x11aa   : > { %4225 = vadd.xlane.f32.xlu1 %v10340_v26 }
0x11ac   : > { %8474 = vmatpush3.bf16.msra.mxu1 %v8904_v47 }
0x11ad   : > { %8497 = vmatprep.subr.bf16.mxu1 %v9202_v61 }
0x11af   : > { %v8099_v12 = vpop.f32.mrb[92].mxu1 }
0x11b0   : > { %v8100_v62 = vpop.f32.mrb[93].mxu1 }
0x11b1   : > { %v8101_v4 = vadd.f32 %v8100_v62, %v8099_v12  ;;  %v8102_v16 = vpop.f32.mrb[94].mxu1 }
0x11b2   : > { %v8103_v56 = vpop.f32.mrb[95].mxu1 }
0x11b3   : > { %v4209_v28 = vadd.f32 %v8101_v4, %v7635_v55  ;;  %v8104_v60 = vadd.f32 %v8103_v56, %v8102_v16  ;;  %v7654_v4 = vld [vmem:[%s11257_s20 + $0x1] ss:$0 sm:$0xff] }
0x11b5   : > { %v4212_v36 = vadd.f32 %v8104_v60, %v7635_v55  ;;  %v10344_v19 = vadd.f32 %v4209_v28, %v10078_v30  ;;  %v8878_v30 = vld [vmem:[%s11226_s5 + $0xdc] ss:$12 sps:$4 sm:$0xff]  }
0x11b6   : > { %4470 = vmatprep.subr.bf16.mxu0 %v8878_v30  ;;  %v8899_v55 = vld [vmem:[%s11226_s5 + $0x168] ss:$12 sps:$4 sm:$0xff]  }
0x11b7   : > { %4227 = vadd.xlane.f32.xlu0 %v10344_v19  ;;  %v10348_v50 = vadd.f32 %v4212_v36, %v10083_v7  ;;  %v8876_v7 = vld [vmem:[%s11226_s5 + $0xd8] ss:$12 sps:$4 sm:$0xff]  }
0x11b8   : > { %4471 = vmatpush1.bf16.msra.mxu0 %v8876_v7 }
0x11b9   : > { %4229 = vadd.xlane.f32.xlu1 %v10348_v50  ;;  %4472 = vmatprep.subr.bf16.mxu0 %v8881_v32 }
0x11bc   : > { %4473 = vmatpush1.bf16.msra.mxu0 %v8879_v58 }
0x11bd   : > { %4474 = vmatprep.subr.bf16.mxu0 %v8885_v17 }
0x11c0   : > { %4475 = vmatpush1.bf16.msra.mxu0 %v8883_v20 }
0x11c1   : > { %4476 = vmatprep.subr.bf16.mxu0 %v8889_v38 }
0x11c4   : > { %4477 = vmatpush1.bf16.msra.mxu0 %v8887_v5 }
0x11c5   : > { %4478 = vmatprep.subr.bf16.mxu0 %v8893_v33 }
0x11c8   : > { %4479 = vmatpush1.bf16.msra.mxu0 %v8891_v10 }
0x11c9   : > { %4480 = vmatprep.subr.bf16.mxu0 %v8897_v41 }
0x11cc   : > { %4481 = vmatpush1.bf16.msra.mxu0 %v8895_v1 }
0x11cd   : > { %4482 = vmatprep.subr.bf16.mxu0 %v8901_v45 }
0x11d0   : > { %4483 = vmatpush1.bf16.msra.mxu0 %v8899_v55 }
0x11d1   : > { %8479 = vmatprep.subr.bf16.mxu0 %v9202_v61 }
0x1235   : > { %v4224_v53 = vpop.xlane.xlu0 %4223 }
0x1236   : > { %v4231_v9 = vmul.f32 0.0078125, %v4224_v53  ;;  %v7655_v53 = vld [vmem:[%s11225_s4 + $0x1] ss:$0 sm:$0xff] }
0x1237   : > { %v4226_v14 = vpop.xlane.xlu1 %4225 }
0x1238   : > { %v10364_v18 = vsub.f32 %v10336_v35, %v4231_v9  ;;  %v4232_v51 = vmul.f32 0.0078125, %v4226_v14 }
0x123a   : > { %v10367_v48 = vsub.f32 %v10340_v26, %v4232_v51  ;;  %v4239_v3 = vmul.f32 %v10364_v18, %v10364_v18 }
0x123c   : > { %4243 = vadd.xlane.f32.xlu0 %v4239_v3  ;;  %v4240_v29 = vmul.f32 %v10367_v48, %v10367_v48 }
0x123e   : > { %4245 = vadd.xlane.f32.xlu1 %v4240_v29 }
0x1244   : > { %v4228_v13 = vpop.xlane.xlu0 %4227 }
0x1245   : > { %v4233_v46 = vmul.f32 0.0078125, %v4228_v13 }
0x1246   : > { %v4230_v23 = vpop.xlane.xlu1 %4229 }
0x1247   : > { %v10374_v24 = vsub.f32 %v10344_v19, %v4233_v46  ;;  %v4234_v11 = vmul.f32 0.0078125, %v4230_v23 }
0x1249   : > { %v10377_v44 = vsub.f32 %v10348_v50, %v4234_v11  ;;  %v4241_v21 = vmul.f32 %v10374_v24, %v10374_v24 }
0x124b   : > { %4247 = vadd.xlane.f32.xlu0 %v4241_v21  ;;  %v4242_v59 = vmul.f32 %v10377_v44, %v10377_v44 }
0x124d   : > { %4249 = vadd.xlane.f32.xlu1 %v4242_v59 }
0x12c9   : > { %v4244_v52 = vpop.xlane.xlu0 %4243 }
0x12ca   : > { %v4251_v40 = vmul.f32 0.0078125, %v4244_v52 }
0x12cb   : > { %v4246_v43 = vpop.xlane.xlu1 %4245 }
0x12cc   : > { %v4255_v49 = vadd.f32 1e-12, %v4251_v40  ;;  %v4252_v27 = vmul.f32 0.0078125, %v4246_v43 }
0x12ce   : > { %9073 = vrsqrt.f32 %v4255_v49  ;;  %v4256_v12 = vadd.f32 1e-12, %v4252_v27 }
0x12d0   : > { %9075 = vrsqrt.f32 %v4256_v12 }
0x12d8   : > { %v9074_v62 = vpop.eup %9073  ;;  %v4248_v56 = vpop.xlane.xlu0 %4247 }
0x12d9   : > { %v4263_v16 = vmul.f32 %v9074_v62, %v10364_v18  ;;  %v4253_v60 = vmul.f32 0.0078125, %v4248_v56 }
0x12da   : > { %v9076_v28 = vpop.eup %9075  ;;  %v4250_v57 = vpop.xlane.xlu1 %4249 }
0x12db   : > { %v4273_v36 = vmul.f32 %v7654_v4, %v4263_v16  ;;  %v4264_v25 = vmul.f32 %v9076_v28, %v10367_v48  ;;  %v4257_v30 = vadd.f32 1e-12, %v4253_v60  ;;  %v4254_v7 = vmul.f32 0.0078125, %v4250_v57 }
0x12dd   : > { %v4274_v9 = vmul.f32 %v7654_v4, %v4264_v25  ;;  %9077 = vrsqrt.f32 %v4257_v30  ;;  %v4258_v14 = vadd.f32 1e-12, %v4254_v7  ;;  %v4283_v51 = vadd.f32 %v7655_v53, %v4273_v36 }
0x12df   : > { %v4284_v3 = vadd.f32 %v7655_v53, %v4274_v9  ;;  %9079 = vrsqrt.f32 %v4258_v14 }
0x12e1   : > { %v4287_v18 = vpack.c.bf16 %v4284_v3, %v4283_v51 }
0x12e3   : > { %4501 = vmatmul.mubr.bf16.vlgmr.msra.gmra.mrb[88].mxu0 %v4287_v18  ;;  %8475 = vmatprep.mubr.bf16.mxu1 %v4287_v18 }
0x12e4   : > { %4510 = vmatprep.mubr.bf16.mxu0 %v9201_v22 }
0x12e7   : > { %v9078_v29 = vpop.eup %9077 }
0x12e8   : > { %v4265_v48 = vmul.f32 %v9078_v29, %v10374_v24  ;;  %v7688_v24 = vld [vmem:[%s11227_s6 + $0x3] sm:$0x7] }
0x12e9   : > { %v9080_v13 = vpop.eup %9079  ;;  %v4328_v15 = vrot.slane %v7688_v24, %v9620_v0  ;;  %v4336_v45 = vrot.slane %v7688_v24, %v1338_v8 }
0x12ea   : > { %v4266_v46 = vmul.f32 %v9080_v13, %v10377_v44  ;;  %v4275_v23 = vmul.f32 %v7654_v4, %v4265_v48  ;;  %v4332_v44 = vrot.slane %v7688_v24, %v9626_v2 }
0x12ec   : > { %v4276_v11 = vmul.f32 %v7654_v4, %v4266_v46  ;;  %v4285_v21 = vadd.f32 %v7655_v53, %v4275_v23 }
0x12ee   : > { %v4286_v59 = vadd.f32 %v7655_v53, %v4276_v11 }
0x12f0   : > { %v4288_v32 = vpack.c.bf16 %v4286_v59, %v4285_v21 }
0x12f2   : > { %4511 = vmatmul.mubr.bf16.gmra.mrb[92].mxu0 %v4288_v32  ;;  %8476 = vmatmul.mubr.bf16.vlgmr.msra.gmra.mrb[96].mxu1 %v4288_v32 }
0x12f3   : > { %8481 = vmatprep.mubr.msk.bf16.mxu0 %vm9203_vm0, %v9202_v61  ;;  %8499 = vmatprep.mubr.msk.bf16.mxu1 %vm9203_vm0, %v9202_v61 }
0x13b6   : > { %v4502_v58 = vpop.f32.mrb[88].mxu0 }
0x13b7   : > { %v10465_v17 = vadd.f32 %v4502_v58, %v4328_v15  ;;  %v4504_v34 = vpop.f32.mrb[89].mxu0 }
0x13b8   : > { %v4505_v20 = vadd.f32 %v4504_v34, %v4332_v44  ;;  %v4506_v38 = vpop.f32.mrb[90].mxu0 }
0x13b9   : > { %v10467_v6 = vadd.f32 %v4506_v38, %v4328_v15  ;;  %v4508_v5 = vpop.f32.mrb[91].mxu0 }
0x13ba   : > { %v10470_v33 = vpack.c.bf16 %v4505_v20, %v10465_v17  ;;  %v4509_v42 = vadd.f32 %v4508_v5, %v4332_v44 }
0x13bc   : > { %v10473_v10 = vpack.c.bf16 %v4509_v42, %v10467_v6  ;;  %v4602_v1 = vrot.slane %v10470_v33, 4 }
0x13be   : > { %v4607_v41 = vsel %vm1606_vm1, %v4602_v1, 0  ;;  %v4649_v39 = vrot.slane %v10473_v10, 4 }
0x13bf   : > { %8480 = vmatpush3.bf16.xpose.msra.mxu0 %v4607_v41 }
0x13c0   : > { %8485 = vmatprep.subr.bf16.mxu0 %v9202_v61  ;;  %v4654_v37 = vsel %vm1606_vm1, %v4649_v39, 0 }
0x13c5   : > { %v4512_v31 = vpop.f32.mrb[92].mxu0  ;;  %v8477_v55 = vpop.f32.mrb[96].mxu1 }
0x13c6   : > { %8482 = vmatmul.mubr.msk.bf16.vlgmr.msra.gmra.mrb[96].mxu0 %vm1606_vm1, %v10470_v33  ;;  %v10484_v47 = vadd.f32 %v4512_v31, %v4328_v15  ;;  %v10486_v52 = vadd.f32 %v8477_v55, %v4336_v45  ;;  %v4514_v40 = vpop.f32.mrb[93].mxu0  ;;  %v4555_v43 = vpop.f32.mrb[97].mxu1 }
0x13c7   : > { %8486 = vmatpush3.bf16.xpose.msra.mxu0 %v4654_v37  ;;  %8487 = vmatprep.mubr.msk.bf16.mxu0 %vm9203_vm0, %v9202_v61  ;;  %v4515_v49 = vadd.f32 %v4514_v40, %v4332_v44  ;;  %v4516_v63 = vpop.f32.mrb[94].mxu0  ;;  %v8478_v8 = vpop.f32.mrb[98].mxu1  ;;  %v4556_v36 = vadd.f32 %v4555_v43, %v4336_v45 }
0x13c8   : > { %8491 = vmatprep.subr.bf16.mxu0 %v9202_v61  ;;  %v10491_v27 = vadd.f32 %v4516_v63, %v4328_v15  ;;  %v10493_v12 = vadd.f32 %v8478_v8, %v4336_v45  ;;  %v4518_v62 = vpop.f32.mrb[95].mxu0  ;;  %v4558_v4 = vpop.f32.mrb[99].mxu1 }
0x13c9   : > { %v10496_v16 = vpack.c.bf16 %v4515_v49, %v10484_v47  ;;  %v4519_v56 = vadd.f32 %v4518_v62, %v4332_v44  ;;  %v4559_v30 = vadd.f32 %v4558_v4, %v4336_v45  ;;  %v10510_v53 = vpack.c.bf16 %v4556_v36, %v4556_v36 }
0x13cb   : > { %v10499_v28 = vpack.c.bf16 %v4519_v56, %v10491_v27  ;;  %v4696_v60 = vrot.slane %v10496_v16, 4  ;;  %v10513_v9 = vpack.c.bf16 %v4559_v30, %v4559_v30  ;;  %v4842_v14 = vsel %vm1846_vm2, %v10510_v53, 0 }
0x13cd   : > { %v4743_v25 = vrot.slane %v10499_v28, 4  ;;  %v4701_v57 = vsel %vm1606_vm1, %v4696_v60, 0  ;;  %v4888_v51 = vsel %vm1846_vm2, %v10513_v9, 0 }
0x13ce   : > { %8488 = vmatmul.mubr.msk.bf16.vlgmr.msra.gmra.mrb[100].mxu0 %vm1606_vm1, %v10473_v10 }
0x13cf   : > { %8492 = vmatpush3.bf16.xpose.msra.mxu0 %v4701_v57  ;;  %8493 = vmatprep.mubr.msk.bf16.mxu0 %vm9203_vm0, %v9202_v61  ;;  %v4748_v7 = vsel %vm1606_vm1, %v4743_v25, 0 }
0x13d0   : > { %8503 = vmatprep.subr.bf16.mxu0 %v9202_v61  ;;  %8498 = vmatpush3.bf16.xpose.msra.mxu1 %v4748_v7 }
0x13d1   : > { %8509 = vmatprep.subr.bf16.mxu1 %v9202_v61 }
0x13d6   : > { %8494 = vmatmul.mubr.msk.bf16.vlgmr.msra.gmra.mrb[104].mxu0 %vm1606_vm1, %v10496_v16 }
0x13d7   : > { %8504 = vmatpush3.bf16.msra.mxu0 %v4842_v14  ;;  %8505 = vmatprep.mubr.msk.bf16.mxu0 %vm9203_vm0, %v9202_v61 }
0x13d8   : > { %8500 = vmatmul.mubr.msk.bf16.vlgmr.msra.gmra.mrb[100].mxu1 %vm1606_vm1, %v10499_v28  ;;  %8515 = vmatprep.subr.bf16.mxu0 %v9202_v61 }
0x13d9   : > { %8510 = vmatpush3.bf16.msra.mxu1 %v4888_v51  ;;  %8511 = vmatprep.mubr.msk.bf16.mxu1 %vm9203_vm0, %v9202_v61 }
0x13da   : > { %8521 = vmatprep.subr.bf16.mxu1 %v9202_v61 }
0x1499   : > { %v4643_v3 = vpop.f32.mrb[96].mxu0 }
0x149a   : > { %v4644_v18 = vadd.f32 %v4643_v3, %v9696_v54  ;;  %v8483_v29 = vpop.f32.mrb[97].mxu0 }
0x149b   : > { %v4646_v48 = vpop.f32.mrb[98].mxu0  ;;  %v10557_v29 = vpack.c.bf16 %v10484_v47, %v10484_v47 }
0x149c   : > { %v8484_v13 = vpop.f32.mrb[99].mxu0  ;;  %v4790_v46 = vsel %vm1794_vm4, %v4644_v18, -inf  ;;  %v10561_v48 = vpack.c.bf16 %v10467_v6, %v10467_v6  ;;  %v10575_v6 = vpack.c.bf16 %v10486_v52, %v10486_v52  ;;  %v10585_v52 = vpack.c.bf16 %v10493_v12, %v10493_v12 }
0x149d   : > { %4791 = vmax.xlane.f32.xlu0 %v4790_v46 }
0x14a1   : > { %v4690_v23 = vpop.f32.mrb[100].mxu0 }
0x14a2   : > { %v4691_v11 = vadd.f32 %v4690_v23, %v9696_v54  ;;  %v8489_v21 = vpop.f32.mrb[101].mxu0 }
0x14a3   : > { %v4693_v59 = vpop.f32.mrb[102].mxu0 }
0x14a4   : > { %v8490_v32 = vpop.f32.mrb[103].mxu0  ;;  %v4793_v24 = vsel %vm1794_vm4, %v4691_v11, -inf }
0x14a5   : > { %4794 = vmax.xlane.f32.xlu1 %v4793_v24 }
0x14a9   : > { %v4737_v15 = vpop.f32.mrb[104].mxu0 }
0x14aa   : > { %v4738_v44 = vadd.f32 %v4737_v15, %v9696_v54  ;;  %v8495_v58 = vpop.f32.mrb[105].mxu0 }
0x14ab   : > { %v4784_v34 = vpop.f32.mrb[100].mxu1  ;;  %v4740_v20 = vpop.f32.mrb[106].mxu0  ;;  %v4980_v58 = vsel %vm1846_vm2, %v10585_v52, 0 }
0x14ac   : > { %v4785_v38 = vadd.f32 %v4784_v34, %v9696_v54  ;;  %v8501_v5 = vpop.f32.mrb[101].mxu1  ;;  %v8496_v42 = vpop.f32.mrb[107].mxu0  ;;  %v4796_v1 = vsel %vm1794_vm4, %v4738_v44, -inf }
0x14ad   : > { %v4787_v41 = vpop.f32.mrb[102].mxu1  ;;  %4797 = vmax.xlane.f32.xlu0 %v4796_v1 }
0x14ae   : > { %v8502_v39 = vpop.f32.mrb[103].mxu1  ;;  %v4799_v45 = vsel %vm1794_vm4, %v4785_v38, -inf }
0x14af   : > { %4800 = vmax.xlane.f32.xlu1 %v4799_v45 }
0x152a   : > { %v4792_v31 = vpop.xlane.xlu0 %4791 }
0x152b   : > { %v4802_v55 = vsub.f32 %v4644_v18, %v4792_v31  ;;  %v10549_v18 = vpack.c.bf16 %v10465_v17, %v10465_v17  ;;  %v10569_v17 = vpack.c.bf16 %v10491_v27, %v10491_v27  ;;  %v4934_v27 = vsel %vm1846_vm2, %v10575_v6, 0 }
0x152d   : > { %v4806_v37 = vmul.f32 1.442695, %v4802_v55 }
0x152f   : > { %9081 = vpow2.f32 %v4806_v37 }
0x1532   : > { %v4795_v40 = vpop.xlane.xlu1 %4794 }
0x1533   : > { %v4803_v43 = vsub.f32 %v4691_v11, %v4795_v40 }
0x1535   : > { %v4808_v49 = vmul.f32 1.442695, %v4803_v43 }
0x1537   : > { %9083 = vpow2.f32 %v4808_v49 }
0x1539   : > { %v9082_v63 = vpop.eup %9081 }
0x153a   : > { %v4798_v8 = vpop.xlane.xlu0 %4797  ;;  %v4814_v62 = vsel %vm1794_vm4, %v9082_v63, 0.0 }
0x153b   : > { %v4804_v4 = vsub.f32 %v4738_v44, %v4798_v8  ;;  %4815 = vadd.xlane.f32.xlu0 %v4814_v62 }
0x153c   : > { %v4801_v56 = vpop.xlane.xlu1 %4800 }
0x153d   : > { %v4805_v60 = vsub.f32 %v4785_v38, %v4801_v56  ;;  %v4810_v36 = vmul.f32 1.442695, %v4804_v4 }
0x153f   : > { %v4812_v25 = vmul.f32 1.442695, %v4805_v60  ;;  %9085 = vpow2.f32 %v4810_v36 }
0x1541   : > { %v9084_v57 = vpop.eup %9083  ;;  %9087 = vpow2.f32 %v4812_v25 }
0x1542   : > { %v4817_v30 = vsel %vm1794_vm4, %v9084_v57, 0.0 }
0x1543   : > { %4818 = vadd.xlane.f32.xlu1 %v4817_v30 }
0x1549   : > { %v9086_v7 = vpop.eup %9085 }
0x154a   : > { %v4820_v14 = vsel %vm1794_vm4, %v9086_v7, 0.0 }
0x154b   : > { %v9088_v51 = vpop.eup %9087  ;;  %4821 = vadd.xlane.f32.xlu0 %v4820_v14 }
0x154c   : > { %v4823_v3 = vsel %vm1794_vm4, %v9088_v51, 0.0 }
0x154d   : > { %4824 = vadd.xlane.f32.xlu1 %v4823_v3 }
0x155e   : > { %5078 = vrot.lane.b32.xlu1 %v10473_v10, %s11258_s3 }
0x1561   : > { %5026 = vrot.lane.b32.xlu0 %v10470_v33, %s11258_s3 }
0x1562   : > { %5130 = vrot.lane.b32.xlu1 %v10496_v16, %s11258_s3 }
0x1565   : > { %5030 = vrot.lane.b32.xlu0 %v10549_v18, %s11258_s3 }
0x1566   : > { %5182 = vrot.lane.b32.xlu1 %v10499_v28, %s11258_s3 }
0x1569   : > { %5134 = vrot.lane.b32.xlu0 %v10557_v29, %s11258_s3 }
0x156a   : > { %5082 = vrot.lane.b32.xlu1 %v10561_v48, %s11258_s3 }
0x156e   : > { %5186 = vrot.lane.b32.xlu1 %v10569_v17, %s11258_s3 }
0x15c8   : > { %v4816_v13 = vpop.xlane.xlu0 %4815 }
0x15c9   : > { %9089 = vrcp.f32 %v4816_v13 }
0x15d0   : > { %v4819_v47 = vpop.xlane.xlu1 %4818 }
0x15d1   : > { %9091 = vrcp.f32 %v4819_v47 }
0x15d3   : > { %v9090_v46 = vpop.eup %9089 }
0x15d4   : > { %v4830_v23 = vmul.f32 %v9090_v46, %v9082_v63 }
0x15d6   : > { %v4834_v11 = vpack.c.bf16 %v4830_v23, %v4830_v23 }
0x15d8   : > { %8506 = vmatmul.mubr.msk.bf16.vlgmr.msra.gmra.mrb[108].mxu0 %vm1794_vm4, %v4834_v11  ;;  %v4822_v21 = vpop.xlane.xlu0 %4821 }
0x15d9   : > { %8516 = vmatpush3.bf16.msra.mxu0 %v4934_v27  ;;  %9093 = vrcp.f32 %v4822_v21  ;;  %8517 = vmatprep.mubr.msk.bf16.mxu0 %vm9203_vm0, %v9202_v61 }
0x15da   : > { %v4825_v59 = vpop.xlane.xlu1 %4824  ;;  %8527 = vmatprep.subr.bf16.mxu0 %v9202_v61 }
0x15db   : > { %v9092_v32 = vpop.eup %9091  ;;  %9095 = vrcp.f32 %v4825_v59 }
0x15dc   : > { %v4831_v24 = vmul.f32 %v9092_v32, %v9084_v57  ;;  %v5027_v34 = vpop.permute.xlu0 %5026 }
0x15dd   : > { %v5028_v5 = vrot.slane %v5027_v34, 4 }
0x15de   : > { %v4835_v15 = vpack.c.bf16 %v4831_v24, %v4831_v24  ;;  %v5079_v44 = vpop.permute.xlu1 %5078 }
0x15df   : > { %v5080_v41 = vrot.slane %v5079_v44, 4  ;;  %v5036_v45 = vsel %vm1606_vm1, %v5028_v5, 0 }
0x15e0   : > { %8512 = vmatmul.mubr.msk.bf16.vlgmr.msra.gmra.mrb[104].mxu1 %vm1794_vm4, %v4835_v15  ;;  %v5031_v49 = vpop.permute.xlu0 %5030 }
0x15e1   : > { %8522 = vmatpush3.bf16.msra.mxu1 %v4980_v58  ;;  %8523 = vmatprep.mubr.msk.bf16.mxu1 %vm9203_vm0, %v9202_v61  ;;  %v5088_v55 = vsel %vm1606_vm1, %v5080_v41, 0 }
0x15e2   : > { %8533 = vmatprep.subr.bf16.mxu1 %v9202_v61  ;;  %v5131_v42 = vpop.permute.xlu1 %5130 }
0x15e3   : > { %v9094_v20 = vpop.eup %9093  ;;  %v5132_v40 = vrot.slane %v5131_v42, 4 }
0x15e4   : > { %v4832_v38 = vmul.f32 %v9094_v20, %v9086_v7  ;;  %v5135_v4 = vpop.permute.xlu0 %5134 }
0x15e5   : > { %v9096_v12 = vpop.eup %9095  ;;  %v5140_v63 = vsel %vm1606_vm1, %v5132_v40, 0 }
0x15e6   : > { %v4833_v1 = vmul.f32 %v9096_v12, %v9088_v51  ;;  %v4836_v39 = vpack.c.bf16 %v4832_v38, %v4832_v38  ;;  %v5183_v37 = vpop.permute.xlu1 %5182 }
0x15e7   : > { %v5184_v43 = vrot.slane %v5183_v37, 4 }
0x15e8   : > { %v4837_v31 = vpack.c.bf16 %v4833_v1, %v4833_v1  ;;  %8518 = vmatmul.mubr.msk.bf16.vlgmr.msra.gmra.mrb[112].mxu0 %vm1794_vm4, %v4836_v39 }
0x15e9   : > { %8528 = vmatpush3.bf16.xpose.msra.mxu0 %v5036_v45  ;;  %8529 = vmatprep.mubr.msk.bf16.mxu0 %vm9203_vm0, %v9202_v61  ;;  %v5192_v62 = vsel %vm1606_vm1, %v5184_v43, 0 }
0x15ea   : > { %8524 = vmatmul.mubr.msk.bf16.vlgmr.msra.gmra.mrb[108].mxu1 %vm1794_vm4, %v4837_v31  ;;  %8539 = vmatprep.subr.bf16.mxu0 %v9202_v61  ;;  %v5083_v8 = vpop.permute.xlu1 %5082 }
0x15eb   : > { %8534 = vmatpush3.bf16.xpose.msra.mxu1 %v5088_v55  ;;  %8535 = vmatprep.mubr.msk.bf16.mxu1 %vm9203_vm0, %v9202_v61 }
0x15ec   : > { %8545 = vmatprep.subr.bf16.mxu1 %v9202_v61 }
0x15ee   : > { %v5187_v56 = vpop.permute.xlu1 %5186 }
0x15f0   : > { %8530 = vmatmul.mubr.msk.bf16.vlgmr.msra.gmra.mrb[116].mxu0 %vm1606_vm1, %v5031_v49 }
0x15f1   : > { %8540 = vmatpush3.bf16.xpose.msra.mxu0 %v5140_v63  ;;  %8541 = vmatprep.mubr.msk.bf16.mxu0 %vm9203_vm0, %v9202_v61 }
0x15f2   : > { %8536 = vmatmul.mubr.msk.bf16.vlgmr.msra.gmra.mrb[112].mxu1 %vm1606_vm1, %v5083_v8  ;;  %8551 = vmatprep.subr.bf16.mxu0 %v9202_v61 }
0x15f3   : > { %8546 = vmatpush3.bf16.xpose.msra.mxu1 %v5192_v62  ;;  %8547 = vmatprep.mubr.msk.bf16.mxu1 %vm9203_vm0, %v9202_v61 }
0x15f4   : > { %8557 = vmatprep.subr.bf16.mxu1 %v9202_v61 }
0x15f8   : > { %8542 = vmatmul.mubr.msk.bf16.vlgmr.msra.gmra.mrb[120].mxu0 %vm1606_vm1, %v5135_v4 }
0x15f9   : > { %8553 = vmatprep.mubr.msk.bf16.mxu0 %vm9203_vm0, %v9202_v61 }
0x15fa   : > { %8548 = vmatmul.mubr.msk.bf16.vlgmr.msra.gmra.mrb[116].mxu1 %vm1606_vm1, %v5187_v56 }
0x15fb   : > { %8559 = vmatprep.mubr.msk.bf16.mxu1 %vm9203_vm0, %v9202_v61 }
0x16ab   : > { %v10619_v60 = vpop.f32.mrb[108].mxu0 }
0x16ac   : > { %v8507_v36 = vpop.f32.mrb[109].mxu0 }
0x16ad   : > { %v4881_v25 = vpop.f32.mrb[110].mxu0 }
0x16ae   : > { %v8508_v57 = vpop.f32.mrb[111].mxu0 }
0x16b3   : > { %v10621_v30 = vpop.f32.mrb[104].mxu1 }
0x16b4   : > { %v8513_v7 = vpop.f32.mrb[105].mxu1 }
0x16b5   : > { %v4927_v14 = vpop.f32.mrb[106].mxu1 }
0x16b6   : > { %v8514_v51 = vpop.f32.mrb[107].mxu1 }
0x16bb   : > { %v10623_v3 = vpop.f32.mrb[112].mxu0 }
0x16bc   : > { %v8519_v13 = vpop.f32.mrb[113].mxu0 }
0x16bd   : > { %v10625_v47 = vpop.f32.mrb[108].mxu1  ;;  %v4973_v46 = vpop.f32.mrb[114].mxu0 }
0x16be   : > { %v8525_v23 = vpop.f32.mrb[109].mxu1  ;;  %v8520_v11 = vpop.f32.mrb[115].mxu0 }
0x16bf   : > { %v5019_v27 = vpop.f32.mrb[110].mxu1 }
0x16c0   : > { %v8526_v21 = vpop.f32.mrb[111].mxu1 }
0x16c3   : > { %v5072_v59 = vpop.f32.mrb[116].mxu0 }
0x16c4   : > { %v5073_v32 = vadd.f32 %v5072_v59, %v9696_v54  ;;  %v8531_v24 = vpop.f32.mrb[117].mxu0 }
0x16c5   : > { %v5124_v15 = vpop.f32.mrb[112].mxu1  ;;  %v5075_v44 = vpop.f32.mrb[118].mxu0 }
0x16c6   : > { %v5125_v58 = vadd.f32 %v5124_v15, %v9696_v54  ;;  %v8537_v34 = vpop.f32.mrb[113].mxu1  ;;  %v8532_v20 = vpop.f32.mrb[119].mxu0  ;;  %v5234_v38 = vsel %vm1794_vm4, %v5073_v32, -inf }
0x16c7   : > { %v5127_v5 = vpop.f32.mrb[114].mxu1  ;;  %5235 = vmax.xlane.f32.xlu0 %v5234_v38 }
0x16c8   : > { %v8538_v12 = vpop.f32.mrb[115].mxu1  ;;  %v5237_v42 = vsel %vm1794_vm4, %v5125_v58, -inf }
0x16c9   : > { %5238 = vmax.xlane.f32.xlu1 %v5237_v42 }
0x16cb   : > { %v5176_v1 = vpop.f32.mrb[120].mxu0 }
0x16cc   : > { %v5177_v41 = vadd.f32 %v5176_v1, %v9696_v54  ;;  %v8543_v39 = vpop.f32.mrb[121].mxu0 }
0x16cd   : > { %v5228_v45 = vpop.f32.mrb[116].mxu1  ;;  %v5179_v31 = vpop.f32.mrb[122].mxu0 }
0x16ce   : > { %v5229_v55 = vadd.f32 %v5228_v45, %v9696_v54  ;;  %v8549_v37 = vpop.f32.mrb[117].mxu1  ;;  %v8544_v40 = vpop.f32.mrb[123].mxu0  ;;  %v5240_v43 = vsel %vm1794_vm4, %v5177_v41, -inf }
0x16cf   : > { %v5231_v49 = vpop.f32.mrb[118].mxu1  ;;  %5241 = vmax.xlane.f32.xlu0 %v5240_v43 }
0x16d0   : > { %v8550_v63 = vpop.f32.mrb[119].mxu1  ;;  %v5243_v8 = vsel %vm1794_vm4, %v5229_v55, -inf }
0x16d3   : > { %5244 = vmax.xlane.f32.xlu0 %v5243_v8 }
0x16da   : > { %5330 = vrot.lane.b32.xlu1 %v10513_v9, %s11258_s3 }
0x16de   : > { %5378 = vrot.lane.b32.xlu1 %v10575_v6, %s11258_s3 }
0x16e2   : > { %5426 = vrot.lane.b32.xlu1 %v10585_v52, %s11258_s3 }
0x16e9   : > { %5282 = vrot.lane.b32.xlu0 %v10510_v53, %s11258_s3 }
0x1754   : > { %v5236_v62 = vpop.xlane.xlu0 %5235 }
0x1755   : > { %v5246_v4 = vsub.f32 %v5073_v32, %v5236_v62 }
0x1756   : > { %v5239_v56 = vpop.xlane.xlu1 %5238 }
0x1757   : > { %v5247_v36 = vsub.f32 %v5125_v58, %v5239_v56  ;;  %v5250_v25 = vmul.f32 1.442695, %v5246_v4 }
0x1759   : > { %v5252_v57 = vmul.f32 1.442695, %v5247_v36  ;;  %9097 = vpow2.f32 %v5250_v25 }
0x175a   : > { %v5331_v7 = vpop.permute.xlu1 %5330 }
0x175b   : > { %9099 = vpow2.f32 %v5252_v57  ;;  %v5336_v14 = vsel %vm1846_vm2, %v5331_v7, 0 }
0x175c   : > { %8558 = vmatpush3.bf16.msra.mxu1 %v5336_v14  ;;  %v5242_v51 = vpop.xlane.xlu0 %5241 }
0x175d   : > { %v5248_v13 = vsub.f32 %v5177_v41, %v5242_v51  ;;  %8569 = vmatprep.subr.bf16.mxu1 %v9202_v61 }
0x175e   : > { %v5379_v5 = vpop.permute.xlu1 %5378 }
0x175f   : > { %v5254_v46 = vmul.f32 1.442695, %v5248_v13  ;;  %v5384_v40 = vsel %vm1846_vm2, %v5379_v5, 0 }
0x1760   : > { %v5245_v23 = vpop.xlane.xlu0 %5244 }
0x1761   : > { %9101 = vpow2.f32 %v5254_v46  ;;  %v5249_v58 = vsub.f32 %v5229_v55, %v5245_v23 }
0x1762   : > { %v5427_v12 = vpop.permute.xlu1 %5426 }
0x1763   : > { %v9098_v11 = vpop.eup %9097  ;;  %v5256_v34 = vmul.f32 1.442695, %v5249_v58  ;;  %v5432_v49 = vsel %vm1846_vm2, %v5427_v12, 0 }
0x1764   : > { %v5283_v27 = vpop.permute.xlu0 %5282  ;;  %v5258_v21 = vsel %vm1794_vm4, %v9098_v11, 0.0 }
0x1765   : > { %v9100_v59 = vpop.eup %9099  ;;  %v5288_v32 = vsel %vm1846_vm2, %v5283_v27, 0  ;;  %5259 = vadd.xlane.f32.xlu0 %v5258_v21  ;;  %9103 = vpow2.f32 %v5256_v34 }
0x1766   : > { %v5261_v24 = vsel %vm1794_vm4, %v9100_v59, 0.0  ;;  %8552 = vmatpush3.bf16.msra.mxu0 %v5288_v32 }
0x1767   : > { %5262 = vadd.xlane.f32.xlu1 %v5261_v24  ;;  %8563 = vmatprep.subr.bf16.mxu0 %v9202_v61 }
0x176b   : > { %v9102_v15 = vpop.eup %9101 }
0x176c   : > { %v5264_v44 = vsel %vm1794_vm4, %v9102_v15, 0.0 }
0x176d   : > { %5265 = vadd.xlane.f32.xlu0 %v5264_v44 }
0x176f   : > { %v9104_v20 = vpop.eup %9103 }
0x1770   : > { %v5267_v38 = vsel %vm1794_vm4, %v9104_v20, 0.0 }
0x1778   : > { %5529 = vrot.lane.b32.xlu1 %v10473_v10, %s11259_s26 }
0x1783   : > { %5478 = vrot.lane.b32.xlu0 %v10470_v33, %s11259_s26 }
0x1787   : > { %5580 = vrot.lane.b32.xlu0 %v10496_v16, %s11259_s26 }
0x178b   : > { %5481 = vrot.lane.b32.xlu0 %v10549_v18, %s11259_s26 }
0x178f   : > { %5583 = vrot.lane.b32.xlu0 %v10557_v29, %s11259_s26 }
0x179c   : > { %5268 = vadd.xlane.f32.xlu1 %v5267_v38 }
0x17ad   : > { %5631 = vrot.lane.b32.xlu1 %v10499_v28, %s11259_s26 }
0x17b1   : > { %5532 = vrot.lane.b32.xlu1 %v10561_v48, %s11259_s26 }
0x17b5   : > { %5634 = vrot.lane.b32.xlu1 %v10569_v17, %s11259_s26 }
0x17f2   : > { %v5260_v42 = vpop.xlane.xlu0 %5259 }
0x17f3   : > { %9105 = vrcp.f32 %v5260_v42 }
0x17f4   : > { %v5263_v1 = vpop.xlane.xlu1 %5262 }
0x17f5   : > { %9107 = vrcp.f32 %v5263_v1 }
0x17f8   : > { %v5530_v13 = vpop.permute.xlu1 %5529 }
0x17fa   : > { %v5266_v41 = vpop.xlane.xlu0 %5265 }
0x17fb   : > { %9109 = vrcp.f32 %v5266_v41 }
0x17fd   : > { %v9106_v39 = vpop.eup %9105 }
0x17fe   : > { %v5274_v45 = vmul.f32 %v9106_v39, %v9098_v11  ;;  %v5479_v63 = vpop.permute.xlu0 %5478  ;;  %v5531_v11 = vrot.slane %v5530_v13, 4 }
0x17ff   : > { %v9108_v31 = vpop.eup %9107  ;;  %v5480_v4 = vrot.slane %v5479_v63, 4 }
0x1800   : > { %v5275_v55 = vmul.f32 %v9108_v31, %v9100_v59  ;;  %v5278_v37 = vpack.c.bf16 %v5274_v45, %v5274_v45  ;;  %v5538_v59 = vsel %vm1606_vm1, %v5531_v11, 0 }
0x1801   : > { %v5487_v36 = vsel %vm1606_vm1, %v5480_v4, 0 }
0x1802   : > { %8554 = vmatmul.mubr.msk.bf16.vlgmr.msra.gmra.mrb[124].mxu0 %vm1794_vm4, %v5278_v37  ;;  %v5279_v43 = vpack.c.bf16 %v5275_v55, %v5275_v55  ;;  %v5581_v25 = vpop.permute.xlu0 %5580 }
0x1803   : > { %8564 = vmatpush3.bf16.msra.mxu0 %v5384_v40  ;;  %8565 = vmatprep.mubr.msk.bf16.mxu0 %vm9203_vm0, %v9202_v61  ;;  %v5582_v57 = vrot.slane %v5581_v25, 4 }
0x1804   : > { %8560 = vmatmul.mubr.msk.bf16.vlgmr.msra.gmra.mrb[120].mxu1 %vm1794_vm4, %v5279_v43  ;;  %8575 = vmatprep.subr.bf16.mxu0 %v9202_v61 }
0x1805   : > { %v9110_v8 = vpop.eup %9109  ;;  %8570 = vmatpush3.bf16.msra.mxu1 %v5432_v49  ;;  %8571 = vmatprep.mubr.msk.bf16.mxu1 %vm9203_vm0, %v9202_v61  ;;  %v5589_v14 = vsel %vm1606_vm1, %v5582_v57, 0 }
0x1806   : > { %v5276_v62 = vmul.f32 %v9110_v8, %v9102_v15  ;;  %8581 = vmatprep.subr.bf16.mxu1 %v9202_v61  ;;  %v5482_v7 = vpop.permute.xlu0 %5481 }
0x1808   : > { %v5280_v56 = vpack.c.bf16 %v5276_v62, %v5276_v62 }
0x180a   : > { %8566 = vmatmul.mubr.msk.bf16.vlgmr.msra.gmra.mrb[128].mxu0 %vm1794_vm4, %v5280_v56  ;;  %v5584_v51 = vpop.permute.xlu0 %5583 }
0x180b   : > { %8577 = vmatprep.mubr.msk.bf16.mxu0 %vm9203_vm0, %v9202_v61 }
0x180c   : > { %8576 = vmatpush3.bf16.xpose.msra.mxu0 %v5487_v36 }
0x180d   : > { %8587 = vmatprep.subr.bf16.mxu0 %v9202_v61 }
0x1813   : > { %8578 = vmatmul.mubr.msk.bf16.vlgmr.msra.gmra.mrb[132].mxu0 %vm1606_vm1, %v5482_v7 }
0x1814   : > { %8588 = vmatpush3.bf16.xpose.msra.mxu0 %v5589_v14  ;;  %8589 = vmatprep.mubr.msk.bf16.mxu0 %vm9203_vm0, %v9202_v61 }
0x1815   : > { %8599 = vmatprep.subr.bf16.mxu0 %v9202_v61 }
0x181b   : > { %8590 = vmatmul.mubr.msk.bf16.vlgmr.msra.gmra.mrb[136].mxu0 %vm1606_vm1, %v5584_v51 }
0x181c   : > { %8601 = vmatprep.mubr.msk.bf16.mxu0 %vm9203_vm0, %v9202_v61 }
0x1829   : > { %v5269_v46 = vpop.xlane.xlu1 %5268 }
0x182a   : > { %9111 = vrcp.f32 %v5269_v46 }
0x182d   : > { %v5632_v32 = vpop.permute.xlu1 %5631 }
0x182e   : > { %v5633_v24 = vrot.slane %v5632_v32, 4 }
0x1830   : > { %v5640_v44 = vsel %vm1606_vm1, %v5633_v24, 0 }
0x1831   : > { %v5533_v15 = vpop.permute.xlu1 %5532 }
0x1834   : > { %v9112_v23 = vpop.eup %9111 }
0x1835   : > { %v5277_v27 = vmul.f32 %v9112_v23, %v9104_v20  ;;  %v5635_v58 = vpop.permute.xlu1 %5634 }
0x1837   : > { %v5281_v21 = vpack.c.bf16 %v5277_v27, %v5277_v27 }
0x1839   : > { %8572 = vmatmul.mubr.msk.bf16.vlgmr.msra.gmra.mrb[124].mxu1 %vm1794_vm4, %v5281_v21 }
0x183a   : > { %8582 = vmatpush3.bf16.xpose.msra.mxu1 %v5538_v59  ;;  %8583 = vmatprep.mubr.msk.bf16.mxu1 %vm9203_vm0, %v9202_v61 }
0x183b   : > { %8593 = vmatprep.subr.bf16.mxu1 %v9202_v61 }
0x1841   : > { %8584 = vmatmul.mubr.msk.bf16.vlgmr.msra.gmra.mrb[128].mxu1 %vm1606_vm1, %v5533_v15 }
0x1842   : > { %8594 = vmatpush3.bf16.xpose.msra.mxu1 %v5640_v44  ;;  %8595 = vmatprep.mubr.msk.bf16.mxu1 %vm9203_vm0, %v9202_v61 }
0x1843   : > { %8605 = vmatprep.subr.bf16.mxu1 %v9202_v61 }
0x1849   : > { %8596 = vmatmul.mubr.msk.bf16.vlgmr.msra.gmra.mrb[132].mxu1 %vm1606_vm1, %v5635_v58 }
0x184a   : > { %8607 = vmatprep.mubr.msk.bf16.mxu1 %vm9203_vm0, %v9202_v61 }
0x18d5   : > { %v10703_v34 = vpop.f32.mrb[124].mxu0 }
0x18d6   : > { %v8555_v20 = vpop.f32.mrb[125].mxu0 }
0x18d7   : > { %v10705_v38 = vpop.f32.mrb[120].mxu1  ;;  %v5327_v5 = vpop.f32.mrb[126].mxu0 }
0x18d8   : > { %v8561_v12 = vpop.f32.mrb[121].mxu1  ;;  %v8556_v42 = vpop.f32.mrb[127].mxu0 }
0x18d9   : > { %v5375_v1 = vpop.f32.mrb[122].mxu1 }
0x18da   : > { %v8562_v41 = vpop.f32.mrb[123].mxu1 }
0x18dd   : > { %v10707_v39 = vpop.f32.mrb[128].mxu0 }
0x18de   : > { %v8567_v45 = vpop.f32.mrb[129].mxu0 }
0x18df   : > { %v5423_v31 = vpop.f32.mrb[130].mxu0 }
0x18e0   : > { %v8568_v55 = vpop.f32.mrb[131].mxu0 }
0x18e6   : > { %v5523_v37 = vpop.f32.mrb[132].mxu0 }
0x18e7   : > { %v5524_v40 = vadd.f32 %v5523_v37, %v9696_v54  ;;  %v8579_v43 = vpop.f32.mrb[133].mxu0 }
0x18e8   : > { %v5526_v49 = vpop.f32.mrb[134].mxu0 }
0x18e9   : > { %v8580_v63 = vpop.f32.mrb[135].mxu0  ;;  %v5682_v8 = vsel %vm1794_vm4, %v5524_v40, -inf }
0x18ea   : > { %5683 = vmax.xlane.f32.xlu0 %v5682_v8 }
0x18ee   : > { %v5625_v62 = vpop.f32.mrb[136].mxu0 }
0x18ef   : > { %v5626_v4 = vadd.f32 %v5625_v62, %v9696_v54  ;;  %v8591_v56 = vpop.f32.mrb[137].mxu0 }
0x18f0   : > { %v5628_v36 = vpop.f32.mrb[138].mxu0 }
0x18f1   : > { %v8592_v25 = vpop.f32.mrb[139].mxu0  ;;  %v5688_v57 = vsel %vm1794_vm4, %v5626_v4, -inf }
0x18f2   : > { %5689 = vmax.xlane.f32.xlu0 %v5688_v57 }
0x190c   : > { %v10713_v7 = vpop.f32.mrb[124].mxu1 }
0x190d   : > { %v8573_v14 = vpop.f32.mrb[125].mxu1 }
0x190e   : > { %v5471_v51 = vpop.f32.mrb[126].mxu1 }
0x190f   : > { %v8574_v13 = vpop.f32.mrb[127].mxu1 }
0x1914   : > { %v5574_v46 = vpop.f32.mrb[128].mxu1 }
0x1915   : > { %v5575_v23 = vadd.f32 %v5574_v46, %v9696_v54  ;;  %v8585_v11 = vpop.f32.mrb[129].mxu1 }
0x1916   : > { %v5577_v27 = vpop.f32.mrb[130].mxu1 }
0x1917   : > { %v8586_v21 = vpop.f32.mrb[131].mxu1  ;;  %v5685_v59 = vsel %vm1794_vm4, %v5575_v23, -inf }
0x1918   : > { %5686 = vmax.xlane.f32.xlu1 %v5685_v59 }
0x191c   : > { %v5676_v32 = vpop.f32.mrb[132].mxu1 }
0x191d   : > { %v5677_v24 = vadd.f32 %v5676_v32, %v9696_v54  ;;  %v8597_v15 = vpop.f32.mrb[133].mxu1 }
0x191e   : > { %v5679_v44 = vpop.f32.mrb[134].mxu1 }
0x191f   : > { %v8598_v58 = vpop.f32.mrb[135].mxu1  ;;  %v5691_v20 = vsel %vm1794_vm4, %v5677_v24, -inf }
0x1920   : > { %5692 = vmax.xlane.f32.xlu0 %v5691_v20 }
0x1929   : > { %5778 = vrot.lane.b32.xlu1 %v10513_v9, %s11259_s26 }
0x192d   : > { %5826 = vrot.lane.b32.xlu1 %v10575_v6, %s11259_s26 }
0x1931   : > { %5874 = vrot.lane.b32.xlu1 %v10585_v52, %s11259_s26 }
0x1936   : > { %5730 = vrot.lane.b32.xlu0 %v10510_v53, %s11259_s26 }
0x1977   : > { %v5684_v5 = vpop.xlane.xlu0 %5683 }
0x1978   : > { %v5694_v12 = vsub.f32 %v5524_v40, %v5684_v5 }
0x197a   : > { %v5698_v42 = vmul.f32 1.442695, %v5694_v12 }
0x197c   : > { %9113 = vpow2.f32 %v5698_v42 }
0x197f   : > { %v5690_v1 = vpop.xlane.xlu0 %5689 }
0x1980   : > { %v5696_v41 = vsub.f32 %v5626_v4, %v5690_v1 }
0x1982   : > { %v5702_v45 = vmul.f32 1.442695, %v5696_v41 }
0x1984   : > { %9115 = vpow2.f32 %v5702_v45 }
0x1986   : > { %v9114_v31 = vpop.eup %9113 }
0x1987   : > { %v5706_v55 = vsel %vm1794_vm4, %v9114_v31, 0.0 }
0x1988   : > { %5707 = vadd.xlane.f32.xlu0 %v5706_v55 }
0x198e   : > { %v9116_v37 = vpop.eup %9115 }
0x198f   : > { %v5712_v43 = vsel %vm1794_vm4, %v9116_v37, 0.0 }
0x1990   : > { %5713 = vadd.xlane.f32.xlu0 %v5712_v43 }
0x19a5   : > { %v5687_v49 = vpop.xlane.xlu1 %5686 }
0x19a6   : > { %v5695_v63 = vsub.f32 %v5575_v23, %v5687_v49  ;;  %5926 = vrot.lane.b32.xlu0 %v10470_v33, %s11260_s29 }
0x19a8   : > { %v5700_v40 = vmul.f32 1.442695, %v5695_v63 }
0x19a9   : > { %v5779_v8 = vpop.permute.xlu1 %5778 }
0x19aa   : > { %9117 = vpow2.f32 %v5700_v40  ;;  %v5784_v62 = vsel %vm1846_vm2, %v5779_v8, 0  ;;  %6028 = vrot.lane.b32.xlu0 %v10496_v16, %s11260_s29 }
0x19ab   : > { %8606 = vmatpush3.bf16.msra.mxu1 %v5784_v62 }
0x19ac   : > { %8617 = vmatprep.subr.bf16.mxu1 %v9202_v61 }
0x19ad   : > { %v5693_v4 = vpop.xlane.xlu0 %5692  ;;  %v5827_v46 = vpop.permute.xlu1 %5826 }
0x19ae   : > { %5929 = vrot.lane.b32.xlu0 %v10549_v18, %s11260_s29  ;;  %v5697_v16 = vsub.f32 %v5677_v24, %v5693_v4  ;;  %v5832_v11 = vsel %vm1846_vm2, %v5827_v46, 0 }
0x19b0   : > { %v5704_v57 = vmul.f32 1.442695, %v5697_v16 }
0x19b1   : > { %v5731_v56 = vpop.permute.xlu0 %5730  ;;  %v5875_v20 = vpop.permute.xlu1 %5874 }
0x19b2   : > { %v5736_v36 = vsel %vm1846_vm2, %v5731_v56, 0  ;;  %6031 = vrot.lane.b32.xlu0 %v10557_v29, %s11260_s29  ;;  %9119 = vpow2.f32 %v5704_v57  ;;  %v5880_v41 = vsel %vm1846_vm2, %v5875_v20, 0 }
0x19b3   : > { %8600 = vmatpush3.bf16.msra.mxu0 %v5736_v36 }
0x19b4   : > { %v9118_v33 = vpop.eup %9117  ;;  %8611 = vmatprep.subr.bf16.mxu0 %v9202_v61 }
0x19b5   : > { %v5709_v25 = vsel %vm1794_vm4, %v9118_v33, 0.0 }
0x19b6   : > { %5710 = vadd.xlane.f32.xlu1 %v5709_v25 }
0x19bc   : > { %v9120_v18 = vpop.eup %9119 }
0x19bd   : > { %v5715_v14 = vsel %vm1794_vm4, %v9120_v18, 0.0 }
0x19c7   : > { %5977 = vrot.lane.b32.xlu1 %v10473_v10, %s11260_s29 }
0x19eb   : > { %5716 = vadd.xlane.f32.xlu1 %v5715_v14 }
0x19fc   : > { %6079 = vrot.lane.b32.xlu1 %v10499_v28, %s11260_s29 }
0x1a00   : > { %5980 = vrot.lane.b32.xlu1 %v10561_v48, %s11260_s29 }
0x1a04   : > { %6082 = vrot.lane.b32.xlu1 %v10569_v17, %s11260_s29 }
0x1a15   : > { %v5708_v29 = vpop.xlane.xlu0 %5707 }
0x1a16   : > { %9121 = vrcp.f32 %v5708_v29 }
0x1a1d   : > { %v5714_v51 = vpop.xlane.xlu0 %5713 }
0x1a1e   : > { %9123 = vrcp.f32 %v5714_v51 }
0x1a20   : > { %v9122_v10 = vpop.eup %9121 }
0x1a21   : > { %v5722_v13 = vmul.f32 %v9122_v10, %v9114_v31  ;;  %v5927_v28 = vpop.permute.xlu0 %5926 }
0x1a22   : > { %v5928_v27 = vrot.slane %v5927_v28, 4 }
0x1a23   : > { %v5726_v23 = vpack.c.bf16 %v5722_v13, %v5722_v13 }
0x1a24   : > { %v5935_v59 = vsel %vm1606_vm1, %v5928_v27, 0 }
0x1a25   : > { %8602 = vmatmul.mubr.msk.bf16.vlgmr.msra.gmra.mrb[140].mxu0 %vm1794_vm4, %v5726_v23  ;;  %v6029_v32 = vpop.permute.xlu0 %6028 }
0x1a26   : > { %8612 = vmatpush3.bf16.msra.mxu0 %v5832_v11  ;;  %8613 = vmatprep.mubr.msk.bf16.mxu0 %vm9203_vm0, %v9202_v61  ;;  %v6030_v24 = vrot.slane %v6029_v32, 4 }
0x1a27   : > { %8623 = vmatprep.subr.bf16.mxu0 %v9202_v61 }
0x1a28   : > { %v9124_v48 = vpop.eup %9123  ;;  %v6037_v44 = vsel %vm1606_vm1, %v6030_v24, 0 }
0x1a29   : > { %v5724_v17 = vmul.f32 %v9124_v48, %v9116_v37  ;;  %v5930_v15 = vpop.permute.xlu0 %5929 }
0x1a2b   : > { %v5728_v21 = vpack.c.bf16 %v5724_v17, %v5724_v17 }
0x1a2d   : > { %8614 = vmatmul.mubr.msk.bf16.vlgmr.msra.gmra.mrb[144].mxu0 %vm1794_vm4, %v5728_v21  ;;  %v6032_v58 = vpop.permute.xlu0 %6031 }
0x1a2e   : > { %8625 = vmatprep.mubr.msk.bf16.mxu0 %vm9203_vm0, %v9202_v61 }
0x1a2f   : > { %8624 = vmatpush3.bf16.xpose.msra.mxu0 %v5935_v59 }
0x1a30   : > { %8635 = vmatprep.subr.bf16.mxu0 %v9202_v61 }
0x1a36   : > { %8626 = vmatmul.mubr.msk.bf16.vlgmr.msra.gmra.mrb[148].mxu0 %vm1606_vm1, %v5930_v15 }
0x1a37   : > { %8636 = vmatpush3.bf16.xpose.msra.mxu0 %v6037_v44  ;;  %8637 = vmatprep.mubr.msk.bf16.mxu0 %vm9203_vm0, %v9202_v61 }
0x1a38   : > { %8647 = vmatprep.subr.bf16.mxu0 %v9202_v61 }
0x1a3e   : > { %8638 = vmatmul.mubr.msk.bf16.vlgmr.msra.gmra.mrb[152].mxu0 %vm1606_vm1, %v6032_v58 }
0x1a3f   : > { %8649 = vmatprep.mubr.msk.bf16.mxu0 %vm9203_vm0, %v9202_v61 }
0x1a43   : > { %v5711_v5 = vpop.xlane.xlu1 %5710 }
0x1a44   : > { %9125 = vrcp.f32 %v5711_v5 }
0x1a47   : > { %v5978_v45 = vpop.permute.xlu1 %5977 }
0x1a48   : > { %v5979_v37 = vrot.slane %v5978_v45, 4 }
0x1a4a   : > { %v5986_v63 = vsel %vm1606_vm1, %v5979_v37, 0 }
0x1a4e   : > { %v9126_v12 = vpop.eup %9125 }
0x1a4f   : > { %v5723_v42 = vmul.f32 %v9126_v12, %v9118_v33 }
0x1a51   : > { %v5727_v1 = vpack.c.bf16 %v5723_v42, %v5723_v42 }
0x1a53   : > { %8608 = vmatmul.mubr.msk.bf16.vlgmr.msra.gmra.mrb[136].mxu1 %vm1794_vm4, %v5727_v1 }
0x1a54   : > { %8618 = vmatpush3.bf16.msra.mxu1 %v5880_v41  ;;  %8619 = vmatprep.mubr.msk.bf16.mxu1 %vm9203_vm0, %v9202_v61 }
0x1a55   : > { %8629 = vmatprep.subr.bf16.mxu1 %v9202_v61 }
0x1a78   : > { %v5717_v31 = vpop.xlane.xlu1 %5716 }
0x1a79   : > { %9127 = vrcp.f32 %v5717_v31 }
0x1a7c   : > { %v6080_v40 = vpop.permute.xlu1 %6079 }
0x1a7d   : > { %v6081_v8 = vrot.slane %v6080_v40, 4 }
0x1a7f   : > { %v6088_v4 = vsel %vm1606_vm1, %v6081_v8, 0 }
0x1a80   : > { %v5981_v62 = vpop.permute.xlu1 %5980 }
0x1a83   : > { %v9128_v55 = vpop.eup %9127 }
0x1a84   : > { %v5725_v43 = vmul.f32 %v9128_v55, %v9120_v18  ;;  %v6083_v56 = vpop.permute.xlu1 %6082 }
0x1a86   : > { %v5729_v49 = vpack.c.bf16 %v5725_v43, %v5725_v43 }
0x1a88   : > { %8620 = vmatmul.mubr.msk.bf16.vlgmr.msra.gmra.mrb[140].mxu1 %vm1794_vm4, %v5729_v49 }
0x1a89   : > { %8630 = vmatpush3.bf16.xpose.msra.mxu1 %v5986_v63  ;;  %8631 = vmatprep.mubr.msk.bf16.mxu1 %vm9203_vm0, %v9202_v61 }
0x1a8a   : > { %8641 = vmatprep.subr.bf16.mxu1 %v9202_v61 }
0x1a90   : > { %8632 = vmatmul.mubr.msk.bf16.vlgmr.msra.gmra.mrb[144].mxu1 %vm1606_vm1, %v5981_v62 }
0x1a91   : > { %8642 = vmatpush3.bf16.xpose.msra.mxu1 %v6088_v4  ;;  %8643 = vmatprep.mubr.msk.bf16.mxu1 %vm9203_vm0, %v9202_v61 }
0x1a92   : > { %8653 = vmatprep.subr.bf16.mxu1 %v9202_v61 }
0x1a98   : > { %8644 = vmatmul.mubr.msk.bf16.vlgmr.msra.gmra.mrb[148].mxu1 %vm1606_vm1, %v6083_v56 }
0x1a99   : > { %8655 = vmatprep.mubr.msk.bf16.mxu1 %vm9203_vm0, %v9202_v61 }
0x1af8   : > { %v10787_v36 = vpop.f32.mrb[140].mxu0 }
0x1af9   : > { %v8603_v33 = vpop.f32.mrb[141].mxu0 }
0x1afa   : > { %v5775_v25 = vpop.f32.mrb[142].mxu0 }
0x1afb   : > { %v8604_v16 = vpop.f32.mrb[143].mxu0 }
0x1b00   : > { %v5868_v57 = vpop.f32.mrb[144].mxu0 }
0x1b01   : > { %v8615_v18 = vpop.f32.mrb[145].mxu0 }
0x1b02   : > { %v5871_v14 = vpop.f32.mrb[146].mxu0 }
0x1b03   : > { %v8616_v29 = vpop.f32.mrb[147].mxu0 }
0x1b09   : > { %v5971_v51 = vpop.f32.mrb[148].mxu0 }
0x1b0a   : > { %v5972_v10 = vadd.f32 %v5971_v51, %v9696_v54  ;;  %v8627_v13 = vpop.f32.mrb[149].mxu0  ;;  %v5474_v51 = vpack.c.bf16 %v10703_v34, %v10703_v34 }
0x1b0b   : > { %v5974_v46 = vpop.f32.mrb[150].mxu0  ;;  %v5922_v13 = vpack.c.bf16 %v10787_v36, %v10787_v36 }
0x1b0c   : > { %v8628_v23 = vpop.f32.mrb[151].mxu0  ;;  %v6130_v11 = vsel %vm1794_vm4, %v5972_v10, -inf  ;;  %v5924_v46 = vpack.c.bf16 %v5868_v57, %v5868_v57 }
0x1b0d   : > { %6131 = vmax.xlane.f32.xlu0 %v6130_v11 }
0x1b11   : > { %v6073_v28 = vpop.f32.mrb[152].mxu0 }
0x1b12   : > { %v6074_v48 = vadd.f32 %v6073_v28, %v9696_v54  ;;  %v8639_v17 = vpop.f32.mrb[153].mxu0 }
0x1b13   : > { %v6076_v27 = vpop.f32.mrb[154].mxu0 }
0x1b14   : > { %v8640_v21 = vpop.f32.mrb[155].mxu0  ;;  %v6136_v59 = vsel %vm1794_vm4, %v6074_v48, -inf }
0x1b15   : > { %6137 = vmax.xlane.f32.xlu0 %v6136_v59 }
0x1b26   : > { %v10793_v32 = vpop.f32.mrb[136].mxu1 }
0x1b27   : > { %v8609_v24 = vpop.f32.mrb[137].mxu1 }
0x1b28   : > { %v5823_v15 = vpop.f32.mrb[138].mxu1 }
0x1b29   : > { %v8610_v44 = vpop.f32.mrb[139].mxu1 }
0x1b5b   : > { %v10795_v58 = vpop.f32.mrb[140].mxu1 }
0x1b5c   : > { %v8621_v20 = vpop.f32.mrb[141].mxu1 }
0x1b5d   : > { %v5919_v5 = vpop.f32.mrb[142].mxu1  ;;  %v5024_v20 = vpack.c.bf16 %v10623_v3, %v10623_v3  ;;  %v5923_v3 = vpack.c.bf16 %v10793_v32, %v10793_v32 }
0x1b5e   : > { %v8622_v12 = vpop.f32.mrb[143].mxu1 }
0x1b63   : > { %v6022_v42 = vpop.f32.mrb[144].mxu1 }
0x1b64   : > { %v6023_v1 = vadd.f32 %v6022_v42, %v9696_v54  ;;  %v8633_v41 = vpop.f32.mrb[145].mxu1  ;;  %v5475_v42 = vpack.c.bf16 %v10705_v38, %v10705_v38 }
0x1b65   : > { %v6025_v45 = vpop.f32.mrb[146].mxu1  ;;  %v5925_v41 = vpack.c.bf16 %v10795_v58, %v10795_v58 }
0x1b66   : > { %v8634_v31 = vpop.f32.mrb[147].mxu1  ;;  %v6133_v55 = vsel %vm1794_vm4, %v6023_v1, -inf }
0x1b67   : > { %6134 = vmax.xlane.f32.xlu1 %v6133_v55 }
0x1b6b   : > { %v6124_v37 = vpop.f32.mrb[148].mxu1 }
0x1b6c   : > { %v6125_v43 = vadd.f32 %v6124_v37, %v9696_v54  ;;  %v8645_v49 = vpop.f32.mrb[149].mxu1 }
0x1b6d   : > { %v6127_v63 = vpop.f32.mrb[150].mxu1 }
0x1b6e   : > { %v8646_v40 = vpop.f32.mrb[151].mxu1  ;;  %v6139_v8 = vsel %vm1794_vm4, %v6125_v43, -inf }
0x1b6f   : > { %6140 = vmax.xlane.f32.xlu0 %v6139_v8 }
0x1b9a   : > { %v6132_v62 = vpop.xlane.xlu0 %6131 }
0x1b9b   : > { %v6142_v4 = vsub.f32 %v5972_v10, %v6132_v62  ;;  %v5476_v10 = vpack.c.bf16 %v10707_v39, %v10707_v39 }
0x1b9d   : > { %v6146_v56 = vmul.f32 1.442695, %v6142_v4 }
0x1b9f   : > { %9129 = vpow2.f32 %v6146_v56  ;;  %v5025_v56 = vpack.c.bf16 %v10625_v47, %v10625_v47  ;;  %v8905_v47 = vld [vmem:[%s11228_s7 + $0x40] sm:$0xff]  }
0x1ba2   : > { %v6138_v33 = vpop.xlane.xlu0 %6137 }
0x1ba3   : > { %v6144_v25 = vsub.f32 %v6074_v48, %v6138_v33 }
0x1ba5   : > { %v6150_v16 = vmul.f32 1.442695, %v6144_v25 }
0x1ba7   : > { %9131 = vpow2.f32 %v6150_v16 }
0x1ba9   : > { %v9130_v18 = vpop.eup %9129 }
0x1baa   : > { %v6154_v14 = vsel %vm1794_vm4, %v9130_v18, 0.0 }
0x1bab   : > { %6155 = vadd.xlane.f32.xlu0 %v6154_v14 }
0x1bb1   : > { %v9132_v29 = vpop.eup %9131 }
0x1bb2   : > { %v6160_v54 = vsel %vm1794_vm4, %v9132_v29, 0.0 }
0x1bb3   : > { %6161 = vadd.xlane.f32.xlu0 %v6160_v54 }
0x1bc9   : > { %6178 = vrot.lane.b32.xlu0 %v10510_v53, %s11260_s29 }
0x1bcd   : > { %6378 = vrot.lane.b32.xlu0 %v5474_v51, %s11260_s29 }
0x1bd1   : > { %6382 = vrot.lane.b32.xlu0 %v5476_v10, %s11260_s29  ;;  %v8906_v10 = vld [vmem:[%s11228_s7 + $0x48] sm:$0xff]  }
0x1bd5   : > { %6390 = vrot.lane.b32.xlu0 %v5922_v13, %s11259_s26 }
0x1bd9   : > { %6394 = vrot.lane.b32.xlu0 %v5924_v46, %s11259_s26  ;;  %v8907_v46 = vld [vmem:[%s11228_s7 + $0x50] sm:$0xff]  }
0x1bf4   : > { %v6135_v23 = vpop.xlane.xlu1 %6134 }
0x1bf5   : > { %v6143_v53 = vsub.f32 %v6023_v1, %v6135_v23  ;;  %v5477_v1 = vpack.c.bf16 %v10713_v7, %v10713_v7 }
0x1bf7   : > { %v6148_v11 = vmul.f32 1.442695, %v6143_v53 }
0x1bf9   : > { %9133 = vpow2.f32 %v6148_v11 }
0x1bfc   : > { %v6141_v39 = vpop.xlane.xlu0 %6140 }
0x1bfd   : > { %v6145_v36 = vsub.f32 %v6125_v43, %v6141_v39 }
0x1bff   : > { %v6152_v48 = vmul.f32 1.442695, %v6145_v36 }
0x1c01   : > { %9135 = vpow2.f32 %v6152_v48  ;;  %v8908_v48 = vld [vmem:[%s11228_s7 + $0x58] sm:$0xff]  }
0x1c03   : > { %v9134_v34 = vpop.eup %9133 }
0x1c04   : > { %v6157_v28 = vsel %vm1794_vm4, %v9134_v34, 0.0 }
0x1c05   : > { %6158 = vadd.xlane.f32.xlu1 %v6157_v28 }
0x1c0b   : > { %v9136_v17 = vpop.eup %9135 }
0x1c0c   : > { %v6163_v27 = vsel %vm1794_vm4, %v9136_v17, 0.0 }
0x1c16   : > { %6226 = vrot.lane.b32.xlu1 %v10513_v9, %s11260_s29 }
0x1c1a   : > { %6274 = vrot.lane.b32.xlu1 %v10575_v6, %s11260_s29 }
0x1c38   : > { %v6156_v57 = vpop.xlane.xlu0 %6155 }
0x1c39   : > { %9137 = vrcp.f32 %v6156_v57 }
0x1c3e   : > { %6164 = vadd.xlane.f32.xlu1 %v6163_v27  ;;  %v8909_v27 = vld [vmem:[%s11228_s7 + $0x60] sm:$0xff]  }
0x1c40   : > { %v6162_v21 = vpop.xlane.xlu0 %6161 }
0x1c41   : > { %9139 = vrcp.f32 %v6162_v21  ;;  %v8910_v21 = vld [vmem:[%s11228_s7 + $0x68] sm:$0xff]  }
0x1c43   : > { %v9138_v59 = vpop.eup %9137 }
0x1c44   : > { %v6170_v24 = vmul.f32 %v9138_v59, %v9130_v18  ;;  %v6179_v15 = vpop.permute.xlu0 %6178  ;;  %v8911_v59 = vld [vmem:[%s11228_s7 + $0x70] sm:$0xff]  }
0x1c45   : > { %v6184_v44 = vsel %vm1846_vm2, %v6179_v15, 0 }
0x1c46   : > { %8648 = vmatpush3.bf16.msra.mxu0 %v6184_v44  ;;  %v6174_v9 = vpack.c.bf16 %v6170_v24, %v6170_v24  ;;  %v8912_v24 = vld [vmem:[%s11228_s7 + $0x78] sm:$0xff]  }
0x1c47   : > { %8659 = vmatprep.subr.bf16.mxu0 %v9202_v61 }
0x1c48   : > { %v10823_v6 = vpop.permute.xlu0 %6378 }
0x1c49   : > { %8650 = vmatmul.mubr.msk.bf16.vlgmr.msra.gmra.mrb[156].mxu0 %vm1794_vm4, %v6174_v9 }
0x1c4a   : > { %8661 = vmatprep.mubr.msk.bf16.mxu0 %vm9203_vm0, %v9202_v61 }
0x1c4b   : > { %v9140_v38 = vpop.eup %9139 }
0x1c4c   : > { %v6383_v5 = vpop.permute.xlu0 %6382  ;;  %v6172_v7 = vmul.f32 %v9140_v38, %v9132_v29  ;;  %v5023_v38 = vpack.c.bf16 %v10621_v30, %v10621_v30 }
0x1c4d   : > { %v10831_v12 = vsel %vm1606_vm1, %v5024_v20, %v6383_v5 }
0x1c4e   : > { %v6176_v43 = vpack.c.bf16 %v6172_v7, %v6172_v7 }
0x1c4f   : > { %6322 = vrot.lane.b32.xlu1 %v10585_v52, %s11260_s29 }
0x1c53   : > { %6380 = vrot.lane.b32.xlu1 %v5475_v42, %s11260_s29  ;;  %v6391_v42 = vpop.permute.xlu0 %6390 }
0x1c57   : > { %6384 = vrot.lane.b32.xlu1 %v5477_v1, %s11260_s29 }
0x1c5b   : > { %6392 = vrot.lane.b32.xlu1 %v5923_v3, %s11259_s26  ;;  %v6395_v3 = vpop.permute.xlu0 %6394 }
0x1c5c   : > { %v6427_v30 = vsel %vm3428_vm5, %v10831_v12, %v6395_v3  ;;  %v8933_v3 = vld [vmem:[%s11232_s11 + $0xe4] ss:$8 sps:$4 sm:$0xff]  }
0x1c5f   : > { %6396 = vrot.lane.b32.xlu1 %v5925_v41, %s11259_s26 }
0x1c92   : > { %v6159_v52 = vpop.xlane.xlu1 %6158 }
0x1c93   : > { %9141 = vrcp.f32 %v6159_v52  ;;  %v5022_v52 = vpack.c.bf16 %v10619_v60, %v10619_v60 }
0x1c96   : > { %v6227_v45 = vpop.permute.xlu1 %6226 }
0x1c97   : > { %v6232_v31 = vsel %vm1846_vm2, %v6227_v45, 0 }
0x1c98   : > { %8654 = vmatpush3.bf16.msra.mxu1 %v6232_v31  ;;  %v6412_v31 = vsel %vm1606_vm1, %v5022_v52, %v10823_v6  ;;  %v8936_v52 = vld [vmem:[%s11232_s11 + $0xf4] ss:$8 sps:$4 sm:$0xff]  }
0x1c99   : > { %8665 = vmatprep.subr.bf16.mxu1 %v9202_v61 }
0x1c9a   : > { %v6275_v55 = vpop.permute.xlu1 %6274 }
0x1c9b   : > { %v6280_v32 = vsel %vm1846_vm2, %v6275_v55, 0  ;;  %v6423_v55 = vsel %vm3428_vm5, %v6412_v31, %v6391_v42  ;;  %v8928_v42 = vld [vmem:[%s11232_s11 + $0xd0] ss:$8 sps:$4 sm:$0xff]  }
0x1c9c   : > { %8660 = vmatpush3.bf16.msra.mxu0 %v6280_v32 }
0x1c9d   : > { %v9142_v37 = vpop.eup %9141  ;;  %8671 = vmatprep.subr.bf16.mxu0 %v8905_v47 }
0x1c9e   : > { %v6171_v58 = vmul.f32 %v9142_v37, %v9134_v34 }
0x1c9f   : > { %8662 = vmatmul.mubr.msk.bf16.vlgmr.msra.gmra.mrb[160].mxu0 %vm1794_vm4, %v6176_v43 }
0x1ca0   : > { %v6175_v49 = vpack.c.bf16 %v6171_v58, %v6171_v58  ;;  %8672 = vmatpush3.bf16.msra.mxu0 %v8905_v47 }
0x1ca1   : > { %8673 = vmatprep.subr.bf16.mxu0 %v8906_v10 }
0x1ca2   : > { %8656 = vmatmul.mubr.msk.bf16.vlgmr.msra.gmra.mrb[152].mxu1 %vm1794_vm4, %v6175_v49 }
0x1ca3   : > { %8667 = vmatprep.mubr.msk.bf16.mxu1 %vm9203_vm0, %v9202_v61 }
0x1ca4   : > { %8674 = vmatpush3.bf16.msra.mxu0 %v8906_v10 }
0x1ca5   : > { %8675 = vmatprep.subr.bf16.mxu0 %v8907_v46 }
0x1ca8   : > { %8676 = vmatpush3.bf16.msra.mxu0 %v8907_v46 }
0x1ca9   : > { %8677 = vmatprep.subr.bf16.mxu0 %v8908_v48 }
0x1cac   : > { %8678 = vmatpush3.bf16.msra.mxu0 %v8908_v48 }
0x1cad   : > { %8679 = vmatprep.subr.bf16.mxu0 %v8909_v27 }
0x1cb0   : > { %8680 = vmatpush3.bf16.msra.mxu0 %v8909_v27 }
0x1cb1   : > { %8681 = vmatprep.subr.bf16.mxu0 %v8910_v21 }
0x1cb4   : > { %8682 = vmatpush3.bf16.msra.mxu0 %v8910_v21 }
0x1cb5   : > { %8683 = vmatprep.subr.bf16.mxu0 %v8911_v59 }
0x1cb8   : > { %8684 = vmatpush3.bf16.msra.mxu0 %v8911_v59 }
0x1cb9   : > { %8685 = vmatprep.subr.bf16.mxu0 %v8912_v24 }
0x1cbc   : > { %8686 = vmatpush3.bf16.msra.mxu0 %v8912_v24  ;;  %v8921_v24 = vld [vmem:[%s11232_s11 + $0xa4] ss:$8 sps:$4 sm:$0xff]  }
0x1ccb   : > { %v6165_v63 = vpop.xlane.xlu1 %6164 }
0x1ccc   : > { %9143 = vrcp.f32 %v6165_v63 }
0x1ccf   : > { %v6323_v40 = vpop.permute.xlu1 %6322 }
0x1cd0   : > { %v6328_v8 = vsel %vm1846_vm2, %v6323_v40, 0 }
0x1cd1   : > { %8666 = vmatpush3.bf16.msra.mxu1 %v6328_v8 }
0x1cd3   : > { %v10855_v62 = vpop.permute.xlu1 %6380 }
0x1cd4   : > { %v6415_v7 = vsel %vm1606_vm1, %v5023_v38, %v10855_v62  ;;  %v8934_v38 = vld [vmem:[%s11232_s11 + $0xf0] ss:$8 sps:$4 sm:$0xff]  }
0x1cd6   : > { %v9144_v4 = vpop.eup %9143 }
0x1cd7   : > { %v6173_v33 = vmul.f32 %v9144_v4, %v9136_v17  ;;  %v6385_v25 = vpop.permute.xlu1 %6384  ;;  %v7774_v4 = vld [vmem:[%s11229_s8 + $0x1] ss:$0 sm:$0xff] }
0x1cd8   : > { %v10860_v16 = vsel %vm1606_vm1, %v5025_v56, %v6385_v25 }
0x1cd9   : > { %v6177_v18 = vpack.c.bf16 %v6173_v33, %v6173_v33 }
0x1cdb   : > { %8668 = vmatmul.mubr.msk.bf16.vlgmr.msra.gmra.mrb[156].mxu1 %vm1794_vm4, %v6177_v18  ;;  %v6393_v1 = vpop.permute.xlu1 %6392 }
0x1cdc   : > { %6788 = vmatprep.mubr.bf16.mxu1 %v9201_v22  ;;  %v6425_v32 = vsel %vm3428_vm5, %v6415_v7, %v6393_v1  ;;  %v8930_v1 = vld [vmem:[%s11232_s11 + $0xd4] ss:$8 sps:$4 sm:$0xff]  }
0x1cdf   : > { %v6397_v41 = vpop.permute.xlu1 %6396 }
0x1ce0   : > { %v6429_v6 = vsel %vm3428_vm5, %v10860_v16, %v6397_v41  ;;  %v8931_v41 = vld [vmem:[%s11232_s11 + $0xe0] ss:$8 sps:$4 sm:$0xff]  }
0x1d1c   : > { %v6220_v61 = vpop.f32.mrb[156].mxu0 }
0x1d1d   : > { %v6370_v14 = vpack.c.bf16 %v6220_v61, %v6220_v61  ;;  %v8651_v29 = vpop.f32.mrb[157].mxu0 }
0x1d1e   : > { %v6223_v54 = vpop.f32.mrb[158].mxu0 }
0x1d1f   : > { %6402 = vrot.lane.b32.xlu0 %v6370_v14, %s11258_s3  ;;  %v8652_v51 = vpop.f32.mrb[159].mxu0 }
0x1d72   : > { %v6316_v13 = vpop.f32.mrb[160].mxu0 }
0x1d73   : > { %v6372_v23 = vpack.c.bf16 %v6316_v13, %v6316_v13  ;;  %v8663_v53 = vpop.f32.mrb[161].mxu0 }
0x1d74   : > { %v6319_v11 = vpop.f32.mrb[162].mxu0 }
0x1d75   : > { %v6268_v34 = vpop.f32.mrb[152].mxu1  ;;  %6406 = vrot.lane.b32.xlu0 %v6372_v23, %s11258_s3  ;;  %v8664_v28 = vpop.f32.mrb[163].mxu0 }
0x1d76   : > { %v6371_v39 = vpack.c.bf16 %v6268_v34, %v6268_v34  ;;  %v8657_v36 = vpop.f32.mrb[153].mxu1 }
0x1d77   : > { %v6271_v57 = vpop.f32.mrb[154].mxu1 }
0x1d78   : > { %v8658_v17 = vpop.f32.mrb[155].mxu1  ;;  %6404 = vrot.lane.b32.xlu1 %v6371_v39, %s11258_s3 }
0x1d91   : > { %v6403_v45 = vpop.permute.xlu0 %6402 }
0x1d92   : > { %v6431_v43 = vsel %vm3437_vm6, %v6423_v55, %v6403_v45 }
0x1dae   : > { %v6364_v15 = vpop.f32.mrb[156].mxu1 }
0x1daf   : > { %v6373_v44 = vpack.c.bf16 %v6364_v15, %v6364_v15  ;;  %v8669_v9 = vpop.f32.mrb[157].mxu1  ;;  %v8919_v15 = vld [vmem:[%s11232_s11 + $0xa0] ss:$8 sps:$4 sm:$0xff]  }
0x1db0   : > { %v6367_v20 = vpop.f32.mrb[158].mxu1  ;;  %v8922_v9 = vld [vmem:[%s11232_s11 + $0xb0] ss:$8 sps:$4 sm:$0xff]  }
0x1db1   : > { %6408 = vrot.lane.b32.xlu1 %v6373_v44, %s11258_s3  ;;  %v8670_v5 = vpop.f32.mrb[159].mxu1  ;;  %v8924_v44 = vld [vmem:[%s11232_s11 + $0xb4] ss:$8 sps:$4 sm:$0xff]   ;;  %v8927_v20 = vld [vmem:[%s11232_s11 + $0xc4] ss:$8 sps:$4 sm:$0xff]  }
0x1db2   : > { %v8925_v5 = vld [vmem:[%s11232_s11 + $0xc0] ss:$8 sps:$4 sm:$0xff]  }
0x1de7   : > { %v6407_v49 = vpop.permute.xlu0 %6406 }
0x1de8   : > { %v6435_v40 = vsel %vm3437_vm6, %v6427_v30, %v6407_v49 }
0x1dea   : > { %v6405_v37 = vpop.permute.xlu1 %6404 }
0x1deb   : > { %v6433_v58 = vsel %vm3437_vm6, %v6425_v32, %v6405_v37 }
0x1dec   : > { %v7775_v60 = vcombine.low %v6431_v43, %v6433_v58 }
0x1dee   : > { %8687 = vmatprep.mubr.bf16.mxu0 %v7775_v60 }
0x1e23   : > { %v6409_v63 = vpop.permute.xlu1 %6408 }
0x1e24   : > { %v6437_v8 = vsel %vm3437_vm6, %v6429_v6, %v6409_v63 }
0x1e25   : > { %v7776_v62 = vcombine.low %v6435_v40, %v6437_v8  ;;  %v7787_v40 = vld [vmem:[%s11230_s9 + $0x1] ss:$0 sm:$0xff] }
0x1e27   : > { %8688 = vmatmul.mubr.bf16.vlgmr.msra.gmra.mrb[164].mxu0 %v7776_v62 }
0x1efa   : > { %v8689_v56 = vpop.f32.mrb[164].mxu0 }
0x1efb   : > { %v6557_v33 = vpop.f32.mrb[165].mxu0  ;;  %v6566_v12 = vadd.f32 %v8689_v56, %v7774_v4 }
0x1efc   : > { %v6558_v25 = vadd.f32 %v7774_v4, %v6557_v33  ;;  %v8690_v18 = vpop.f32.mrb[166].mxu0 }
0x1efd   : > { %v6560_v61 = vpop.f32.mrb[167].mxu0  ;;  %v10921_v54 = vadd.f32 %v6566_v12, %v10344_v19  ;;  %v6569_v51 = vadd.f32 %v8690_v18, %v7774_v4  ;;  %v8918_v19 = vld [vmem:[%s11232_s11 + $0x94] ss:$8 sps:$4 sm:$0xff]  }
0x1efe   : > { %v10914_v14 = vadd.f32 %v6558_v25, %v10336_v35  ;;  %v6561_v16 = vadd.f32 %v7774_v4, %v6560_v61  ;;  %v8913_v35 = vld [vmem:[%s11232_s11 + $0x80] ss:$8 sps:$4 sm:$0xff]  }
0x1eff   : > { %v10926_v47 = vadd.f32 %v6569_v51, %v10348_v50  ;;  %v8916_v50 = vld [vmem:[%s11232_s11 + $0x90] ss:$8 sps:$4 sm:$0xff]   ;;  %v7788_v25 = vld [vmem:[%s11231_s10 + $0x1] ss:$0 sm:$0xff] }
0x1f00   : > { %v10917_v29 = vadd.f32 %v6561_v16, %v10340_v26  ;;  %6580 = vadd.xlane.f32.xlu0 %v10914_v14  ;;  %v8915_v26 = vld [vmem:[%s11232_s11 + $0x84] ss:$8 sps:$4 sm:$0xff]  }
0x1f01   : > { %6756 = vmatprep.subr.bf16.mxu1 %v8915_v26 }
0x1f02   : > { %6582 = vadd.xlane.f32.xlu1 %v10917_v29  ;;  %6757 = vmatpush1.bf16.msra.mxu1 %v8913_v35 }
0x1f03   : > { %6758 = vmatprep.subr.bf16.mxu1 %v8918_v19 }
0x1f04   : > { %6584 = vadd.xlane.f32.xlu0 %v10921_v54 }
0x1f06   : > { %6759 = vmatpush1.bf16.msra.mxu1 %v8916_v50 }
0x1f07   : > { %6760 = vmatprep.subr.bf16.mxu1 %v8921_v24  ;;  %v8951_v24 = vld [vmem:[%s11234_s13 + $0xf8] sm:$0xff]  }
0x1f08   : > { %6586 = vadd.xlane.f32.xlu0 %v10926_v47 }
0x1f0a   : > { %6761 = vmatpush1.bf16.msra.mxu1 %v8919_v15  ;;  %v8952_v15 = vld [vmem:[%s11234_s13 + $0xb8] sm:$0xff]  }
0x1f0b   : > { %6762 = vmatprep.subr.bf16.mxu1 %v8924_v44  ;;  %v7805_v44 = vld [vmem:[%s11233_s12 + $0x2] sm:$0x3] }
0x1f0e   : > { %6763 = vmatpush1.bf16.msra.mxu1 %v8922_v9  ;;  %v6669_v9 = vrot.slane %v7805_v44, %v9620_v0 }
0x1f0f   : > { %6764 = vmatprep.subr.bf16.mxu1 %v8927_v20  ;;  %v6673_v20 = vrot.slane %v7805_v44, %v9626_v2 }
0x1f12   : > { %6765 = vmatpush1.bf16.msra.mxu1 %v8925_v5 }
0x1f13   : > { %6766 = vmatprep.subr.bf16.mxu1 %v8930_v1 }
0x1f16   : > { %6767 = vmatpush1.bf16.msra.mxu1 %v8928_v42 }
0x1f17   : > { %6768 = vmatprep.subr.bf16.mxu1 %v8933_v3 }
0x1f1a   : > { %6769 = vmatpush1.bf16.msra.mxu1 %v8931_v41 }
0x1f1b   : > { %6770 = vmatprep.subr.bf16.mxu1 %v8936_v52 }
0x1f1e   : > { %6771 = vmatpush1.bf16.msra.mxu1 %v8934_v38 }
0x1f8d   : > { %v6581_v10 = vpop.xlane.xlu0 %6580 }
0x1f8e   : > { %v6588_v13 = vmul.f32 0.0078125, %v6581_v10 }
0x1f8f   : > { %v6583_v46 = vpop.xlane.xlu1 %6582 }
0x1f90   : > { %v6592_v23 = vsub.f32 %v10914_v14, %v6588_v13  ;;  %v6589_v53 = vmul.f32 0.0078125, %v6583_v46 }
0x1f91   : > { %v6585_v11 = vpop.xlane.xlu0 %6584 }
0x1f92   : > { %v6593_v34 = vsub.f32 %v10917_v29, %v6589_v53  ;;  %v6590_v28 = vmul.f32 0.0078125, %v6585_v11  ;;  %v6596_v39 = vmul.f32 %v6592_v23, %v6592_v23  ;;  %v8938_v53 = vld [vmem:[%s11234_s13 + $0x80] sm:$0xff]   ;;  %v8939_v11 = vld [vmem:[%s11234_s13 + $0xc8] sm:$0xff]  }
0x1f94   : > { %v6594_v36 = vsub.f32 %v10921_v54, %v6590_v28  ;;  %6600 = vadd.xlane.f32.xlu0 %v6596_v39  ;;  %v6597_v48 = vmul.f32 %v6593_v34, %v6593_v34  ;;  %v8942_v28 = vld [vmem:[%s11234_s13 + $0x90] sm:$0xff]   ;;  %v8943_v39 = vld [vmem:[%s11234_s13 + $0xd8] sm:$0xff]  }
0x1f95   : > { %v6587_v57 = vpop.xlane.xlu0 %6586 }
0x1f96   : > { %v6591_v17 = vmul.f32 0.0078125, %v6587_v57  ;;  %6602 = vadd.xlane.f32.xlu1 %v6597_v48  ;;  %v6598_v27 = vmul.f32 %v6594_v36, %v6594_v36  ;;  %v8945_v48 = vld [vmem:[%s11234_s13 + $0xe0] sm:$0xff]  }
0x1f97   : > { %v8946_v57 = vld [vmem:[%s11234_s13 + $0xa0] sm:$0xff]  }
0x1f98   : > { %v6595_v21 = vsub.f32 %v10926_v47, %v6591_v17  ;;  %6604 = vadd.xlane.f32.xlu0 %v6598_v27  ;;  %v8947_v17 = vld [vmem:[%s11234_s13 + $0xe8] sm:$0xff]  }
0x1f99   : > { %v8948_v27 = vld [vmem:[%s11234_s13 + $0xa8] sm:$0xff]  }
0x1f9a   : > { %v6599_v59 = vmul.f32 %v6595_v21, %v6595_v21 }
0x1f9c   : > { %6606 = vadd.xlane.f32.xlu1 %v6599_v59  ;;  %v8950_v59 = vld [vmem:[%s11234_s13 + $0xb0] sm:$0xff]  }
0x2021   : > { %v6601_v45 = vpop.xlane.xlu0 %6600 }
0x2022   : > { %v6608_v31 = vmul.f32 0.0078125, %v6601_v45 }
0x2023   : > { %v6603_v7 = vpop.xlane.xlu1 %6602 }
0x2024   : > { %v6612_v55 = vadd.f32 1e-12, %v6608_v31  ;;  %v6609_v32 = vmul.f32 0.0078125, %v6603_v7 }
0x2025   : > { %v6605_v37 = vpop.xlane.xlu0 %6604 }
0x2026   : > { %9145 = vrsqrt.f32 %v6612_v55  ;;  %v6613_v43 = vadd.f32 1e-12, %v6609_v32  ;;  %v6610_v58 = vmul.f32 0.0078125, %v6605_v37 }
0x2028   : > { %9147 = vrsqrt.f32 %v6613_v43  ;;  %v6614_v60 = vadd.f32 1e-12, %v6610_v58 }
0x2029   : > { %v6607_v49 = vpop.xlane.xlu1 %6606 }
0x202a   : > { %9149 = vrsqrt.f32 %v6614_v60  ;;  %v6611_v30 = vmul.f32 0.0078125, %v6607_v49 }
0x202c   : > { %v6615_v6 = vadd.f32 1e-12, %v6611_v30 }
0x202e   : > { %9151 = vrsqrt.f32 %v6615_v6 }
0x2030   : > { %v9146_v63 = vpop.eup %9145 }
0x2031   : > { %v6620_v8 = vmul.f32 %v9146_v63, %v6592_v23  ;;  %v8937_v23 = vld [vmem:[%s11234_s13 + $0xc0] sm:$0xff]  }
0x2032   : > { %v9148_v62 = vpop.eup %9147  ;;  %8189 = vmatprep.subr.bf16.mxu0 %v8937_v23 }
0x2033   : > { %v6621_v4 = vmul.f32 %v9148_v62, %v6593_v34  ;;  %v6630_v56 = vmul.f32 %v7787_v40, %v6620_v8  ;;  %8190 = vmatpush3.bf16.msra.mxu0 %v8938_v53  ;;  %v8941_v34 = vld [vmem:[%s11234_s13 + $0xd0] sm:$0xff]  }
0x2034   : > { %v9150_v33 = vpop.eup %9149  ;;  %8191 = vmatprep.subr.bf16.mxu0 %v8939_v11 }
0x2035   : > { %v6631_v18 = vmul.f32 %v7787_v40, %v6621_v4  ;;  %v6640_v61 = vadd.f32 %v7788_v25, %v6630_v56  ;;  %v6622_v16 = vmul.f32 %v9150_v33, %v6594_v36  ;;  %v8944_v36 = vld [vmem:[%s11234_s13 + $0x98] sm:$0xff]  }
0x2037   : > { %v6641_v12 = vadd.f32 %v7788_v25, %v6631_v18  ;;  %v6632_v19 = vmul.f32 %v7787_v40, %v6622_v16 }
0x2038   : > { %v9152_v51 = vpop.eup %9151 }
0x2039   : > { %v6644_v35 = vpack.c.bf16 %v6641_v12, %v6640_v61  ;;  %v6623_v26 = vmul.f32 %v9152_v51, %v6595_v21  ;;  %v6642_v13 = vadd.f32 %v7788_v25, %v6632_v19  ;;  %v8949_v21 = vld [vmem:[%s11234_s13 + $0xf0] sm:$0xff]  }
0x203b   : > { %6789 = vmatmul.mubr.bf16.vlgmr.msra.gmra.mrb[160].mxu1 %v6644_v35  ;;  %v6633_v50 = vmul.f32 %v7787_v40, %v6623_v26 }
0x203c   : > { %6798 = vmatprep.mubr.bf16.mxu1 %v9201_v22  ;;  %v8940_v22 = vld [vmem:[%s11234_s13 + $0x88] sm:$0xff]  }
0x203d   : > { %v6643_v10 = vadd.f32 %v7788_v25, %v6633_v50  ;;  %8192 = vmatpush3.bf16.msra.mxu0 %v8940_v22 }
0x203e   : > { %8193 = vmatprep.subr.bf16.mxu0 %v8941_v34 }
0x203f   : > { %v6645_v46 = vpack.c.bf16 %v6643_v10, %v6642_v13 }
0x2041   : > { %8194 = vmatpush3.bf16.msra.mxu0 %v8942_v28 }
0x2042   : > { %8195 = vmatprep.subr.bf16.mxu0 %v8943_v39 }
0x2043   : > { %6799 = vmatmul.mubr.bf16.gmra.mrb[164].mxu1 %v6645_v46 }
0x2045   : > { %8196 = vmatpush3.bf16.msra.mxu0 %v8944_v36 }
0x2046   : > { %8197 = vmatprep.subr.bf16.mxu0 %v8945_v48 }
0x2049   : > { %8198 = vmatpush3.bf16.msra.mxu0 %v8946_v57 }
0x204a   : > { %8199 = vmatprep.subr.bf16.mxu0 %v8947_v17 }
0x204d   : > { %8200 = vmatpush3.bf16.msra.mxu0 %v8948_v27 }
0x204e   : > { %8201 = vmatprep.subr.bf16.mxu0 %v8949_v21 }
0x2051   : > { %8202 = vmatpush3.bf16.msra.mxu0 %v8950_v59 }
0x2052   : > { %8203 = vmatprep.subr.bf16.mxu0 %v8951_v24 }
0x2055   : > { %8204 = vmatpush3.bf16.msra.mxu0 %v8952_v15 }
0x210e   : > { %v6790_v5 = vpop.f32.mrb[160].mxu1 }
0x210f   : > { %v6791_v42 = vadd.f32 %v6790_v5, %v6669_v9  ;;  %v6792_v1 = vpop.f32.mrb[161].mxu1 }
0x2110   : > { %v11041_v3 = vadd.f32 %v6792_v1, %v6673_v20  ;;  %v6794_v41 = vpop.f32.mrb[162].mxu1 }
0x2111   : > { %v11043_v52 = vmul.f32 0.70710677, %v6791_v42  ;;  %v11045_v38 = vadd.f32 %v6794_v41, %v6669_v9  ;;  %v6796_v45 = vpop.f32.mrb[163].mxu1  ;;  %v11085_v22 = vmul.f32 0.5, %v6791_v42 }
0x2112   : > { %v11048_v31 = vmul.f32 0.70710677, %v11041_v3  ;;  %v11050_v7 = vadd.f32 %v6796_v45, %v6673_v20 }
0x2113   : > { %v6825_v0 = vand.u32 2147483647, %v11043_v52  ;;  %v11054_v2 = vmul.f32 0.70710677, %v11045_v38  ;;  %vm6985_vm15 = vcmp.ge.f32.partialorder %v11043_v52, 0.0 }
0x2114   : > { %v6826_v55 = vand.u32 2147483647, %v11048_v31  ;;  %v11058_v32 = vmul.f32 0.70710677, %v11050_v7  ;;  %vm6986_vm0 = vcmp.ge.f32.partialorder %v11048_v31, 0.0 }
0x2115   : > { %v6833_v37 = vmul.f32 0.3275911, %v6825_v0  ;;  %v6827_v43 = vand.u32 2147483647, %v11054_v2  ;;  %v6937_v51 = vsub.f32 0.0, %v6825_v0  ;;  %vm6987_vm1 = vcmp.ge.f32.partialorder %v11054_v2, 0.0 }
0x2116   : > { %v6834_v58 = vmul.f32 0.3275911, %v6826_v55  ;;  %v6828_v60 = vand.u32 2147483647, %v11058_v32  ;;  %v6800_v6 = vpop.f32.mrb[164].mxu1  ;;  %v6938_v19 = vsub.f32 0.0, %v6826_v55 }
0x2117   : > { %v6841_v49 = vadd.f32 1.0, %v6833_v37  ;;  %v6835_v30 = vmul.f32 0.3275911, %v6827_v43  ;;  %v6802_v8 = vpop.f32.mrb[165].mxu1  ;;  %v11062_v25 = vadd.f32 %v6800_v6, %v6669_v9  ;;  %v6939_v10 = vsub.f32 0.0, %v6827_v43 }
0x2118   : > { %v6842_v63 = vadd.f32 1.0, %v6834_v58  ;;  %v6836_v40 = vmul.f32 0.3275911, %v6828_v60  ;;  %v6804_v4 = vpop.f32.mrb[166].mxu1  ;;  %v11064_v18 = vadd.f32 %v6802_v8, %v6673_v20  ;;  %v6940_v13 = vsub.f32 0.0, %v6828_v60 }
0x2119   : > { %9153 = vrcp.f32 %v6841_v49  ;;  %v6843_v62 = vadd.f32 1.0, %v6835_v30  ;;  %v6806_v56 = vpop.f32.mrb[167].mxu1  ;;  %v11066_v61 = vadd.f32 %v6804_v4, %v6669_v9  ;;  %v11069_v12 = vmul.f32 0.70710677, %v11062_v25 }
0x211a   : > { %9155 = vrcp.f32 %v6842_v63  ;;  %v6844_v33 = vadd.f32 1.0, %v6836_v40  ;;  %v11071_v16 = vadd.f32 %v6806_v56, %v6673_v20  ;;  %v11074_v35 = vmul.f32 0.70710677, %v11064_v18 }
0x211b   : > { %9157 = vrcp.f32 %v6843_v62  ;;  %v11077_v26 = vmul.f32 0.70710677, %v11066_v61  ;;  %v6829_v50 = vand.u32 2147483647, %v11069_v12  ;;  %v6945_v34 = vmul.f32 %v6937_v51, %v6825_v0 }
0x211c   : > { %9159 = vrcp.f32 %v6844_v33  ;;  %v6830_v46 = vand.u32 2147483647, %v11074_v35  ;;  %v11083_v11 = vmul.f32 0.70710677, %v11071_v16  ;;  %v6946_v48 = vmul.f32 %v6938_v19, %v6826_v55 }
0x211d   : > { %v6831_v23 = vand.u32 2147483647, %v11077_v26  ;;  %v6837_v53 = vmul.f32 0.3275911, %v6829_v50  ;;  %v6941_v17 = vsub.f32 0.0, %v6829_v50  ;;  %v6947_v24 = vmul.f32 %v6939_v10, %v6827_v43 }
0x211e   : > { %v6838_v28 = vmul.f32 0.3275911, %v6830_v46  ;;  %v6832_v27 = vand.u32 2147483647, %v11083_v11  ;;  %v6948_v15 = vmul.f32 %v6940_v13, %v6828_v60  ;;  %v6942_v20 = vsub.f32 0.0, %v6830_v46 }
0x211f   : > { %v6839_v39 = vmul.f32 0.3275911, %v6831_v23  ;;  %v6845_v57 = vadd.f32 1.0, %v6837_v53  ;;  %v6953_v1 = vmul.f32 1.442695, %v6945_v34  ;;  %v6949_v37 = vmul.f32 %v6941_v17, %v6829_v50 }
0x2120   : > { %v6846_v44 = vadd.f32 1.0, %v6838_v28  ;;  %v6840_v41 = vmul.f32 0.3275911, %v6832_v27  ;;  %v6955_v55 = vmul.f32 1.442695, %v6946_v48  ;;  %v6943_v58 = vsub.f32 0.0, %v6831_v23 }
0x2121   : > { %9161 = vrcp.f32 %v6845_v57  ;;  %v6847_v5 = vadd.f32 1.0, %v6839_v39  ;;  %v6957_v60 = vmul.f32 1.442695, %v6947_v24  ;;  %v6959_v40 = vmul.f32 1.442695, %v6948_v15 }
0x2122   : > { %9163 = vrcp.f32 %v6846_v44  ;;  %v6848_v30 = vadd.f32 1.0, %v6840_v41  ;;  %v6950_v8 = vmul.f32 %v6942_v20, %v6830_v46  ;;  %v6961_v51 = vmul.f32 1.442695, %v6949_v37 }
0x2123   : > { %v11087_v36 = vpop.eup %9153  ;;  %9165 = vrcp.f32 %v6847_v5  ;;  %v6951_v19 = vmul.f32 %v6943_v58, %v6831_v23  ;;  %v6944_v34 = vsub.f32 0.0, %v6832_v27  ;;  %v11109_v23 = vmul.f32 0.5, %v11041_v3 }
0x2124   : > { %v11090_v21 = vpop.eup %9155  ;;  %v6865_v59 = vmul.f32 1.0614054, %v11087_v36  ;;  %9167 = vpow2.f32 %v6953_v1  ;;  %v6963_v46 = vmul.f32 1.442695, %v6950_v8  ;;  %vm6988_vm2 = vcmp.ge.f32.partialorder %v11058_v32, 0.0 }
0x2125   : > { %v6866_v9 = vmul.f32 1.0614054, %v11090_v21  ;;  %v11094_v45 = vpop.eup %9157  ;;  %9169 = vrcp.f32 %v6848_v30  ;;  %v6952_v1 = vmul.f32 %v6944_v34, %v6832_v27  ;;  %vm6989_vm3 = vcmp.ge.f32.partialorder %v11069_v12, 0.0 }
0x2126   : > { %v6873_v42 = vadd.f32 -1.4531521, %v6865_v59  ;;  %v6867_v43 = vmul.f32 1.0614054, %v11094_v45  ;;  %v11098_v6 = vpop.eup %9159  ;;  %9171 = vpow2.f32 %v6955_v55  ;;  %v6965_v59 = vmul.f32 1.442695, %v6951_v19 }
0x2127   : > { %v6874_v0 = vadd.f32 -1.4531521, %v6866_v9  ;;  %v6868_v56 = vmul.f32 1.0614054, %v11098_v6  ;;  %9173 = vpow2.f32 %v6957_v60  ;;  %vm6991_vm4 = vcmp.ge.f32.partialorder %v11077_v26, 0.0 }
0x2128   : > { %v6881_v49 = vmul.f32 %v11087_v36, %v6873_v42  ;;  %v6875_v4 = vadd.f32 -1.4531521, %v6867_v43  ;;  %9175 = vpow2.f32 %v6959_v40  ;;  %vm6990_vm5 = vcmp.ge.f32.partialorder %v11074_v35, 0.0 }
0x2129   : > { %v6882_v63 = vmul.f32 %v11090_v21, %v6874_v0  ;;  %v6876_v13 = vadd.f32 -1.4531521, %v6868_v56  ;;  %9177 = vpow2.f32 %v6961_v51  ;;  %v6967_v56 = vmul.f32 1.442695, %v6952_v1 }
0x212a   : > { %v6889_v62 = vadd.f32 1.4214138, %v6881_v49  ;;  %v6883_v10 = vmul.f32 %v11094_v45, %v6875_v4  ;;  %9179 = vpow2.f32 %v6963_v46  ;;  %v11123_v49 = vmul.f32 0.5, %v11045_v38 }
0x212b   : > { %v6890_v33 = vadd.f32 1.4214138, %v6882_v63  ;;  %v6884_v48 = vmul.f32 %v11098_v6, %v6876_v13  ;;  %v11106_v57 = vpop.eup %9161  ;;  %9181 = vpow2.f32 %v6965_v59  ;;  %vm6992_vm6 = vcmp.ge.f32.partialorder %v11083_v11, 0.0 }
0x212c   : > { %v6897_v50 = vmul.f32 %v11087_v36, %v6889_v62  ;;  %v6891_v39 = vadd.f32 1.4214138, %v6883_v10  ;;  %v11111_v24 = vpop.eup %9163  ;;  %v6869_v20 = vmul.f32 1.0614054, %v11106_v57  ;;  %9183 = vpow2.f32 %v6967_v56 }
0x212d   : > { %v6898_v53 = vmul.f32 %v11090_v21, %v6890_v33  ;;  %v6892_v9 = vadd.f32 1.4214138, %v6884_v48  ;;  %v6870_v42 = vmul.f32 1.0614054, %v11111_v24  ;;  %v11119_v37 = vpop.eup %9165  ;;  %v6814_v26 = vmul.f32 0.5, %v11064_v18 }
0x212e   : > { %v6905_v28 = vadd.f32 -0.28449672, %v6897_v50  ;;  %v6899_v44 = vmul.f32 %v11094_v45, %v6891_v39  ;;  %v6877_v55 = vadd.f32 -1.4531521, %v6869_v20  ;;  %v9168_v60 = vpop.eup %9167  ;;  %v6871_v38 = vmul.f32 1.0614054, %v11119_v37 }
0x212f   : > { %v6906_v17 = vadd.f32 -0.28449672, %v6898_v53  ;;  %v6900_v0 = vmul.f32 %v11098_v6, %v6892_v9  ;;  %v6878_v43 = vadd.f32 -1.4531521, %v6870_v42  ;;  %v11129_v8 = vpop.eup %9169 }
0x2130   : > { %v6913_v15 = vmul.f32 %v11087_v36, %v6905_v28  ;;  %v6907_v41 = vadd.f32 -0.28449672, %v6899_v44  ;;  %v6885_v40 = vmul.f32 %v11106_v57, %v6877_v55  ;;  %v9172_v33 = vpop.eup %9171  ;;  %v6879_v46 = vadd.f32 -1.4531521, %v6871_v38 }
0x2131   : > { %v6914_v5 = vmul.f32 %v11090_v21, %v6906_v17  ;;  %v6908_v63 = vadd.f32 -0.28449672, %v6900_v0  ;;  %v6886_v4 = vmul.f32 %v11111_v24, %v6878_v43  ;;  %v9174_v10 = vpop.eup %9173  ;;  %v6872_v34 = vmul.f32 1.0614054, %v11129_v8 }
0x2132   : > { %v6921_v3 = vadd.f32 0.2548296, %v6913_v15  ;;  %v6915_v27 = vmul.f32 %v11094_v45, %v6907_v41  ;;  %v6893_v50 = vadd.f32 1.4214138, %v6885_v40  ;;  %v6887_v9 = vmul.f32 %v11119_v37, %v6879_v46 }
0x2133   : > { %v6922_v58 = vadd.f32 0.2548296, %v6914_v5  ;;  %v6894_v53 = vadd.f32 1.4214138, %v6886_v4  ;;  %v6880_v20 = vadd.f32 -1.4531521, %v6872_v34 }
0x2134   : > { %v6929_v30 = vmul.f32 %v11087_v36, %v6921_v3  ;;  %v6923_v19 = vadd.f32 0.2548296, %v6915_v27  ;;  %v6916_v36 = vmul.f32 %v11098_v6, %v6908_v63  ;;  %v6901_v17 = vmul.f32 %v11106_v57, %v6893_v50 }
0x2135   : > { %v6930_v62 = vmul.f32 %v11090_v21, %v6922_v58  ;;  %v9176_v21 = vpop.eup %9175  ;;  %v6902_v44 = vmul.f32 %v11111_v24, %v6894_v53  ;;  %v6895_v58 = vadd.f32 1.4214138, %v6887_v9 }
0x2136   : > { %v6969_v51 = vmul.f32 %v9168_v60, %v6929_v30  ;;  %v6931_v39 = vmul.f32 %v11094_v45, %v6923_v19  ;;  %v6924_v48 = vadd.f32 0.2548296, %v6916_v36  ;;  %v9178_v59 = vpop.eup %9177  ;;  %v6909_v3 = vadd.f32 -0.28449672, %v6901_v17 }
0x2137   : > { %v6970_v13 = vmul.f32 %v9172_v33, %v6930_v62  ;;  %v9180_v41 = vpop.eup %9179  ;;  %v6910_v55 = vadd.f32 -0.28449672, %v6902_v44  ;;  %v6888_v45 = vmul.f32 %v11129_v8, %v6880_v20  ;;  %v6903_v62 = vmul.f32 %v11119_v37, %v6895_v58 }
0x2138   : > { %v6977_v28 = vsub.f32 1.0, %v6969_v51  ;;  %v6971_v42 = vmul.f32 %v9174_v10, %v6931_v39  ;;  %v6932_v1 = vmul.f32 %v11098_v6, %v6924_v48  ;;  %v6917_v27 = vmul.f32 %v11106_v57, %v6909_v3  ;;  %v9182_v63 = vpop.eup %9181 }
0x2139   : > { %v6978_v15 = vsub.f32 1.0, %v6970_v13  ;;  %v6918_v6 = vmul.f32 %v11111_v24, %v6910_v55  ;;  %v6911_v19 = vadd.f32 -0.28449672, %v6903_v62  ;;  %v6896_v36 = vadd.f32 1.4214138, %v6888_v45 }
0x213a   : > { %v6993_v5 = vsub.f32 0.0, %v6977_v28  ;;  %v6979_v60 = vsub.f32 1.0, %v6971_v42  ;;  %v6972_v30 = vmul.f32 %v9176_v21, %v6932_v1  ;;  %v6925_v51 = vadd.f32 0.2548296, %v6917_v27 }
0x213b   : > { %v6994_v0 = vsub.f32 0.0, %v6978_v15  ;;  %v6926_v52 = vadd.f32 0.2548296, %v6918_v6  ;;  %v6919_v34 = vmul.f32 %v11119_v37, %v6911_v19  ;;  %v6904_v21 = vmul.f32 %v11129_v8, %v6896_v36  ;;  %v7855_v19 = vld [vmem:[%s11235_s14 + $0x1] ss:$0 sm:$0xff] }
0x213c   : > { %v7001_v43 = vsel %vm6985_vm15, %v6977_v28, %v6993_v5  ;;  %v6995_v38 = vsub.f32 0.0, %v6979_v60  ;;  %v6980_v33 = vsub.f32 1.0, %v6972_v30  ;;  %v6933_v13 = vmul.f32 %v11106_v57, %v6925_v51 }
0x213d   : > { %v7002_v40 = vsel %vm6986_vm0, %v6978_v15, %v6994_v0  ;;  %v7009_v4 = vadd.f32 1.0, %v7001_v43  ;;  %v6934_v46 = vmul.f32 %v11111_v24, %v6926_v52  ;;  %v6812_v39 = vmul.f32 0.5, %v11050_v7 }
0x213e   : > { %v7010_v50 = vadd.f32 1.0, %v7002_v40  ;;  %v7003_v10 = vsel %vm6987_vm1, %v6979_v60, %v6995_v38  ;;  %v6996_v31 = vsub.f32 0.0, %v6980_v33  ;;  %v6973_v48 = vmul.f32 %v9178_v59, %v6933_v13  ;;  %v9184_v59 = vpop.eup %9183 }
0x213f   : > { %v7011_v53 = vadd.f32 1.0, %v7003_v10  ;;  %v7017_v28 = vmul.f32 %v7009_v4, %v11085_v22  ;;  %v6974_v15 = vmul.f32 %v9180_v41, %v6934_v46  ;;  %v6927_v57 = vadd.f32 0.2548296, %v6919_v34 }
0x2140   : > { %v7004_v56 = vsel %vm6988_vm2, %v6980_v33, %v6996_v31  ;;  %v6981_v44 = vsub.f32 1.0, %v6973_v48  ;;  %v6912_v9 = vadd.f32 -0.28449672, %v6904_v21  ;;  %v7018_v24 = vmul.f32 %v7010_v50, %v11109_v23 }
0x2141   : > { %v7019_v2 = vmul.f32 %v7011_v53, %v11123_v49  ;;  %v7012_v17 = vadd.f32 1.0, %v7004_v56  ;;  %v6935_v42 = vmul.f32 %v11119_v37, %v6927_v57  ;;  %v6982_v1 = vsub.f32 1.0, %v6974_v15 }
0x2142   : > { %v6997_v22 = vsub.f32 0.0, %v6981_v44  ;;  %v6920_v7 = vmul.f32 %v11129_v8, %v6912_v9  ;;  %v6813_v43 = vmul.f32 0.5, %v11062_v25  ;;  %v6815_v30 = vmul.f32 0.5, %v11066_v61 }
0x2143   : > { %v7025_v20 = vpack.c.bf16 %v7019_v2, %v7017_v28  ;;  %v7020_v5 = vmul.f32 %v7012_v17, %v6812_v39  ;;  %v6975_v32 = vmul.f32 %v9182_v63, %v6935_v42  ;;  %v6998_v55 = vsub.f32 0.0, %v6982_v1 }
0x2144   : > { %v6928_v49 = vadd.f32 0.2548296, %v6920_v7  ;;  %v7005_v41 = vsel %vm6989_vm3, %v6981_v44, %v6997_v22  ;;  %v6816_v25 = vmul.f32 0.5, %v11071_v16 }
0x2145   : > { %v7026_v3 = vpack.c.bf16 %v7020_v5, %v7018_v24  ;;  %v6983_v0 = vsub.f32 1.0, %v6975_v32  ;;  %v7013_v45 = vadd.f32 1.0, %v7005_v41  ;;  %v7006_v12 = vsel %vm6990_vm5, %v6982_v1, %v6998_v55  ;;  %v8955_v41 = vld [vmem:[%s11238_s17 + $0x10] sm:$0xff]   ;;  %v8957_v55 = vld [vmem:[%s11238_s17 + $0x20] sm:$0xff]  }
0x2146   : > { %v6936_v23 = vmul.f32 %v11129_v8, %v6928_v49  ;;  %v7014_v8 = vadd.f32 1.0, %v7006_v12  ;;  %v8953_v49 = vld [vmem:[%s11238_s17] sm:$0xff]  }
0x2147   : > { %7198 = vmatprep.mubr.bf16.mxu0 %v7026_v3  ;;  %v6999_v58 = vsub.f32 0.0, %v6983_v0  ;;  %v7021_v40 = vmul.f32 %v7013_v45, %v6813_v43  ;;  %8691 = vmatprep.subr.bf16.mxu1 %v8953_v49  ;;  %v8960_v45 = vld [vmem:[%s11238_s17 + $0x38] sm:$0xff]  }
0x2148   : > { %7199 = vmatmul.mubr.bf16.vlgmr.msra.gmra.mrb[168].mxu0 %v7025_v20  ;;  %v6976_v37 = vmul.f32 %v9184_v59, %v6936_v23  ;;  %v7022_v35 = vmul.f32 %v7014_v8, %v6814_v26  ;;  %v8954_v59 = vld [vmem:[%s11238_s17 + $0x8] sm:$0xff]   ;;  %8692 = vmatpush3.bf16.msra.mxu1 %v8953_v49 }
0x2149   : > { %v7007_v60 = vsel %vm6991_vm4, %v6983_v0, %v6999_v58  ;;  %8693 = vmatprep.subr.bf16.mxu1 %v8954_v59  ;;  %v8956_v0 = vld [vmem:[%s11238_s17 + $0x18] sm:$0xff]   ;;  %v8958_v23 = vld [vmem:[%s11238_s17 + $0x28] sm:$0xff]   ;;  %v8959_v58 = vld [vmem:[%s11238_s17 + $0x30] sm:$0xff]  }
0x214a   : > { %v7015_v27 = vadd.f32 1.0, %v7007_v60  ;;  %v6984_v63 = vsub.f32 1.0, %v6976_v37 }
0x214c   : > { %v7023_v6 = vmul.f32 %v7015_v27, %v6815_v30  ;;  %v7000_v62 = vsub.f32 0.0, %v6984_v63  ;;  %8694 = vmatpush3.bf16.msra.mxu1 %v8954_v59 }
0x214d   : > { %8695 = vmatprep.subr.bf16.mxu1 %v8955_v41 }
0x214e   : > { %v7008_v4 = vsel %vm6992_vm6, %v6984_v63, %v7000_v62  ;;  %v7027_v38 = vpack.c.bf16 %v7023_v6, %v7021_v40  ;;  %v7872_v40 = vld [vmem:[%s11236_s15] ss:$0 sm:$0xff] }
0x214f   : > { %v7016_v33 = vadd.f32 1.0, %v7008_v4 }
0x2150   : > { %8696 = vmatpush3.bf16.msra.mxu1 %v8955_v41 }
0x2151   : > { %v7024_v51 = vmul.f32 %v7016_v33, %v6816_v25  ;;  %8697 = vmatprep.subr.bf16.mxu1 %v8956_v0 }
0x2153   : > { %v7028_v52 = vpack.c.bf16 %v7024_v51, %v7022_v35  ;;  %v7873_v51 = vld [vmem:[%s11237_s16] ss:$0 sm:$0xff] }
0x2154   : > { %8698 = vmatpush3.bf16.msra.mxu1 %v8956_v0 }
0x2155   : > { %7206 = vmatprep.mubr.bf16.mxu0 %v7028_v52  ;;  %8699 = vmatprep.subr.bf16.mxu1 %v8957_v55 }
0x2156   : > { %7207 = vmatmul.mubr.bf16.gmra.mrb[172].mxu0 %v7027_v38 }
0x2158   : > { %8700 = vmatpush3.bf16.msra.mxu1 %v8957_v55 }
0x2159   : > { %8701 = vmatprep.subr.bf16.mxu1 %v8958_v23 }
0x215c   : > { %8702 = vmatpush3.bf16.msra.mxu1 %v8958_v23 }
0x215d   : > { %8703 = vmatprep.subr.bf16.mxu1 %v8959_v58 }
0x2160   : > { %8704 = vmatpush3.bf16.msra.mxu1 %v8959_v58 }
0x2161   : > { %8705 = vmatprep.subr.bf16.mxu1 %v8960_v45 }
0x2164   : > { %8706 = vmatpush3.bf16.msra.mxu1 %v8960_v45 }
0x221b   : > { %v8205_v61 = vpop.f32.mrb[168].mxu0 }
0x221c   : > { %v8206_v36 = vpop.f32.mrb[169].mxu0 }
0x221d   : > { %v8207_v50 = vadd.f32 %v8206_v36, %v8205_v61  ;;  %v8208_v11 = vpop.f32.mrb[170].mxu0 }
0x221e   : > { %v8209_v10 = vpop.f32.mrb[171].mxu0 }
0x221f   : > { %v7201_v31 = vadd.f32 %v8207_v50, %v7855_v19  ;;  %v8210_v13 = vadd.f32 %v8209_v10, %v8208_v11 }
0x2221   : > { %v7204_v18 = vadd.f32 %v8210_v13, %v7855_v19  ;;  %v7215_v16 = vadd.f32 %v7201_v31, %v10914_v14 }
0x2223   : > { %7221 = vadd.xlane.f32.xlu0 %v7215_v16  ;;  %v7216_v53 = vadd.f32 %v7204_v18, %v10917_v29 }
0x2225   : > { %7223 = vadd.xlane.f32.xlu1 %v7216_v53 }
0x2229   : > { %v8211_v46 = vpop.f32.mrb[172].mxu0 }
0x222a   : > { %v8212_v34 = vpop.f32.mrb[173].mxu0 }
0x222b   : > { %v8213_v21 = vadd.f32 %v8212_v34, %v8211_v46  ;;  %v8214_v28 = vpop.f32.mrb[174].mxu0 }
0x222c   : > { %v8215_v39 = vpop.f32.mrb[175].mxu0 }
0x222d   : > { %v7209_v56 = vadd.f32 %v8213_v21, %v7855_v19  ;;  %v8216_v48 = vadd.f32 %v8215_v39, %v8214_v28  ;;  %v7874_v21 = vld [vmem:[%s11239_s18] ss:$0 sm:$0xff] }
0x222f   : > { %v7212_v2 = vadd.f32 %v8216_v48, %v7855_v19  ;;  %v7217_v17 = vadd.f32 %v7209_v56, %v10921_v54 }
0x2231   : > { %7225 = vadd.xlane.f32.xlu0 %v7217_v17  ;;  %v7218_v15 = vadd.f32 %v7212_v2, %v10926_v47 }
0x2233   : > { %7227 = vadd.xlane.f32.xlu1 %v7218_v15 }
0x22b0   : > { %v7222_v57 = vpop.xlane.xlu0 %7221 }
0x22b1   : > { %v7229_v14 = vmul.f32 0.0078125, %v7222_v57 }
0x22b2   : > { %v7224_v44 = vpop.xlane.xlu1 %7223 }
0x22b3   : > { %v7233_v9 = vsub.f32 %v7215_v16, %v7229_v14  ;;  %v7230_v29 = vmul.f32 0.0078125, %v7224_v44 }
0x22b5   : > { %v7234_v24 = vsub.f32 %v7216_v53, %v7230_v29  ;;  %v7237_v20 = vmul.f32 %v7233_v9, %v7233_v9 }
0x22b7   : > { %7241 = vadd.xlane.f32.xlu0 %v7237_v20  ;;  %v7238_v5 = vmul.f32 %v7234_v24, %v7234_v24 }
0x22b9   : > { %7243 = vadd.xlane.f32.xlu1 %v7238_v5 }
0x22be   : > { %v7226_v42 = vpop.xlane.xlu0 %7225 }
0x22bf   : > { %v7231_v22 = vmul.f32 0.0078125, %v7226_v42 }
0x22c0   : > { %v7228_v1 = vpop.xlane.xlu1 %7227 }
0x22c1   : > { %v7235_v7 = vsub.f32 %v7217_v17, %v7231_v22  ;;  %v7232_v32 = vmul.f32 0.0078125, %v7228_v1 }
0x22c3   : > { %v7236_v54 = vsub.f32 %v7218_v15, %v7232_v32  ;;  %v7239_v3 = vmul.f32 %v7235_v7, %v7235_v7 }
0x22c5   : > { %7245 = vadd.xlane.f32.xlu0 %v7239_v3  ;;  %v7240_v47 = vmul.f32 %v7236_v54, %v7236_v54 }
0x22c7   : > { %7247 = vadd.xlane.f32.xlu1 %v7240_v47 }
0x2344   : > { %v7242_v37 = vpop.xlane.xlu0 %7241 }
0x2345   : > { %v7249_v43 = vmul.f32 0.0078125, %v7242_v37 }
0x2346   : > { %v7244_v60 = vpop.xlane.xlu1 %7243 }
0x2347   : > { %v7253_v12 = vadd.f32 1e-12, %v7249_v43  ;;  %v7250_v30 = vmul.f32 0.0078125, %v7244_v60 }
0x2349   : > { %9185 = vrsqrt.f32 %v7253_v12  ;;  %v7254_v27 = vadd.f32 1e-12, %v7250_v30 }
0x234b   : > { %9187 = vrsqrt.f32 %v7254_v27 }
0x2352   : > { %v7246_v6 = vpop.xlane.xlu0 %7245 }
0x2353   : > { %v9186_v63 = vpop.eup %9185  ;;  %v7251_v4 = vmul.f32 0.0078125, %v7246_v6 }
0x2354   : > { %v7261_v62 = vmul.f32 %v9186_v63, %v7233_v9  ;;  %v7248_v38 = vpop.xlane.xlu1 %7247 }
0x2355   : > { %v9188_v8 = vpop.eup %9187  ;;  %v7255_v33 = vadd.f32 1e-12, %v7251_v4  ;;  %v7252_v35 = vmul.f32 0.0078125, %v7248_v38 }
0x2356   : > { %v7262_v26 = vmul.f32 %v9188_v8, %v7234_v24  ;;  %v7271_v25 = vmul.f32 %v7872_v40, %v7261_v62 }
0x2357   : > { %9189 = vrsqrt.f32 %v7255_v33  ;;  %v7256_v61 = vadd.f32 1e-12, %v7252_v35 }
0x2358   : > { %v7272_v52 = vmul.f32 %v7872_v40, %v7262_v26  ;;  %v7281_v19 = vadd.f32 %v7873_v51, %v7271_v25 }
0x2359   : > { %9191 = vrsqrt.f32 %v7256_v61 }
0x235a   : > { %v7282_v36 = vadd.f32 %v7873_v51, %v7272_v52 }
0x235c   : > { %v7285_v50 = vpack.c.bf16 %v7282_v36, %v7281_v19 }
0x235e   : > { %8707 = vmatprep.mubr.bf16.mxu1 %v7285_v50 }
0x2361   : > { %v9190_v11 = vpop.eup %9189 }
0x2362   : > { %v7263_v10 = vmul.f32 %v9190_v11, %v7235_v7 }
0x2363   : > { %v9192_v31 = vpop.eup %9191 }
0x2364   : > { %v7264_v13 = vmul.f32 %v9192_v31, %v7236_v54  ;;  %v7273_v18 = vmul.f32 %v7872_v40, %v7263_v10 }
0x2366   : > { %v7274_v16 = vmul.f32 %v7872_v40, %v7264_v13  ;;  %v7283_v53 = vadd.f32 %v7873_v51, %v7273_v18 }
0x2368   : > { %v7284_v46 = vadd.f32 %v7873_v51, %v7274_v16 }
0x236a   : > { %v7286_v34 = vpack.c.bf16 %v7284_v46, %v7283_v53 }
0x236c   : > { %8708 = vmatmul.mubr.bf16.vlgmr.msra.gmra.mrb[168].mxu1 %v7286_v34 }
0x243f   : > { %v8709_v28 = vpop.f32.mrb[168].mxu1 }
0x2440   : > { %v7392_v39 = vpop.f32.mrb[169].mxu1  ;;  %v7401_v15 = vadd.f32 %v8709_v28, %v7874_v21 }
0x2441   : > { %v7393_v56 = vadd.f32 %v7874_v21, %v7392_v39  ;;  %v8710_v48 = vpop.f32.mrb[170].mxu1 }
0x2442   : > { %v7395_v2 = vpop.f32.mrb[171].mxu1  ;;  %v7404_v57 = vadd.f32 %v8710_v48, %v7874_v21  ;;  %7409 = vst [vmem:[%s607_s28 + $0x10] sm:$0xff] %v7401_v15 }
0x2443   : > { %7407 = vst [vmem:[%s607_s28] sm:$0xff] %v7393_v56  ;;  %v7396_v17 = vadd.f32 %v7874_v21, %v7395_v2 }
0x2444   : > { %7410 = vst [vmem:[%s607_s28 + $0x18] sm:$0xff] %v7404_v57 }
0x2445   : > { %7408 = vst [vmem:[%s607_s28 + $0x8] sm:$0xff] %v7396_v17 }
0x2446 PF: > { %s29_s0 = sadd.s32 1, %s9199_s0  }
0x2447   : > { %p26_p4 = scmp.ge.s32.totalorder %s29_s0, 4  }
0x2449   :  { %28 = sbr.rel (!%p26_p4) target bundleno = 5 (0x5), region = 138 }

</bundles_post_ra>
